<compile_context>
chip_gen: v7x
topology: tpu7x:2x2x1
jax: 0.10.0
libtpu: 0.0.40
codegen_flags: <defaults>
</compile_context>

<pallas_src>
import functools
import math

import jax
import jax.numpy as jnp
from jax.experimental import pallas as pl
from jax.experimental.pallas import tpu as pltpu


# ----------------------------------------------------------------------------
# helpers
# ----------------------------------------------------------------------------
def _pick_tile(m, preferred=256, align=8):
    """Largest multiple-of-`align` divisor of m that is <= preferred (else full m)."""
    if m <= preferred:
        return m
    t = (preferred // align) * align
    while t >= align:
        if m % t == 0:
            return t
        t -= align
    return m


# ----------------------------------------------------------------------------
# generic row-tiled linear (bf16 MXU operands, f32 accumulation, bf16/f32 out)
# ----------------------------------------------------------------------------
def _linear_kernel(x_ref, w_ref, b_ref, o_ref, *, activation):
    y = jnp.dot(x_ref[...].astype(jnp.bfloat16), w_ref[...],
                preferred_element_type=jnp.float32)
    y = y + b_ref[...]
    if activation == "silu":
        y = y * jax.nn.sigmoid(y)          # f32 elementwise (v5e-friendly)
    o_ref[...] = y.astype(o_ref.dtype)


def pallas_linear(x, w, b, activation=None, out_dtype=jnp.float32, tile_m=256):
    """y = act(x @ w + b); x: (M, K), w: (K, N) bf16, b: (N,) f32."""
    M, K = x.shape
    N = w.shape[1]
    tm = _pick_tile(M, tile_m)
    kernel = functools.partial(_linear_kernel, activation=activation)
    return pl.pallas_call(
        kernel,
        out_shape=jax.ShapeDtypeStruct((M, N), out_dtype),
        grid=(M // tm,),
        in_specs=[
            pl.BlockSpec((tm, K), lambda i: (i, 0)),
            # TODO(synk): tile K/N (extra 'arbitrary' grid axes) + vmem_limit_bytes before
            # scaling to real PaliGemma dims -- whole-weight replication blows v7x 64 MiB VMEM.
            pl.BlockSpec((K, N), lambda i: (0, 0)),
            pl.BlockSpec((1, N), lambda i: (0, 0)),
        ],
        out_specs=pl.BlockSpec((tm, N), lambda i: (i, 0)),
        compiler_params=pltpu.CompilerParams(dimension_semantics=("parallel",)),
    )(x, w, b.reshape(1, N))


# ----------------------------------------------------------------------------
# fused suffix embedding: flow interp + action_in_proj + time-MLP
# (rows flattened to (B*N, .), single grid step; time part of the concat-MLP is
#  hoisted to the wrapper so the kernel never repeats a (1,D)x(D,D) matmul)
# ----------------------------------------------------------------------------
def _suffix_fused_kernel(time_ref, noise_ref, act_ref, tpart_ref,
                         wai_ref, bai_ref, wmia_ref, bmi_ref, wmo_ref, bmo_ref,
                         at_ref, ut_ref):
    t = time_ref[...]                                   # (BN, A_pad), same value per lane
    noise = noise_ref[...]                              # (BN, A_pad) f32
    actions = act_ref[...]                              # (BN, A_pad) f32
    x_t = t * noise + (1.0 - t) * actions               # flow-matching interpolation
    ut_ref[...] = noise - actions                       # u_t target (f32 for the loss)

    a_emb = jnp.dot(x_t.astype(jnp.bfloat16), wai_ref[...],
                    preferred_element_type=jnp.float32) + bai_ref[...]          # (BN, D)
    # mlp_in(concat([a, t])) == a @ W[:D] + (t_emb @ W[D:]) + b ; the time part is
    # precomputed once per batch row and broadcast -- the concat never materializes.
    h = jnp.dot(a_emb.astype(jnp.bfloat16), wmia_ref[...],
                preferred_element_type=jnp.float32) + tpart_ref[...] + bmi_ref[...]
    h = h * jax.nn.sigmoid(h)                            # SiLU in f32
    at = jnp.dot(h.astype(jnp.bfloat16), wmo_ref[...],
                 preferred_element_type=jnp.float32) + bmo_ref[...]
    at_ref[...] = at.astype(at_ref.dtype)                # bf16 activation out


def pallas_suffix_fused(time_bn, noise_p, actions_p, t_part_bn, act_in, mlp_in_a, mlp_out):
    w_ai, b_ai = act_in
    w_mi_a, b_mi = mlp_in_a
    w_mo, b_mo = mlp_out
    BN, A_pad = noise_p.shape
    D = w_ai.shape[1]

    def full(shape):
        return pl.BlockSpec(shape, lambda i: (0, 0))

    return pl.pallas_call(
        _suffix_fused_kernel,
        out_shape=(jax.ShapeDtypeStruct((BN, D), jnp.bfloat16),
                   jax.ShapeDtypeStruct((BN, A_pad), jnp.float32)),
        grid=(1,),
        in_specs=[full((BN, A_pad)), full((BN, A_pad)), full((BN, A_pad)), full((BN, D)),
                  full((A_pad, D)), full((1, D)),
                  full((D, D)), full((1, D)),
                  full((D, D)), full((1, D))],
        out_specs=(full((BN, D)), full((BN, A_pad))),
    )(time_bn, noise_p, actions_p, t_part_bn,
      w_ai, b_ai.reshape(1, D), w_mi_a, b_mi.reshape(1, D), w_mo, b_mo.reshape(1, D))


# ----------------------------------------------------------------------------
# fully fused expert layer: fused-QKV proj + masked attention + out-proj residual
# + SiLU MLP residual, one grid step per batch element (whole padded sequence in VMEM)
# ----------------------------------------------------------------------------
def _expert_layer_kernel(x_ref, qv_ref, kv_ref, wqkv_ref, wo_ref, w1_ref, w2_ref,
                         o_ref, *, d_model):
    x = x_ref[0]                                               # (L, D) bf16
    # single 384-wide projection: full MXU column utilization on v6e/v7x; K/V computed once.
    qkv = jnp.dot(x, wqkv_ref[...], preferred_element_type=jnp.float32)
    qkv = qkv.astype(jnp.bfloat16)                             # one cast pass; q/k/v used as bf16
    q = qkv[:, :d_model]                                       # pre-scaled (1/sqrt(D) folded in Wq)
    k = qkv[:, d_model:2 * d_model]
    v = qkv[:, 2 * d_model:]

    s = jax.lax.dot_general(q, k, (((1,), (1,)), ((), ())),
                            preferred_element_type=jnp.float32)   # (L, L)
    # mask[i, j] = (cumsum[j] <= cumsum[i]) & pad[i] & pad[j], encoded in qv/kv values
    mask = kv_ref[0] <= qv_ref[0]                               # (1,L) vs (L,1) -> (L,L)
    s = jnp.where(mask, s, -1e30)

    m = jnp.max(s, axis=-1, keepdims=True)                      # stable softmax (single kv block)
    p = jnp.exp(s - m)
    l = jnp.sum(p, axis=-1, keepdims=True)
    attn = jnp.dot(p.astype(jnp.bfloat16), v, preferred_element_type=jnp.float32)
    attn = attn * pl.reciprocal(l, approx=True)                 # EUP reciprocal

    h1 = x.astype(jnp.float32) + jnp.dot(attn.astype(jnp.bfloat16), wo_ref[...],
                                         preferred_element_type=jnp.float32)   # residual 1
    h = jnp.dot(h1.astype(jnp.bfloat16), w1_ref[...], preferred_element_type=jnp.float32)
    h = h * jax.nn.sigmoid(h)
    out = h1 + jnp.dot(h.astype(jnp.bfloat16), w2_ref[...],
                       preferred_element_type=jnp.float32)                      # residual 2
    o_ref[0] = out.astype(o_ref.dtype)


def pallas_expert_layer(x, qv_col, kv_row, w_qkv, w_o, w1, w2):
    B, L, D = x.shape
    H3 = w_qkv.shape[1]
    H = w1.shape[1]
    # TODO(synk): at real PI0 sequence lengths, re-introduce flash-style q/kv tiling with
    # precomputed K/V and re-budget tiles against v7x's 64 MiB VMEM (vmem_limit_bytes).
    return pl.pallas_call(
        functools.partial(_expert_layer_kernel, d_model=D),
        out_shape=jax.ShapeDtypeStruct((B, L, D), jnp.bfloat16),
        grid=(B,),
        in_specs=[
            pl.BlockSpec((1, L, D), lambda b: (b, 0, 0)),     # token embeddings
            pl.BlockSpec((1, L, 1), lambda b: (b, 0, 0)),     # q-side mask values
            pl.BlockSpec((1, 1, L), lambda b: (b, 0, 0)),     # k-side mask values
            pl.BlockSpec((D, H3), lambda b: (0, 0)),          # fused [Wq/sqrt(D) | Wk | Wv]
            pl.BlockSpec((D, D), lambda b: (0, 0)),           # Wo
            pl.BlockSpec((D, H), lambda b: (0, 0)),           # W1
            pl.BlockSpec((H, D), lambda b: (0, 0)),           # W2
        ],
        out_specs=pl.BlockSpec((1, L, D), lambda b: (b, 0, 0)),
        compiler_params=pltpu.CompilerParams(dimension_semantics=("parallel",)),
    )(x, qv_col, kv_row, w_qkv, w_o, w1, w2)


# ----------------------------------------------------------------------------
# fused action_out_proj + elementwise MSE (rows flattened, single grid step)
# ----------------------------------------------------------------------------
def _vt_loss_kernel(suffix_ref, w_ref, b_ref, ut_ref, loss_ref):
    v_t = jnp.dot(suffix_ref[...].astype(jnp.bfloat16), w_ref[...],
                  preferred_element_type=jnp.float32) + b_ref[...]
    diff = ut_ref[...] - v_t                     # f32 diff preserves MSE precision
    loss_ref[...] = diff * diff


def pallas_vt_loss(suffix_out, w, b, u_t):
    BN, D = suffix_out.shape
    A_pad = w.shape[1]

    def full(shape):
        return pl.BlockSpec(shape, lambda i: (0, 0))

    return pl.pallas_call(
        _vt_loss_kernel,
        out_shape=jax.ShapeDtypeStruct((BN, A_pad), jnp.float32),
        grid=(1,),
        in_specs=[full((BN, D)), full((D, A_pad)), full((1, A_pad)), full((BN, A_pad))],
        out_specs=full((BN, A_pad)),
    )(suffix_out, w, b.reshape(1, A_pad), u_t)


# ----------------------------------------------------------------------------
# plain-JAX glue
# ----------------------------------------------------------------------------
def sinusoidal_pos_embedding(time, dim, min_period, max_period):
    fraction = jnp.linspace(0.0, 1.0, dim // 2, dtype=jnp.float32)
    period = min_period * (max_period / min_period) ** fraction
    scale = (2.0 * math.pi) / period
    sin_input = scale[None, :] * time[:, None]
    return jnp.concatenate([jnp.sin(sin_input), jnp.cos(sin_input)], axis=1)


# ----------------------------------------------------------------------------
# parameters (deterministic synthetic init; weights bf16, biases f32)
# ----------------------------------------------------------------------------
def _init_linear_f32(key, in_dim, out_dim):
    kw, kb = jax.random.split(key)
    w = jax.random.normal(kw, (in_dim, out_dim), jnp.float32) / math.sqrt(in_dim)
    b = 0.01 * jax.random.normal(kb, (out_dim,), jnp.float32)
    return w, b


def init_params(key, cfg):
    D = cfg["proj_width"]
    A = cfg["max_action_dim"]
    A_pad = cfg["action_pad_dim"]
    keys = jax.random.split(key, 12)
    patch_dim = cfg["img_channels"] * cfg["patch_size"] ** 2
    sqrt_d = math.sqrt(D)

    # img_proj: sqrt(D) prefix scaling folded into weight AND bias at init
    w_img, b_img = _init_linear_f32(keys[0], patch_dim, D)
    img_proj = ((w_img * sqrt_d).astype(jnp.bfloat16), b_img * sqrt_d)

    # language embedding table: bf16 with sqrt(D) folded in
    lang_embed = (jax.random.normal(keys[1], (cfg["vocab_size"], D), jnp.float32)
                  * 0.02 * sqrt_d).astype(jnp.bfloat16)

    w_sp, b_sp = _init_linear_f32(keys[2], cfg["max_state_dim"], D)
    state_proj = (w_sp.astype(jnp.bfloat16), b_sp)

    w_ai, b_ai = _init_linear_f32(keys[3], A, D)
    w_ai = jnp.pad(w_ai, ((0, A_pad - A), (0, 0)))          # zero rows: lane padding is inert
    action_in_proj = (w_ai.astype(jnp.bfloat16), b_ai)

    w_mi, b_mi = _init_linear_f32(keys[4], 2 * D, D)
    # split-K of the concat MLP: action half stays in the kernel, time half is hoisted
    action_time_mlp_in = (w_mi[:D].astype(jnp.bfloat16), w_mi[D:].astype(jnp.bfloat16), b_mi)

    w_mo, b_mo = _init_linear_f32(keys[5], D, D)
    action_time_mlp_out = (w_mo.astype(jnp.bfloat16), b_mo)

    w_ao, b_ao = _init_linear_f32(keys[6], D, A)
    w_ao = jnp.pad(w_ao, ((0, 0), (0, A_pad - A)))
    b_ao = jnp.pad(b_ao, (0, A_pad - A))
    action_out_proj = (w_ao.astype(jnp.bfloat16), b_ao)

    # expert layer: fused QKV weight (1/sqrt(D) folded into Wq), Wo, MLP W1/W2
    ek = jax.random.split(keys[7], 6)

    def rw(k, shape):
        return jax.random.normal(k, shape, jnp.float32) / math.sqrt(shape[0])

    wq = rw(ek[0], (D, D)) * (1.0 / sqrt_d)
    wk = rw(ek[1], (D, D))
    wv = rw(ek[2], (D, D))
    w_qkv = jnp.concatenate([wq, wk, wv], axis=1).astype(jnp.bfloat16)   # (D, 3D)
    wo = rw(ek[3], (D, D)).astype(jnp.bfloat16)
    w1 = rw(ek[4], (D, 4 * D)).astype(jnp.bfloat16)
    w2 = rw(ek[5], (4 * D, D)).astype(jnp.bfloat16)

    return {
        "img_proj": img_proj,
        "lang_embed": lang_embed,
        "state_proj": state_proj,
        "action_in_proj": action_in_proj,
        "action_time_mlp_in": action_time_mlp_in,
        "action_time_mlp_out": action_time_mlp_out,
        "action_out_proj": action_out_proj,
        "expert": (w_qkv, wo, w1, w2),
    }


# ----------------------------------------------------------------------------
# forward pass (training loss), mirrors PI0FlowMatching.forward
# ----------------------------------------------------------------------------
def pi0_forward(params, cfg, images, img_masks, lang_tokens, lang_masks,
                state, actions, noise, time):
    B = state.shape[0]
    D = cfg["proj_width"]
    N = cfg["n_action_steps"]
    A = cfg["max_action_dim"]
    A_pad = cfg["action_pad_dim"]

    # lane-dense (128) padding of the action dim; rows flattened to (B*N, .)
    actions_p = jnp.pad(actions, ((0, 0), (0, 0), (0, A_pad - A))).reshape(B * N, A_pad)
    noise_p = jnp.pad(noise, ((0, 0), (0, 0), (0, A_pad - A))).reshape(B * N, A_pad)
    time_bn = jnp.broadcast_to(time.astype(jnp.float32)[:, None, None],
                               (B, N, A_pad)).reshape(B * N, A_pad)

    # ---- embed_prefix ----
    # TODO(synk): SigLIP vision tower + 18-layer PaliGemma are stood in by a deterministic
    # patch-linear projection; real checkpoint weights not loaded.
    n_img, C, H, W = images.shape[1:]
    ps = cfg["patch_size"]
    num_patch = (H // ps) * (W // ps)
    # TODO(synk): fold the patchify gather into the img_proj BlockSpec index_map (and pad
    # K=48 to 128) before scaling to real SigLIP resolutions; transpose copy is tiny here.
    patches = images.astype(jnp.bfloat16).reshape(B * n_img, C, H // ps, ps, W // ps, ps)
    patches = patches.transpose(0, 2, 4, 1, 3, 5).reshape(B * n_img * num_patch, C * ps * ps)
    img_emb = pallas_linear(patches, *params["img_proj"],
                            out_dtype=jnp.bfloat16, tile_m=128)        # 2 parallel grid steps
    img_emb = img_emb.reshape(B, n_img * num_patch, D)
    img_masks_rep = jnp.repeat(img_masks, num_patch, axis=1)           # 'b n -> b (n l)'
    lang_emb = jnp.take(params["lang_embed"], lang_tokens, axis=0)     # bf16, sqrt(D) folded
    prefix_embs = jnp.concatenate([img_emb, lang_emb], axis=1)
    prefix_pad = jnp.concatenate([img_masks_rep, lang_masks], axis=1)
    prefix_att = jnp.zeros(prefix_pad.shape, dtype=bool)

    # ---- embed_suffix ----
    # state_proj (M=B rows) and the time part of action_time_mlp_in (M=B rows) are tiny
    # matmuls: left to plain XLA instead of dedicated pallas_call launches.
    w_sp, b_sp = params["state_proj"]
    state_emb = jnp.dot(state.astype(jnp.bfloat16), w_sp,
                        preferred_element_type=jnp.float32) + b_sp      # (B, D)
    time_emb = sinusoidal_pos_embedding(time, D, 0.004, 4.0)            # (B, D)
    w_mi_a, w_mi_t, b_mi = params["action_time_mlp_in"]
    t_part = jnp.dot(time_emb.astype(jnp.bfloat16), w_mi_t,
                     preferred_element_type=jnp.float32)                # hoisted, once per batch
    t_part_bn = jnp.broadcast_to(t_part[:, None, :], (B, N, D)).reshape(B * N, D)

    at_emb, u_t = pallas_suffix_fused(
        time_bn, noise_p, actions_p, t_part_bn,
        params["action_in_proj"], (w_mi_a, b_mi), params["action_time_mlp_out"])
    at_emb = at_emb.reshape(B, N, D)
    suffix_embs = jnp.concatenate([state_emb[:, None, :].astype(jnp.bfloat16), at_emb], axis=1)
    suffix_pad = jnp.ones((B, N + 1), dtype=bool)
    suffix_att = jnp.zeros((B, N + 1), dtype=bool).at[:, :2].set(True)

    # ---- joint attention mask encoded as two 1-D value vectors (no dense B,L,L mask) ----
    pad_masks = jnp.concatenate([prefix_pad, suffix_pad], axis=1)
    att_masks = jnp.concatenate([prefix_att, suffix_att], axis=1)
    L = pad_masks.shape[1]
    L_pad = pl.cdiv(L, 128) * 128
    cs = jnp.cumsum(att_masks.astype(jnp.int32), axis=1).astype(jnp.float32)
    qvals = jnp.where(pad_masks, cs, -1e9)            # masked query rows see nothing
    kvals = jnp.where(pad_masks, cs, 1e9)             # masked keys are seen by no one
    qvals = jnp.pad(qvals, ((0, 0), (0, L_pad - L)), constant_values=-1e9)
    kvals = jnp.pad(kvals, ((0, 0), (0, L_pad - L)), constant_values=1e9)

    embs = jnp.concatenate([prefix_embs, suffix_embs], axis=1)          # (B, L, D) bf16
    embs_pad = jnp.pad(embs, ((0, 0), (0, L_pad - L), (0, 0)))

    # TODO(synk): position_ids / RoPE and the multi-layer PaliGemma + Gemma expert stack
    # are stood in by a single fused joint-attention + SiLU-MLP layer.
    w_qkv, w_o, w1, w2 = params["expert"]
    out = pallas_expert_layer(embs_pad, qvals[:, :, None], kvals[:, None, :],
                              w_qkv, w_o, w1, w2)                       # (B, L_pad, D) bf16

    P = prefix_embs.shape[1]
    suffix_out = out[:, P + 1: P + 1 + N, :].reshape(B * N, D)          # action tokens

    # ---- action_out_proj + elementwise MSE loss (fused Pallas kernel) ----
    w_out, b_out = params["action_out_proj"]
    losses_pad = pallas_vt_loss(suffix_out, w_out, b_out, u_t)          # (B*N, A_pad) f32
    return losses_pad.reshape(B, N, A_pad)[:, :, :A]


# ----------------------------------------------------------------------------
# Main
# ----------------------------------------------------------------------------
if __name__ == "__main__":
    cfg = {
        "proj_width": 128,        # lane-aligned hidden
        "max_state_dim": 32,
        "max_action_dim": 8,
        "action_pad_dim": 128,    # lane-dense padding of the action dim
        "n_action_steps": 8,
        "img_channels": 3,
        "patch_size": 4,
        "vocab_size": 16,
    }
    B, n_img, C, H, W = 2, 2, 3, 32, 32
    lang_len = 8

    key = jax.random.PRNGKey(0)
    k = jax.random.split(key, 8)
    images = jax.random.uniform(k[0], (B, n_img, C, H, W), jnp.float32, -1.0, 1.0)
    img_masks = jnp.ones((B, n_img), dtype=bool)
    lang_tokens = jax.random.randint(k[1], (B, lang_len), 0, cfg["vocab_size"])
    lang_masks = jnp.ones((B, lang_len), dtype=bool)
    state = jax.random.normal(k[2], (B, cfg["max_state_dim"]), jnp.float32)
    actions = jax.random.normal(k[3], (B, cfg["n_action_steps"], cfg["max_action_dim"]), jnp.float32)
    noise = jax.random.normal(k[4], (B, cfg["n_action_steps"], cfg["max_action_dim"]), jnp.float32)
    time = jax.random.uniform(k[5], (B,), jnp.float32) * 0.999 + 0.001

    params = init_params(jax.random.PRNGKey(42), cfg)

    fwd = jax.jit(functools.partial(pi0_forward, params, cfg))
    losses = fwd(images, img_masks, lang_tokens, lang_masks, state, actions, noise, time)
    losses = jax.block_until_ready(losses)
    assert losses.shape == (B, cfg["n_action_steps"], cfg["max_action_dim"])
    assert bool(jnp.all(jnp.isfinite(losses)))
    print("KERNEL_OK")
</pallas_src>

<mosaic_0001>
module attributes {stable_mosaic.version = 11 : i64} {
  func.func @_suffix_fused_kernel(%arg0: i32, %arg1: memref<16x128xf32, #tpu.memory_space<vmem>>, %arg2: memref<16x128xf32, #tpu.memory_space<vmem>>, %arg3: memref<16x128xf32, #tpu.memory_space<vmem>>, %arg4: memref<16x128xf32, #tpu.memory_space<vmem>>, %arg5: memref<128x128xbf16, #tpu.memory_space<vmem>>, %arg6: memref<1x128xf32, #tpu.memory_space<vmem>>, %arg7: memref<128x128xbf16, #tpu.memory_space<vmem>>, %arg8: memref<1x128xf32, #tpu.memory_space<vmem>>, %arg9: memref<128x128xbf16, #tpu.memory_space<vmem>>, %arg10: memref<1x128xf32, #tpu.memory_space<vmem>>, %arg11: memref<16x128xbf16, #tpu.memory_space<vmem>>, %arg12: memref<16x128xf32, #tpu.memory_space<vmem>>) attributes {dimension_semantics = [#tpu.dimension_semantics<arbitrary>], iteration_bounds = array<i64: 1>, scalar_prefetch = 0 : i64, scratch_operands = 0 : i64, tpu.core_type = #tpu.core_type<tc>, window_params = [{pipeline_mode = #tpu.pipeline_mode<synchronous>, transform_indices = @transform_0, window_bounds = array<i64: 16, 128>}, {pipeline_mode = #tpu.pipeline_mode<synchronous>, transform_indices = @transform_1, window_bounds = array<i64: 16, 128>}, {pipeline_mode = #tpu.pipeline_mode<synchronous>, transform_indices = @transform_2, window_bounds = array<i64: 16, 128>}, {pipeline_mode = #tpu.pipeline_mode<synchronous>, transform_indices = @transform_3, window_bounds = array<i64: 16, 128>}, {pipeline_mode = #tpu.pipeline_mode<synchronous>, transform_indices = @transform_4, window_bounds = array<i64: 128, 128>}, {pipeline_mode = #tpu.pipeline_mode<synchronous>, transform_indices = @transform_5, window_bounds = array<i64: 1, 128>}, {pipeline_mode = #tpu.pipeline_mode<synchronous>, transform_indices = @transform_6, window_bounds = array<i64: 128, 128>}, {pipeline_mode = #tpu.pipeline_mode<synchronous>, transform_indices = @transform_7, window_bounds = array<i64: 1, 128>}, {pipeline_mode = #tpu.pipeline_mode<synchronous>, transform_indices = @transform_8, window_bounds = array<i64: 128, 128>}, {pipeline_mode = #tpu.pipeline_mode<synchronous>, transform_indices = @transform_9, window_bounds = array<i64: 1, 128>}, {pipeline_mode = #tpu.pipeline_mode<synchronous>, transform_indices = @transform_10, window_bounds = array<i64: 16, 128>}, {pipeline_mode = #tpu.pipeline_mode<synchronous>, transform_indices = @transform_11, window_bounds = array<i64: 16, 128>}]} {
    %c0 = arith.constant 0 : index
    %c0_0 = arith.constant 0 : index
    %0 = vector.load %arg1[%c0, %c0_0] : memref<16x128xf32, #tpu.memory_space<vmem>>, vector<16x128xf32>
    %c0_1 = arith.constant 0 : index
    %c0_2 = arith.constant 0 : index
    %1 = vector.load %arg2[%c0_1, %c0_2] : memref<16x128xf32, #tpu.memory_space<vmem>>, vector<16x128xf32>
    %c0_3 = arith.constant 0 : index
    %c0_4 = arith.constant 0 : index
    %2 = vector.load %arg3[%c0_3, %c0_4] : memref<16x128xf32, #tpu.memory_space<vmem>>, vector<16x128xf32>
    %3 = arith.mulf %0, %1 : vector<16x128xf32>
    %cst = arith.constant 1.000000e+00 : f32
    %4 = vector.broadcast %cst : f32 to vector<16x128xf32>
    %5 = arith.subf %4, %0 : vector<16x128xf32>
    %6 = arith.mulf %5, %2 : vector<16x128xf32>
    %7 = arith.addf %3, %6 : vector<16x128xf32>
    %8 = arith.subf %1, %2 : vector<16x128xf32>
    %c0_5 = arith.constant 0 : index
    %c0_6 = arith.constant 0 : index
    %9 = vector.load %arg12[%c0_5, %c0_6] : memref<16x128xf32, #tpu.memory_space<vmem>>, vector<16x128xf32>
    tpu.vector_store %arg12[%c0_5, %c0_6], %8 {strides = array<i32>} : memref<16x128xf32, #tpu.memory_space<vmem>>, vector<16x128xf32>,
    %10 = arith.truncf %7 : vector<16x128xf32> to vector<16x128xbf16>
    %c0_7 = arith.constant 0 : index
    %c0_8 = arith.constant 0 : index
    %11 = vector.load %arg5[%c0_7, %c0_8] : memref<128x128xbf16, #tpu.memory_space<vmem>>, vector<128x128xbf16>
    %cst_9 = arith.constant dense<0.000000e+00> : vector<16x128xf32>
    %12 = tpu.matmul %10, %11, %cst_9 {dimension_numbers = #tpu.dot_dimension_numbers<[1], [0], [0], [1], [0, 0, 1, 1], [], []>} : vector<16x128xbf16>, vector<128x128xbf16>, vector<16x128xf32> -> vector<16x128xf32>
    %c0_10 = arith.constant 0 : index
    %c0_11 = arith.constant 0 : index
    %13 = vector.load %arg6[%c0_10, %c0_11] : memref<1x128xf32, #tpu.memory_space<vmem>>, vector<1x128xf32>
    %14 = vector.broadcast %13 : vector<1x128xf32> to vector<16x128xf32>
    %15 = arith.addf %12, %14 : vector<16x128xf32>
    %16 = arith.truncf %15 : vector<16x128xf32> to vector<16x128xbf16>
    %c0_12 = arith.constant 0 : index
    %c0_13 = arith.constant 0 : index
    %17 = vector.load %arg7[%c0_12, %c0_13] : memref<128x128xbf16, #tpu.memory_space<vmem>>, vector<128x128xbf16>
    %cst_14 = arith.constant dense<0.000000e+00> : vector<16x128xf32>
    %18 = tpu.matmul %16, %17, %cst_14 {dimension_numbers = #tpu.dot_dimension_numbers<[1], [0], [0], [1], [0, 0, 1, 1], [], []>} : vector<16x128xbf16>, vector<128x128xbf16>, vector<16x128xf32> -> vector<16x128xf32>
    %c0_15 = arith.constant 0 : index
    %c0_16 = arith.constant 0 : index
    %19 = vector.load %arg4[%c0_15, %c0_16] : memref<16x128xf32, #tpu.memory_space<vmem>>, vector<16x128xf32>
    %20 = arith.addf %18, %19 : vector<16x128xf32>
    %c0_17 = arith.constant 0 : index
    %c0_18 = arith.constant 0 : index
    %21 = vector.load %arg8[%c0_17, %c0_18] : memref<1x128xf32, #tpu.memory_space<vmem>>, vector<1x128xf32>
    %22 = vector.broadcast %21 : vector<1x128xf32> to vector<16x128xf32>
    %23 = arith.addf %20, %22 : vector<16x128xf32>
    %24 = arith.negf %23 : vector<16x128xf32>
    %25 = math.exp %24 : vector<16x128xf32>
    %cst_19 = arith.constant 1.000000e+00 : f32
    %26 = vector.broadcast %cst_19 : f32 to vector<16x128xf32>
    %27 = arith.addf %26, %25 : vector<16x128xf32>
    %28 = arith.divf %26, %27 : vector<16x128xf32>
    %29 = arith.mulf %23, %28 : vector<16x128xf32>
    %30 = arith.truncf %29 : vector<16x128xf32> to vector<16x128xbf16>
    %c0_20 = arith.constant 0 : index
    %c0_21 = arith.constant 0 : index
    %31 = vector.load %arg9[%c0_20, %c0_21] : memref<128x128xbf16, #tpu.memory_space<vmem>>, vector<128x128xbf16>
    %cst_22 = arith.constant dense<0.000000e+00> : vector<16x128xf32>
    %32 = tpu.matmul %30, %31, %cst_22 {dimension_numbers = #tpu.dot_dimension_numbers<[1], [0], [0], [1], [0, 0, 1, 1], [], []>} : vector<16x128xbf16>, vector<128x128xbf16>, vector<16x128xf32> -> vector<16x128xf32>
    %c0_23 = arith.constant 0 : index
    %c0_24 = arith.constant 0 : index
    %33 = vector.load %arg10[%c0_23, %c0_24] : memref<1x128xf32, #tpu.memory_space<vmem>>, vector<1x128xf32>
    %34 = vector.broadcast %33 : vector<1x128xf32> to vector<16x128xf32>
    %35 = arith.addf %32, %34 : vector<16x128xf32>
    %36 = arith.truncf %35 : vector<16x128xf32> to vector<16x128xbf16>
    %c0_25 = arith.constant 0 : index
    %c0_26 = arith.constant 0 : index
    %37 = vector.load %arg11[%c0_25, %c0_26] : memref<16x128xbf16, #tpu.memory_space<vmem>>, vector<16x128xbf16>
    tpu.vector_store %arg11[%c0_25, %c0_26], %36 {strides = array<i32>} : memref<16x128xbf16, #tpu.memory_space<vmem>>, vector<16x128xbf16>,
    return
  }
  func.func @transform_0(%arg0: i32) -> (i32, i32) {
    %c0_i32 = arith.constant 0 : i32
    %c0_i32_0 = arith.constant 0 : i32
    %c0_i32_1 = arith.constant 0 : i32
    return %c0_i32, %c0_i32_0 : i32, i32
  }
  func.func @transform_1(%arg0: i32) -> (i32, i32) {
    %c0_i32 = arith.constant 0 : i32
    %c0_i32_0 = arith.constant 0 : i32
    %c0_i32_1 = arith.constant 0 : i32
    return %c0_i32, %c0_i32_0 : i32, i32
  }
  func.func @transform_2(%arg0: i32) -> (i32, i32) {
    %c0_i32 = arith.constant 0 : i32
    %c0_i32_0 = arith.constant 0 : i32
    %c0_i32_1 = arith.constant 0 : i32
    return %c0_i32, %c0_i32_0 : i32, i32
  }
  func.func @transform_3(%arg0: i32) -> (i32, i32) {
    %c0_i32 = arith.constant 0 : i32
    %c0_i32_0 = arith.constant 0 : i32
    %c0_i32_1 = arith.constant 0 : i32
    return %c0_i32, %c0_i32_0 : i32, i32
  }
  func.func @transform_4(%arg0: i32) -> (i32, i32) {
    %c0_i32 = arith.constant 0 : i32
    %c0_i32_0 = arith.constant 0 : i32
    %c0_i32_1 = arith.constant 0 : i32
    return %c0_i32, %c0_i32_0 : i32, i32
  }
  func.func @transform_5(%arg0: i32) -> (i32, i32) {
    %c0_i32 = arith.constant 0 : i32
    %c0_i32_0 = arith.constant 0 : i32
    %c0_i32_1 = arith.constant 0 : i32
    return %c0_i32, %c0_i32_0 : i32, i32
  }
  func.func @transform_6(%arg0: i32) -> (i32, i32) {
    %c0_i32 = arith.constant 0 : i32
    %c0_i32_0 = arith.constant 0 : i32
    %c0_i32_1 = arith.constant 0 : i32
    return %c0_i32, %c0_i32_0 : i32, i32
  }
  func.func @transform_7(%arg0: i32) -> (i32, i32) {
    %c0_i32 = arith.constant 0 : i32
    %c0_i32_0 = arith.constant 0 : i32
    %c0_i32_1 = arith.constant 0 : i32
    return %c0_i32, %c0_i32_0 : i32, i32
  }
  func.func @transform_8(%arg0: i32) -> (i32, i32) {
    %c0_i32 = arith.constant 0 : i32
    %c0_i32_0 = arith.constant 0 : i32
    %c0_i32_1 = arith.constant 0 : i32
    return %c0_i32, %c0_i32_0 : i32, i32
  }
  func.func @transform_9(%arg0: i32) -> (i32, i32) {
    %c0_i32 = arith.constant 0 : i32
    %c0_i32_0 = arith.constant 0 : i32
    %c0_i32_1 = arith.constant 0 : i32
    return %c0_i32, %c0_i32_0 : i32, i32
  }
  func.func @transform_10(%arg0: i32) -> (i32, i32) {
    %c0_i32 = arith.constant 0 : i32
    %c0_i32_0 = arith.constant 0 : i32
    %c0_i32_1 = arith.constant 0 : i32
    return %c0_i32, %c0_i32_0 : i32, i32
  }
  func.func @transform_11(%arg0: i32) -> (i32, i32) {
    %c0_i32 = arith.constant 0 : i32
    %c0_i32_0 = arith.constant 0 : i32
    %c0_i32_1 = arith.constant 0 : i32
    return %c0_i32, %c0_i32_0 : i32, i32
  }
}

module attributes {stable_mosaic.version = 11 : i64} {
  func.func @_linear_kernel(%arg0: i32, %arg1: memref<128x48xbf16, #tpu.memory_space<vmem>>, %arg2: memref<48x128xbf16, #tpu.memory_space<vmem>>, %arg3: memref<1x128xf32, #tpu.memory_space<vmem>>, %arg4: memref<128x128xbf16, #tpu.memory_space<vmem>>) attributes {dimension_semantics = [#tpu.dimension_semantics<parallel>], iteration_bounds = array<i64: 2>, scalar_prefetch = 0 : i64, scratch_operands = 0 : i64, tpu.core_type = #tpu.core_type<tc>, window_params = [{transform_indices = @transform_0, window_bounds = array<i64: 128, 48>}, {pipeline_mode = #tpu.pipeline_mode<synchronous>, transform_indices = @transform_1, window_bounds = array<i64: 48, 128>}, {pipeline_mode = #tpu.pipeline_mode<synchronous>, transform_indices = @transform_2, window_bounds = array<i64: 1, 128>}, {transform_indices = @transform_3, window_bounds = array<i64: 128, 128>}]} {
    %c0 = arith.constant 0 : index
    %c0_0 = arith.constant 0 : index
    %0 = vector.load %arg1[%c0, %c0_0] : memref<128x48xbf16, #tpu.memory_space<vmem>>, vector<128x48xbf16>
    %c0_1 = arith.constant 0 : index
    %c0_2 = arith.constant 0 : index
    %1 = vector.load %arg2[%c0_1, %c0_2] : memref<48x128xbf16, #tpu.memory_space<vmem>>, vector<48x128xbf16>
    %cst = arith.constant dense<0.000000e+00> : vector<128x128xf32>
    %2 = tpu.matmul %0, %1, %cst {dimension_numbers = #tpu.dot_dimension_numbers<[1], [0], [0], [1], [0, 0, 1, 1], [], []>} : vector<128x48xbf16>, vector<48x128xbf16>, vector<128x128xf32> -> vector<128x128xf32>
    %c0_3 = arith.constant 0 : index
    %c0_4 = arith.constant 0 : index
    %3 = vector.load %arg3[%c0_3, %c0_4] : memref<1x128xf32, #tpu.memory_space<vmem>>, vector<1x128xf32>
    %4 = vector.broadcast %3 : vector<1x128xf32> to vector<128x128xf32>
    %5 = arith.addf %2, %4 : vector<128x128xf32>
    %6 = arith.truncf %5 : vector<128x128xf32> to vector<128x128xbf16>
    %c0_5 = arith.constant 0 : index
    %c0_6 = arith.constant 0 : index
    %7 = vector.load %arg4[%c0_5, %c0_6] : memref<128x128xbf16, #tpu.memory_space<vmem>>, vector<128x128xbf16>
    tpu.vector_store %arg4[%c0_5, %c0_6], %6 {strides = array<i32>} : memref<128x128xbf16, #tpu.memory_space<vmem>>, vector<128x128xbf16>,
    return
  }
  func.func @transform_0(%arg0: i32) -> (i32, i32) {
    %c0_i32 = arith.constant 0 : i32
    %c0_i32_0 = arith.constant 0 : i32
    return %arg0, %c0_i32 : i32, i32
  }
  func.func @transform_1(%arg0: i32) -> (i32, i32) {
    %c0_i32 = arith.constant 0 : i32
    %c0_i32_0 = arith.constant 0 : i32
    %c0_i32_1 = arith.constant 0 : i32
    return %c0_i32, %c0_i32_0 : i32, i32
  }
  func.func @transform_2(%arg0: i32) -> (i32, i32) {
    %c0_i32 = arith.constant 0 : i32
    %c0_i32_0 = arith.constant 0 : i32
    %c0_i32_1 = arith.constant 0 : i32
    return %c0_i32, %c0_i32_0 : i32, i32
  }
  func.func @transform_3(%arg0: i32) -> (i32, i32) {
    %c0_i32 = arith.constant 0 : i32
    %c0_i32_0 = arith.constant 0 : i32
    return %arg0, %c0_i32 : i32, i32
  }
}

module attributes {stable_mosaic.version = 11 : i64} {
  func.func @_expert_layer_kernel(%arg0: i32, %arg1: memref<1x256x128xbf16, #tpu.memory_space<vmem>>, %arg2: memref<1x256x1xf32, #tpu.memory_space<vmem>>, %arg3: memref<1x1x256xf32, #tpu.memory_space<vmem>>, %arg4: memref<128x384xbf16, #tpu.memory_space<vmem>>, %arg5: memref<128x128xbf16, #tpu.memory_space<vmem>>, %arg6: memref<128x512xbf16, #tpu.memory_space<vmem>>, %arg7: memref<512x128xbf16, #tpu.memory_space<vmem>>, %arg8: memref<1x256x128xbf16, #tpu.memory_space<vmem>>) attributes {dimension_semantics = [#tpu.dimension_semantics<parallel>], iteration_bounds = array<i64: 2>, scalar_prefetch = 0 : i64, scratch_operands = 0 : i64, tpu.core_type = #tpu.core_type<tc>, window_params = [{transform_indices = @transform_0, window_bounds = array<i64: 1, 256, 128>}, {transform_indices = @transform_1, window_bounds = array<i64: 1, 256, 1>}, {transform_indices = @transform_2, window_bounds = array<i64: 1, 1, 256>}, {pipeline_mode = #tpu.pipeline_mode<synchronous>, transform_indices = @transform_3, window_bounds = array<i64: 128, 384>}, {pipeline_mode = #tpu.pipeline_mode<synchronous>, transform_indices = @transform_4, window_bounds = array<i64: 128, 128>}, {pipeline_mode = #tpu.pipeline_mode<synchronous>, transform_indices = @transform_5, window_bounds = array<i64: 128, 512>}, {pipeline_mode = #tpu.pipeline_mode<synchronous>, transform_indices = @transform_6, window_bounds = array<i64: 512, 128>}, {transform_indices = @transform_7, window_bounds = array<i64: 1, 256, 128>}]} {
    %c0 = arith.constant 0 : index
    %c0_0 = arith.constant 0 : index
    %c0_1 = arith.constant 0 : index
    %0 = vector.load %arg1[%c0, %c0_0, %c0_1] : memref<1x256x128xbf16, #tpu.memory_space<vmem>>, vector<1x256x128xbf16>
    %1 = vector.shape_cast %0 : vector<1x256x128xbf16> to vector<256x128xbf16>
    %c0_2 = arith.constant 0 : index
    %c0_3 = arith.constant 0 : index
    %2 = vector.load %arg4[%c0_2, %c0_3] : memref<128x384xbf16, #tpu.memory_space<vmem>>, vector<128x384xbf16>
    %cst = arith.constant dense<0.000000e+00> : vector<256x384xf32>
    %3 = tpu.matmul %1, %2, %cst {dimension_numbers = #tpu.dot_dimension_numbers<[1], [0], [0], [1], [0, 0, 1, 1], [], []>} : vector<256x128xbf16>, vector<128x384xbf16>, vector<256x384xf32> -> vector<256x384xf32>
    %4 = arith.truncf %3 : vector<256x384xf32> to vector<256x384xbf16>
    %5 = vector.extract_strided_slice %4 {offsets = [0, 0], sizes = [256, 128], strides = [1, 1]} : vector<256x384xbf16> to vector<256x128xbf16>
    %6 = vector.extract_strided_slice %4 {offsets = [0, 128], sizes = [256, 128], strides = [1, 1]} : vector<256x384xbf16> to vector<256x128xbf16>
    %7 = vector.extract_strided_slice %4 {offsets = [0, 256], sizes = [256, 128], strides = [1, 1]} : vector<256x384xbf16> to vector<256x128xbf16>
    %cst_4 = arith.constant dense<0.000000e+00> : vector<256x256xf32>
    %8 = tpu.matmul %5, %6, %cst_4 {dimension_numbers = #tpu.dot_dimension_numbers<[1], [1], [0], [0], [0, 0, 1, 0], [], []>} : vector<256x128xbf16>, vector<256x128xbf16>, vector<256x256xf32> -> vector<256x256xf32>
    %c0_5 = arith.constant 0 : index
    %c0_6 = arith.constant 0 : index
    %c0_7 = arith.constant 0 : index
    %9 = vector.load %arg3[%c0_5, %c0_6, %c0_7] : memref<1x1x256xf32, #tpu.memory_space<vmem>>, vector<1x1x256xf32>
    %10 = vector.shape_cast %9 : vector<1x1x256xf32> to vector<1x256xf32>
    %c0_8 = arith.constant 0 : index
    %c0_9 = arith.constant 0 : index
    %c0_10 = arith.constant 0 : index
    %11 = vector.load %arg2[%c0_8, %c0_9, %c0_10] : memref<1x256x1xf32, #tpu.memory_space<vmem>>, vector<1x256x1xf32>
    %12 = vector.shape_cast %11 : vector<1x256x1xf32> to vector<256x1xf32>
    %13 = vector.broadcast %10 : vector<1x256xf32> to vector<256x256xf32>
    %14 = vector.broadcast %12 : vector<256x1xf32> to vector<256x256xf32>
    %15 = arith.cmpf ole, %13, %14 : vector<256x256xf32>
    %cst_11 = arith.constant -1.000000e+30 : f32
    %16 = vector.broadcast %cst_11 : f32 to vector<256x256xf32>
    %17 = arith.select %15, %8, %16 : vector<256x256xi1>, vector<256x256xf32>
    %cst_12 = arith.constant dense<0xFF800000> : vector<256xf32>
    %18 = vector.multi_reduction <maximumf>, %17, %cst_12 [1] : vector<256x256xf32> to vector<256xf32>
    %19 = vector.shape_cast %18 : vector<256xf32> to vector<256x1xf32>
    %20 = vector.broadcast %19 : vector<256x1xf32> to vector<256x256xf32>
    %21 = arith.subf %17, %20 : vector<256x256xf32>
    %22 = math.exp %21 : vector<256x256xf32>
    %cst_13 = arith.constant dense<0.000000e+00> : vector<256xf32>
    %23 = vector.multi_reduction <add>, %22, %cst_13 [1] : vector<256x256xf32> to vector<256xf32>
    %24 = vector.shape_cast %23 : vector<256xf32> to vector<256x1xf32>
    %25 = arith.truncf %22 : vector<256x256xf32> to vector<256x256xbf16>
    %cst_14 = arith.constant dense<0.000000e+00> : vector<256x128xf32>
    %26 = tpu.matmul %25, %7, %cst_14 {dimension_numbers = #tpu.dot_dimension_numbers<[1], [0], [0], [1], [0, 0, 1, 1], [], []>} : vector<256x256xbf16>, vector<256x128xbf16>, vector<256x128xf32> -> vector<256x128xf32>
    %27 = tpu.reciprocal %24 {approx = true} : vector<256x1xf32> -> vector<256x1xf32>
    %28 = vector.broadcast %27 : vector<256x1xf32> to vector<256x128xf32>
    %29 = arith.mulf %26, %28 : vector<256x128xf32>
    %30 = arith.extf %1 : vector<256x128xbf16> to vector<256x128xf32>
    %31 = arith.truncf %29 : vector<256x128xf32> to vector<256x128xbf16>
    %c0_15 = arith.constant 0 : index
    %c0_16 = arith.constant 0 : index
    %32 = vector.load %arg5[%c0_15, %c0_16] : memref<128x128xbf16, #tpu.memory_space<vmem>>, vector<128x128xbf16>
    %cst_17 = arith.constant dense<0.000000e+00> : vector<256x128xf32>
    %33 = tpu.matmul %31, %32, %cst_17 {dimension_numbers = #tpu.dot_dimension_numbers<[1], [0], [0], [1], [0, 0, 1, 1], [], []>} : vector<256x128xbf16>, vector<128x128xbf16>, vector<256x128xf32> -> vector<256x128xf32>
    %34 = arith.addf %30, %33 : vector<256x128xf32>
    %35 = arith.truncf %34 : vector<256x128xf32> to vector<256x128xbf16>
    %c0_18 = arith.constant 0 : index
    %c0_19 = arith.constant 0 : index
    %36 = vector.load %arg6[%c0_18, %c0_19] : memref<128x512xbf16, #tpu.memory_space<vmem>>, vector<128x512xbf16>
    %cst_20 = arith.constant dense<0.000000e+00> : vector<256x512xf32>
    %37 = tpu.matmul %35, %36, %cst_20 {dimension_numbers = #tpu.dot_dimension_numbers<[1], [0], [0], [1], [0, 0, 1, 1], [], []>} : vector<256x128xbf16>, vector<128x512xbf16>, vector<256x512xf32> -> vector<256x512xf32>
    %38 = arith.negf %37 : vector<256x512xf32>
    %39 = math.exp %38 : vector<256x512xf32>
    %cst_21 = arith.constant 1.000000e+00 : f32
    %40 = vector.broadcast %cst_21 : f32 to vector<256x512xf32>
    %41 = arith.addf %40, %39 : vector<256x512xf32>
    %42 = arith.divf %40, %41 : vector<256x512xf32>
    %43 = arith.mulf %37, %42 : vector<256x512xf32>
    %44 = arith.truncf %43 : vector<256x512xf32> to vector<256x512xbf16>
    %c0_22 = arith.constant 0 : index
    %c0_23 = arith.constant 0 : index
    %45 = vector.load %arg7[%c0_22, %c0_23] : memref<512x128xbf16, #tpu.memory_space<vmem>>, vector<512x128xbf16>
    %cst_24 = arith.constant dense<0.000000e+00> : vector<256x128xf32>
    %46 = tpu.matmul %44, %45, %cst_24 {dimension_numbers = #tpu.dot_dimension_numbers<[1], [0], [0], [1], [0, 0, 1, 1], [], []>} : vector<256x512xbf16>, vector<512x128xbf16>, vector<256x128xf32> -> vector<256x128xf32>
    %47 = arith.addf %34, %46 : vector<256x128xf32>
    %48 = arith.truncf %47 : vector<256x128xf32> to vector<256x128xbf16>
    %c0_25 = arith.constant 0 : index
    %c0_26 = arith.constant 0 : index
    %c0_27 = arith.constant 0 : index
    %49 = vector.load %arg8[%c0_25, %c0_26, %c0_27] : memref<1x256x128xbf16, #tpu.memory_space<vmem>>, vector<1x256x128xbf16>
    %50 = vector.shape_cast %49 : vector<1x256x128xbf16> to vector<256x128xbf16>
    %51 = vector.shape_cast %48 : vector<256x128xbf16> to vector<1x256x128xbf16>
    tpu.vector_store %arg8[%c0_25, %c0_26, %c0_27], %51 {strides = array<i32>} : memref<1x256x128xbf16, #tpu.memory_space<vmem>>, vector<1x256x128xbf16>,
    return
  }
  func.func @transform_0(%arg0: i32) -> (i32, i32, i32) {
    %c0_i32 = arith.constant 0 : i32
    %c0_i32_0 = arith.constant 0 : i32
    %c0_i32_1 = arith.constant 0 : i32
    return %arg0, %c0_i32, %c0_i32_0 : i32, i32, i32
  }
  func.func @transform_1(%arg0: i32) -> (i32, i32, i32) {
    %c0_i32 = arith.constant 0 : i32
    %c0_i32_0 = arith.constant 0 : i32
    %c0_i32_1 = arith.constant 0 : i32
    return %arg0, %c0_i32, %c0_i32_0 : i32, i32, i32
  }
  func.func @transform_2(%arg0: i32) -> (i32, i32, i32) {
    %c0_i32 = arith.constant 0 : i32
    %c0_i32_0 = arith.constant 0 : i32
    %c0_i32_1 = arith.constant 0 : i32
    return %arg0, %c0_i32, %c0_i32_0 : i32, i32, i32
  }
  func.func @transform_3(%arg0: i32) -> (i32, i32) {
    %c0_i32 = arith.constant 0 : i32
    %c0_i32_0 = arith.constant 0 : i32
    %c0_i32_1 = arith.constant 0 : i32
    return %c0_i32, %c0_i32_0 : i32, i32
  }
  func.func @transform_4(%arg0: i32) -> (i32, i32) {
    %c0_i32 = arith.constant 0 : i32
    %c0_i32_0 = arith.constant 0 : i32
    %c0_i32_1 = arith.constant 0 : i32
    return %c0_i32, %c0_i32_0 : i32, i32
  }
  func.func @transform_5(%arg0: i32) -> (i32, i32) {
    %c0_i32 = arith.constant 0 : i32
    %c0_i32_0 = arith.constant 0 : i32
    %c0_i32_1 = arith.constant 0 : i32
    return %c0_i32, %c0_i32_0 : i32, i32
  }
  func.func @transform_6(%arg0: i32) -> (i32, i32) {
    %c0_i32 = arith.constant 0 : i32
    %c0_i32_0 = arith.constant 0 : i32
    %c0_i32_1 = arith.constant 0 : i32
    return %c0_i32, %c0_i32_0 : i32, i32
  }
  func.func @transform_7(%arg0: i32) -> (i32, i32, i32) {
    %c0_i32 = arith.constant 0 : i32
    %c0_i32_0 = arith.constant 0 : i32
    %c0_i32_1 = arith.constant 0 : i32
    return %arg0, %c0_i32, %c0_i32_0 : i32, i32, i32
  }
}

module attributes {stable_mosaic.version = 11 : i64} {
  func.func @_vt_loss_kernel(%arg0: i32, %arg1: memref<16x128xbf16, #tpu.memory_space<vmem>>, %arg2: memref<128x128xbf16, #tpu.memory_space<vmem>>, %arg3: memref<1x128xf32, #tpu.memory_space<vmem>>, %arg4: memref<16x128xf32, #tpu.memory_space<vmem>>, %arg5: memref<16x128xf32, #tpu.memory_space<vmem>>) attributes {dimension_semantics = [#tpu.dimension_semantics<arbitrary>], iteration_bounds = array<i64: 1>, scalar_prefetch = 0 : i64, scratch_operands = 0 : i64, tpu.core_type = #tpu.core_type<tc>, window_params = [{pipeline_mode = #tpu.pipeline_mode<synchronous>, transform_indices = @transform_0, window_bounds = array<i64: 16, 128>}, {pipeline_mode = #tpu.pipeline_mode<synchronous>, transform_indices = @transform_1, window_bounds = array<i64: 128, 128>}, {pipeline_mode = #tpu.pipeline_mode<synchronous>, transform_indices = @transform_2, window_bounds = array<i64: 1, 128>}, {pipeline_mode = #tpu.pipeline_mode<synchronous>, transform_indices = @transform_3, window_bounds = array<i64: 16, 128>}, {pipeline_mode = #tpu.pipeline_mode<synchronous>, transform_indices = @transform_4, window_bounds = array<i64: 16, 128>}]} {
    %c0 = arith.constant 0 : index
    %c0_0 = arith.constant 0 : index
    %0 = vector.load %arg1[%c0, %c0_0] : memref<16x128xbf16, #tpu.memory_space<vmem>>, vector<16x128xbf16>
    %c0_1 = arith.constant 0 : index
    %c0_2 = arith.constant 0 : index
    %1 = vector.load %arg2[%c0_1, %c0_2] : memref<128x128xbf16, #tpu.memory_space<vmem>>, vector<128x128xbf16>
    %cst = arith.constant dense<0.000000e+00> : vector<16x128xf32>
    %2 = tpu.matmul %0, %1, %cst {dimension_numbers = #tpu.dot_dimension_numbers<[1], [0], [0], [1], [0, 0, 1, 1], [], []>} : vector<16x128xbf16>, vector<128x128xbf16>, vector<16x128xf32> -> vector<16x128xf32>
    %c0_3 = arith.constant 0 : index
    %c0_4 = arith.constant 0 : index
    %3 = vector.load %arg3[%c0_3, %c0_4] : memref<1x128xf32, #tpu.memory_space<vmem>>, vector<1x128xf32>
    %4 = vector.broadcast %3 : vector<1x128xf32> to vector<16x128xf32>
    %5 = arith.addf %2, %4 : vector<16x128xf32>
    %c0_5 = arith.constant 0 : index
    %c0_6 = arith.constant 0 : index
    %6 = vector.load %arg4[%c0_5, %c0_6] : memref<16x128xf32, #tpu.memory_space<vmem>>, vector<16x128xf32>
    %7 = arith.subf %6, %5 : vector<16x128xf32>
    %8 = arith.mulf %7, %7 : vector<16x128xf32>
    %c0_7 = arith.constant 0 : index
    %c0_8 = arith.constant 0 : index
    %9 = vector.load %arg5[%c0_7, %c0_8] : memref<16x128xf32, #tpu.memory_space<vmem>>, vector<16x128xf32>
    tpu.vector_store %arg5[%c0_7, %c0_8], %8 {strides = array<i32>} : memref<16x128xf32, #tpu.memory_space<vmem>>, vector<16x128xf32>,
    return
  }
  func.func @transform_0(%arg0: i32) -> (i32, i32) {
    %c0_i32 = arith.constant 0 : i32
    %c0_i32_0 = arith.constant 0 : i32
    %c0_i32_1 = arith.constant 0 : i32
    return %c0_i32, %c0_i32_0 : i32, i32
  }
  func.func @transform_1(%arg0: i32) -> (i32, i32) {
    %c0_i32 = arith.constant 0 : i32
    %c0_i32_0 = arith.constant 0 : i32
    %c0_i32_1 = arith.constant 0 : i32
    return %c0_i32, %c0_i32_0 : i32, i32
  }
  func.func @transform_2(%arg0: i32) -> (i32, i32) {
    %c0_i32 = arith.constant 0 : i32
    %c0_i32_0 = arith.constant 0 : i32
    %c0_i32_1 = arith.constant 0 : i32
    return %c0_i32, %c0_i32_0 : i32, i32
  }
  func.func @transform_3(%arg0: i32) -> (i32, i32) {
    %c0_i32 = arith.constant 0 : i32
    %c0_i32_0 = arith.constant 0 : i32
    %c0_i32_1 = arith.constant 0 : i32
    return %c0_i32, %c0_i32_0 : i32, i32
  }
  func.func @transform_4(%arg0: i32) -> (i32, i32) {
    %c0_i32 = arith.constant 0 : i32
    %c0_i32_0 = arith.constant 0 : i32
    %c0_i32_1 = arith.constant 0 : i32
    return %c0_i32, %c0_i32_0 : i32, i32
  }
}

</mosaic_0001>

<bundles_post_ra>
// kernel: pi0_forward.5
= control target key start
LH: loop header
LB: loop body
LE: loop exit
PB: predicated region body
PF: predicated region fallthrough
CT: control target
= control target key end

     0   :  { %v590_v0 = vmov 0.0   ;;  %vm591_vm0 = vmmov 0   ;;  %s796_s4 = inlined_call_operand.vmem [shape: bf16[128,128], index: 4, kind: input, shape index: {}]   ;;  %s797_s1 = inlined_call_operand.vmem [shape: f32[16,128], index: 1, kind: input, shape index: {}]   ;;  %s798_s2 = inlined_call_operand.vmem [shape: f32[16,128], index: 2, kind: input, shape index: {}]   ;;  %s799_s6 = inlined_call_operand.vmem [shape: bf16[128,128], index: 6, kind: input, shape index: {}]   ;;  %s800_s11 = inlined_call_operand.vmem [shape: f32[16,128], index: 11, kind: output, shape index: {1}]   ;;  %s801_s0 = inlined_call_operand.vmem [shape: f32[16,128], index: 0, kind: input, shape index: {}]   ;;  %s802_s5 = inlined_call_operand.vmem [shape: f32[1,128], index: 5, kind: input, shape index: {}]   ;;  %s803_s8 = inlined_call_operand.vmem [shape: bf16[128,128], index: 8, kind: input, shape index: {}]   ;;  %s804_s3 = inlined_call_operand.vmem [shape: f32[16,128], index: 3, kind: input, shape index: {}]   ;;  %s805_s7 = inlined_call_operand.vmem [shape: f32[1,128], index: 7, kind: input, shape index: {}]   ;;  %s806_s9 = inlined_call_operand.vmem [shape: f32[1,128], index: 9, kind: input, shape index: {}]   ;;  %s807_s10 = inlined_call_operand.vmem [shape: bf16[16,128], index: 10, kind: output, shape index: {0}]  }
   0x1   :  { %496 = vmatprep.subr.bf16.mxu0 %v590_v0  ;;  %v558_v1 = vld [vmem:[%s796_s4] sm:$0xff]   ;;  %512 = vmatprep.mubr.msk.bf16.mxu0 %vm591_vm0, %v590_v0  ;;  %v559_v2 = vld [vmem:[%s796_s4 + $0x8] sm:$0xff]   ;;  %v560_v3 = vld [vmem:[%s796_s4 + $0x10] sm:$0xff]  }
   0x2   :  { %516 = vmatprep.subr.bf16.mxu1 %v590_v0  ;;  %532 = vmatprep.mubr.msk.bf16.mxu1 %vm591_vm0, %v590_v0  ;;  %v561_v4 = vld [vmem:[%s796_s4 + $0x18] sm:$0xff]   ;;  %v40_v5 = vld [vmem:[%s797_s1] sm:$0xff]  ;;  %v41_v6 = vld [vmem:[%s797_s1 + $0x8] sm:$0xff] }
   0x3   :  { %497 = vmatpush3.bf16.msra.mxu0 %v558_v1  ;;  %v42_v7 = vld [vmem:[%s798_s2] sm:$0xff]  ;;  %v43_v8 = vld [vmem:[%s798_s2 + $0x8] sm:$0xff]  ;;  %v568_v16 = vld [vmem:[%s799_s6 + $0x10] sm:$0xff]  }
   0x4   :  { %498 = vmatprep.subr.bf16.mxu0 %v590_v0  ;;  %v52_v9 = vsub.f32 %v40_v5, %v42_v7  ;;  %v53_v10 = vsub.f32 %v41_v6, %v43_v8  ;;  %v566_v11 = vld [vmem:[%s799_s6] sm:$0xff]   ;;  %v567_v13 = vld [vmem:[%s799_s6 + $0x8] sm:$0xff]   ;;  %v569_v20 = vld [vmem:[%s799_s6 + $0x18] sm:$0xff]  }
   0x5   :  { %v562_v12 = vld [vmem:[%s796_s4 + $0x20] sm:$0xff]   ;;  %517 = vmatpush3.bf16.msra.mxu1 %v566_v11  ;;  %v39_v15 = vld [vmem:[%s801_s0 + $0x8] sm:$0xff]  ;;  %v564_v25 = vld [vmem:[%s796_s4 + $0x30] sm:$0xff]  }
   0x6   :  { %54 = vst [vmem:[%s800_s11] sm:$0xff] %v52_v9  ;;  %55 = vst [vmem:[%s800_s11 + $0x8] sm:$0xff] %v53_v10  ;;  %v38_v14 = vld [vmem:[%s801_s0] sm:$0xff]  ;;  %518 = vmatprep.subr.bf16.mxu1 %v590_v0  ;;  %v47_v18 = vsub.f32 1.0, %v39_v15  ;;  %v563_v19 = vld [vmem:[%s796_s4 + $0x28] sm:$0xff]   ;;  %v45_v22 = vmul.f32 %v41_v6, %v39_v15 }
   0x7   :  { %499 = vmatpush3.bf16.msra.mxu0 %v559_v2  ;;  %v46_v17 = vsub.f32 1.0, %v38_v14  ;;  %v44_v21 = vmul.f32 %v40_v5, %v38_v14  ;;  %v570_v26 = vld [vmem:[%s799_s6 + $0x20] sm:$0xff]   ;;  %v565_v29 = vld [vmem:[%s796_s4 + $0x38] sm:$0xff]   ;;  %v571_v30 = vld [vmem:[%s799_s6 + $0x28] sm:$0xff]  }
   0x8   :  { %500 = vmatprep.subr.bf16.mxu0 %v590_v0  ;;  %v49_v24 = vmul.f32 %v47_v18, %v43_v8  ;;  %v572_v32 = vld [vmem:[%s799_s6 + $0x30] sm:$0xff]   ;;  %v573_v33 = vld [vmem:[%s799_s6 + $0x38] sm:$0xff]   ;;  %v431_v34 = vld [vmem:[%s802_s5] ss:$0 sm:$0xff] }
   0x9   :  { %519 = vmatpush3.bf16.msra.mxu1 %v567_v13  ;;  %v48_v23 = vmul.f32 %v46_v17, %v42_v7  ;;  %v574_v42 = vld [vmem:[%s803_s8] sm:$0xff]   ;;  %v575_v43 = vld [vmem:[%s803_s8 + $0x8] sm:$0xff]   ;;  %v576_v44 = vld [vmem:[%s803_s8 + $0x10] sm:$0xff]  }
   0xa   :  { %520 = vmatprep.subr.bf16.mxu1 %v590_v0  ;;  %v51_v28 = vadd.f32 %v49_v24, %v45_v22  ;;  %v577_v45 = vld [vmem:[%s803_s8 + $0x18] sm:$0xff]   ;;  %v578_v46 = vld [vmem:[%s803_s8 + $0x20] sm:$0xff]   ;;  %v579_v47 = vld [vmem:[%s803_s8 + $0x28] sm:$0xff]  }
   0xb   :  { %501 = vmatpush3.bf16.msra.mxu0 %v560_v3  ;;  %v50_v27 = vadd.f32 %v48_v23, %v44_v21  ;;  %v580_v48 = vld [vmem:[%s803_s8 + $0x30] sm:$0xff]   ;;  %v581_v49 = vld [vmem:[%s803_s8 + $0x38] sm:$0xff]   ;;  %v186_v50 = vld [vmem:[%s804_s3] sm:$0xff] }
   0xc   :  { %502 = vmatprep.subr.bf16.mxu0 %v590_v0  ;;  %v448_v52 = vld [vmem:[%s805_s7] ss:$0 sm:$0xff]  ;;  %v187_v53 = vld [vmem:[%s804_s3 + $0x8] sm:$0xff] }
   0xd   :  { %521 = vmatpush3.bf16.msra.mxu1 %v568_v16  ;;  %v56_v31 = vpack.c.bf16 %v51_v28, %v50_v27  ;;  %v451_v8 = vld [vmem:[%s806_s9] ss:$0 sm:$0xff] }
   0xe   :  { %522 = vmatprep.subr.bf16.mxu1 %v590_v0 }
   0xf   :  { %503 = vmatpush3.bf16.msra.mxu0 %v561_v4 }
  0x10   :  { %504 = vmatprep.subr.bf16.mxu0 %v590_v0 }
  0x11   :  { %523 = vmatpush3.bf16.msra.mxu1 %v569_v20 }
  0x12   :  { %524 = vmatprep.subr.bf16.mxu1 %v590_v0 }
  0x13   :  { %505 = vmatpush3.bf16.msra.mxu0 %v562_v12 }
  0x14   :  { %506 = vmatprep.subr.bf16.mxu0 %v590_v0 }
  0x15   :  { %525 = vmatpush3.bf16.msra.mxu1 %v570_v26 }
  0x16   :  { %526 = vmatprep.subr.bf16.mxu1 %v590_v0 }
  0x17   :  { %507 = vmatpush3.bf16.msra.mxu0 %v563_v19 }
  0x18   :  { %508 = vmatprep.subr.bf16.mxu0 %v590_v0 }
  0x19   :  { %527 = vmatpush3.bf16.msra.mxu1 %v571_v30 }
  0x1a   :  { %528 = vmatprep.subr.bf16.mxu1 %v590_v0 }
  0x1b   :  { %509 = vmatpush3.bf16.msra.mxu0 %v564_v25 }
  0x1c   :  { %510 = vmatprep.subr.bf16.mxu0 %v590_v0 }
  0x1d   :  { %529 = vmatpush3.bf16.msra.mxu1 %v572_v32 }
  0x1e   :  { %530 = vmatprep.subr.bf16.mxu1 %v590_v0 }
  0x1f   :  { %511 = vmatpush3.bf16.msra.mxu0 %v565_v29 }
  0x20   :  { %536 = vmatprep.subr.bf16.mxu0 %v590_v0 }
  0x21   :  { %531 = vmatpush3.bf16.msra.mxu1 %v573_v33 }
  0x22   :  { %513 = vmatmul.mubr.bf16.vlgmr.msra.gmra.mrb[0].mxu0 %v56_v31 }
  0x23   :  { %552 = vmatprep.mubr.msk.bf16.mxu0 %vm591_vm0, %v590_v0  ;;  %537 = vmatpush3.bf16.msra.mxu0 %v574_v42 }
  0x24   :  { %538 = vmatprep.subr.bf16.mxu0 %v590_v0 }
  0x27   :  { %539 = vmatpush3.bf16.msra.mxu0 %v575_v43 }
  0x28   :  { %540 = vmatprep.subr.bf16.mxu0 %v590_v0 }
  0x2b   :  { %541 = vmatpush3.bf16.msra.mxu0 %v576_v44 }
  0x2c   :  { %542 = vmatprep.subr.bf16.mxu0 %v590_v0 }
  0x2f   :  { %543 = vmatpush3.bf16.msra.mxu0 %v577_v45 }
  0x30   :  { %544 = vmatprep.subr.bf16.mxu0 %v590_v0 }
  0x33   :  { %545 = vmatpush3.bf16.msra.mxu0 %v578_v46 }
  0x34   :  { %546 = vmatprep.subr.bf16.mxu0 %v590_v0 }
  0x37   :  { %547 = vmatpush3.bf16.msra.mxu0 %v579_v47 }
  0x38   :  { %548 = vmatprep.subr.bf16.mxu0 %v590_v0 }
  0x3b   :  { %549 = vmatpush3.bf16.msra.mxu0 %v580_v48 }
  0x3c   :  { %550 = vmatprep.subr.bf16.mxu0 %v590_v0 }
  0x3f   :  { %551 = vmatpush3.bf16.msra.mxu0 %v581_v49 }
  0xf5   :  { %v162_v35 = vpop.f32.mrb[0].mxu0 }
  0xf6   :  { %v514_v36 = vpop.f32.mrb[1].mxu0  ;;  %v163_v38 = vadd.f32 %v431_v34, %v162_v35 }
  0xf7   :  { %v165_v37 = vpop.f32.mrb[2].mxu0 }
  0xf8   :  { %v166_v39 = vadd.f32 %v431_v34, %v165_v37  ;;  %v515_v40 = vpop.f32.mrb[3].mxu0 }
  0xfa   :  { %v169_v41 = vpack.c.bf16 %v166_v39, %v163_v38 }
  0xfc   :  { %533 = vmatmul.mubr.bf16.vlgmr.msra.gmra.mrb[0].mxu1 %v169_v41 }
 0x1cf   :  { %v270_v51 = vpop.f32.mrb[0].mxu1 }
 0x1d0   :  { %v271_v54 = vadd.f32 %v270_v51, %v186_v50  ;;  %v534_v55 = vpop.f32.mrb[1].mxu1 }
 0x1d1   :  { %v273_v56 = vpop.f32.mrb[2].mxu1 }
 0x1d2   :  { %v284_v57 = vadd.f32 %v448_v52, %v271_v54  ;;  %v274_v58 = vadd.f32 %v273_v56, %v187_v53  ;;  %v535_v59 = vpop.f32.mrb[3].mxu1 }
 0x1d4   :  { %v449_v60 = vmul.f32 -1.442695, %v284_v57  ;;  %v285_v61 = vadd.f32 %v448_v52, %v274_v58 }
 0x1d6   :  { %582 = vpow2.f32 %v449_v60  ;;  %v450_v62 = vmul.f32 -1.442695, %v285_v61 }
 0x1d8   :  { %584 = vpow2.f32 %v450_v62 }
 0x1e0   :  { %v583_v63 = vpop.eup %582 }
 0x1e1   :  { %v292_v0 = vadd.f32 1.0, %v583_v63 }
 0x1e2   :  { %v585_v1 = vpop.eup %584 }
 0x1e3   :  { %586 = vrcp.f32 %v292_v0  ;;  %v293_v2 = vadd.f32 1.0, %v585_v1 }
 0x1e5   :  { %588 = vrcp.f32 %v293_v2 }
 0x1ed   :  { %v587_v3 = vpop.eup %586 }
 0x1ee   :  { %v298_v5 = vmul.f32 %v587_v3, %v284_v57 }
 0x1ef   :  { %v589_v4 = vpop.eup %588 }
 0x1f0   :  { %v299_v6 = vmul.f32 %v589_v4, %v285_v61 }
 0x1f2   :  { %v300_v7 = vpack.c.bf16 %v299_v6, %v298_v5 }
 0x1f4   :  { %553 = vmatmul.mubr.bf16.vlgmr.msra.gmra.mrb[4].mxu0 %v300_v7 }
 0x2c7   :  { %v406_v9 = vpop.f32.mrb[4].mxu0 }
 0x2c8   :  { %v554_v10 = vpop.f32.mrb[5].mxu0  ;;  %v407_v12 = vadd.f32 %v451_v8, %v406_v9 }
 0x2c9   :  { %v409_v11 = vpop.f32.mrb[6].mxu0 }
 0x2ca   :  { %v410_v13 = vadd.f32 %v451_v8, %v409_v11  ;;  %v555_v14 = vpop.f32.mrb[7].mxu0 }
 0x2cc   :  { %v467_v15 = vpack.c.bf16 %v410_v13, %v407_v12 }
 0x2ce   :  { %468 = vst [vmem:[%s807_s10] sm:$0xff] %v467_v15  }

// kernel: pi0_forward.4
= control target key start
LH: loop header
LB: loop body
LE: loop exit
PB: predicated region body
PF: predicated region fallthrough
CT: control target
= control target key end

     0   :  { %s716_s12 = smov 0   ;;  %s770_s0 = inlined_call_operand.vmem [shape: bf16[256,48], index: 0, kind: input, shape index: {}]   ;;  %s771_s1 = inlined_call_operand.vmem [shape: bf16[48,128], index: 1, kind: input, shape index: {}]   ;;  %s772_s2 = inlined_call_operand.vmem [shape: f32[1,128], index: 2, kind: input, shape index: {}]   ;;  %s773_s3 = inlined_call_operand.vmem [shape: bf16[256,128], index: 3, kind: output, shape index: {}]  }
   0x1 LB: > { %s520_s13 = sadd.s32 4294967295, %s694_s12   ;;  %p524_p0 = scmp.ge.s32.totalorder %s694_s12, 1  ;;  %s694_s12 = sphi %s716_s12, %s13_s12  }
   0x2   : > { %p138_p1 = scmp.lt.s32.totalorder %s694_s12, 3 }
   0x4   : > { %p139_p2 = pnand %p524_p0, %p138_p1 }
   0x5   : > { %v677_v0 = vld [vmem:[%s771_s1] sm:$0xff] (!%p139_p2)   ;;  %s525_s16 = sshll.u32 (!%p139_p2), %s520_s13, 4  ;;  %v678_v1 = vld [vmem:[%s771_s1 + $0x8] sm:$0xff] (!%p139_p2)   ;;  %v679_v2 = vld [vmem:[%s771_s1 + $0x10] sm:$0xff] (!%p139_p2)   ;;  %vm262_vm0 = vcmask (!%p139_p2), 392192  }
   0x6   : > { %142 = sbr.rel (%p139_p2) target bundleno = 247 (0xf7), region = 32  ;;  %p163_p3 = scmp.lt.s32.totalorder (!%p139_p2), %s525_s16, 31  ;;  %641 = vmatprep.subr.bf16.mxu0 (!%p139_p2), %v677_v0  ;;  %663 = vmatprep.subr.bf16.mxu1 (!%p139_p2), %v677_v0  ;;  %v529_v12 = vld [vmem:[%s772_s2] ss:$0 sm:$0xff] (!%p139_p2) }
   0x7   : > { %642 = vmatpush3.bf16.msra.mxu0 (!%p139_p2), %v677_v0  ;;  %666 = vmatpush3.bf16.msra.mxu1 (!%p139_p2), %v677_v0 }
   0x8   : > { %643 = vmatprep.subr.bf16.mxu0 (!%p139_p2), %v678_v1  ;;  %664 = vmatprep.subr.bf16.mxu1 (!%p139_p2), %v678_v1 }
   0xb   : > { %644 = vmatpush3.bf16.msra.mxu0 (!%p139_p2), %v678_v1  ;;  %667 = vmatpush3.bf16.msra.mxu1 (!%p139_p2), %v678_v1 }
   0xc   : > { %645 = vmatprep.subr.bf16.mxu0 (!%p139_p2), %v679_v2  ;;  %665 = vmatprep.subr.bf16.mxu1 (!%p139_p2), %v679_v2 }
   0xd   : > { %s775_s16 = smov (!%p163_p3, %s525_s16), 31 }
   0xe   : > { %s526_s21 = sshll.u32 %s775_s16, 2 }
   0xf   : > { %s166_s24 = scalar_lea.vmem %s770_s0, %s526_s21  ;;  %646 = vmatpush3.bf16.msra.mxu0 %v679_v2  ;;  %668 = vmatpush3.bf16.msra.mxu1 %v679_v2  ;;  %s757_s29 = scalar_lea.vmem %s773_s3, %s526_s21 }
  0x10   : > { %v680_v3 = vld [vmem:[%s166_s24] sm:$0xff]   ;;  %v682_v5 = vld [vmem:[%s166_s24 + $0x8] sm:$0xff]   ;;  %v684_v7 = vld [vmem:[%s166_s24 + $0x10] sm:$0xff]  }
  0x11   : > { %v681_v4 = vld [vmem:[%s166_s24 + $0x20] sm:$0xff]   ;;  %647 = vmatprep.mubr.msk.bf16.mxu0 %vm262_vm0, %v680_v3  ;;  %v683_v6 = vld [vmem:[%s166_s24 + $0x28] sm:$0xff]   ;;  %v685_v8 = vld [vmem:[%s166_s24 + $0x30] sm:$0xff]  }
  0x12   : > { %655 = vmatprep.mubr.msk.bf16.mxu1 %vm262_vm0, %v681_v4  ;;  %648 = vmatmul.mubr.msk.bf16.vlgmr.msra.gmra.mrb[0].mxu0 %vm262_vm0, %v682_v5  ;;  %v686_v9 = vld [vmem:[%s166_s24 + $0x18] sm:$0xff]  }
  0x13   : > { %656 = vmatmul.mubr.msk.bf16.vlgmr.msra.gmra.mrb[0].mxu1 %vm262_vm0, %v683_v6  ;;  %651 = vmatprep.mubr.msk.bf16.mxu0 %vm262_vm0, %v684_v7  ;;  %v687_v10 = vld [vmem:[%s166_s24 + $0x38] sm:$0xff]  }
  0x14   : > { %659 = vmatprep.mubr.msk.bf16.mxu1 %vm262_vm0, %v685_v8 }
  0x1a   : > { %652 = vmatmul.mubr.msk.bf16.gmra.mrb[4].mxu0 %vm262_vm0, %v686_v9 }
  0x1b   : > { %660 = vmatmul.mubr.msk.bf16.gmra.mrb[4].mxu1 %vm262_vm0, %v687_v10 }
  0xe5   : > { %v649_v11 = vpop.f32.mrb[0].mxu0 }
  0xe6   : > { %v657_v13 = vpop.f32.mrb[0].mxu1  ;;  %v321_v14 = vpop.f32.mrb[1].mxu0  ;;  %v330_v18 = vadd.f32 %v649_v11, %v529_v12 }
  0xe7   : > { %v353_v15 = vpop.f32.mrb[1].mxu1  ;;  %v650_v16 = vpop.f32.mrb[2].mxu0  ;;  %v362_v19 = vadd.f32 %v657_v13, %v529_v12  ;;  %v322_v24 = vadd.f32 %v529_v12, %v321_v14 }
  0xe8   : > { %v658_v17 = vpop.f32.mrb[2].mxu1  ;;  %v333_v20 = vadd.f32 %v650_v16, %v529_v12  ;;  %v324_v22 = vpop.f32.mrb[3].mxu0  ;;  %v354_v25 = vadd.f32 %v529_v12, %v353_v15 }
  0xe9   : > { %v365_v21 = vadd.f32 %v658_v17, %v529_v12  ;;  %v356_v23 = vpop.f32.mrb[3].mxu1  ;;  %v325_v26 = vadd.f32 %v529_v12, %v324_v22 }
  0xea   : > { %v357_v27 = vadd.f32 %v529_v12, %v356_v23  ;;  %v591_v28 = vpack.c.bf16 %v333_v20, %v330_v18 }
  0xeb   : > { %v611_v29 = vpack.c.bf16 %v365_v21, %v362_v19  ;;  %v586_v30 = vpack.c.bf16 %v325_v26, %v322_v24 }
  0xec   : > { %v606_v31 = vpack.c.bf16 %v357_v27, %v354_v25  ;;  %623 = vst [vmem:[%s757_s29 + $0x8] sm:$0xff] %v591_v28  }
  0xed   : > { %627 = vst [vmem:[%s757_s29 + $0x28] sm:$0xff] %v611_v29   ;;  %587 = vst [vmem:[%s757_s29] sm:$0xff] %v586_v30   ;;  %v653_v32 = vpop.f32.mrb[4].mxu0 }
  0xee   : > { %626 = vst [vmem:[%s757_s29 + $0x20] sm:$0xff] %v606_v31   ;;  %v661_v33 = vpop.f32.mrb[4].mxu1  ;;  %v337_v34 = vpop.f32.mrb[5].mxu0  ;;  %v346_v38 = vadd.f32 %v653_v32, %v529_v12 }
  0xef   : > { %v369_v35 = vpop.f32.mrb[5].mxu1  ;;  %v654_v36 = vpop.f32.mrb[6].mxu0  ;;  %v378_v39 = vadd.f32 %v661_v33, %v529_v12  ;;  %v338_v44 = vadd.f32 %v529_v12, %v337_v34 }
  0xf0   : > { %v662_v37 = vpop.f32.mrb[6].mxu1  ;;  %v349_v40 = vadd.f32 %v654_v36, %v529_v12  ;;  %v340_v42 = vpop.f32.mrb[7].mxu0  ;;  %v370_v45 = vadd.f32 %v529_v12, %v369_v35 }
  0xf1   : > { %v381_v41 = vadd.f32 %v662_v37, %v529_v12  ;;  %v372_v43 = vpop.f32.mrb[7].mxu1  ;;  %v341_v46 = vadd.f32 %v529_v12, %v340_v42 }
  0xf2   : > { %v373_v47 = vadd.f32 %v529_v12, %v372_v43  ;;  %v601_v48 = vpack.c.bf16 %v349_v40, %v346_v38 }
  0xf3   : > { %v621_v49 = vpack.c.bf16 %v381_v41, %v378_v39  ;;  %v596_v50 = vpack.c.bf16 %v341_v46, %v338_v44 }
  0xf4   : > { %v616_v51 = vpack.c.bf16 %v373_v47, %v370_v45  ;;  %625 = vst [vmem:[%s757_s29 + $0x18] sm:$0xff] %v601_v48  }
  0xf5   : > { %629 = vst [vmem:[%s757_s29 + $0x38] sm:$0xff] %v621_v49   ;;  %624 = vst [vmem:[%s757_s29 + $0x10] sm:$0xff] %v596_v50  }
  0xf6   : > { %628 = vst [vmem:[%s757_s29 + $0x30] sm:$0xff] %v616_v51  }
  0xf7 PF: > { %s13_s12 = sadd.s32 1, %s694_s12  }
  0xf8   : > { %p10_p4 = scmp.ge.s32.totalorder %s13_s12, 4  }
  0xfa   :  { %12 = sbr.rel (!%p10_p4) target bundleno = 1 (0x1), region = 62 }

// kernel: pi0_forward.6
= control target key start
LH: loop header
LB: loop body
LE: loop exit
PB: predicated region body
PF: predicated region fallthrough
CT: control target
= control target key end

     0   :  { %s6757_s24 = smov 0   ;;  %s8548_s0 = inlined_call_operand.vmem [shape: bf16[2,256,128], index: 0, kind: input, shape index: {}]   ;;  %s8549_s1 = inlined_call_operand.vmem [shape: f32[2,256,1], index: 1, kind: input, shape index: {}]   ;;  %s8550_s2 = inlined_call_operand.vmem [shape: f32[2,1,256], index: 2, kind: input, shape index: {}]   ;;  %s8551_s3 = inlined_call_operand.vmem [shape: bf16[128,384], index: 3, kind: input, shape index: {}]   ;;  %s8552_s4 = inlined_call_operand.vmem [shape: bf16[128,128], index: 4, kind: input, shape index: {}]   ;;  %s8553_s5 = inlined_call_operand.vmem [shape: bf16[128,512], index: 5, kind: input, shape index: {}]   ;;  %s8554_s6 = inlined_call_operand.vmem [shape: bf16[512,128], index: 6, kind: input, shape index: {}]   ;;  %s8555_s7 = inlined_call_operand.vmem [shape: bf16[2,256,128], index: 7, kind: output, shape index: {}]  }
   0x1 LB: > { %s4881_s25 = sadd.s32 4294967295, %s6714_s24   ;;  %p4885_p0 = scmp.ge.s32.totalorder %s6714_s24, 1  ;;  %s6714_s24 = sphi %s6757_s24, %s17_s24  }
   0x2   : > { %p256_p1 = scmp.lt.s32.totalorder %s6714_s24, 3 }
   0x4   : > { %p257_p2 = pnand %p4885_p0, %p256_p1 }
   0x6   : > { %260 = sbr.rel (%p257_p2) target bundleno = 1947 (0x79b), region = 48 }
   0xd   : > { %v5836_v0 = vld [vmem:[%s8551_s3 + $0x4] ss:$12 sps:$4 sm:$0xff]   ;;  %p297_p3 = scmp.lt.s32.totalorder %s4881_s25, 1  ;;  %v5838_v1 = vld [vmem:[%s8551_s3] ss:$12 sps:$4 sm:$0xff]   ;;  %v8556_v2 = vmov 0  }
   0xe   : > { %637 = vmatprep.mubr.bf16.mxu0 %v8556_v2  ;;  %5834 = vset.pattern.permute.xlu0 %v8556_v2  ;;  %v5839_v3 = vld [vmem:[%s8551_s3 + $0x1c] ss:$12 sps:$4 sm:$0xff]   ;;  %v5841_v4 = vld [vmem:[%s8551_s3 + $0x18] ss:$12 sps:$4 sm:$0xff]   ;;  %v5842_v5 = vld [vmem:[%s8551_s3 + $0x34] ss:$12 sps:$4 sm:$0xff]  }
   0xf   : > { %605 = vmatprep.subr.bf16.mxu0 %v5836_v0  ;;  %s8739_s25 = smov (!%p297_p3, %s4881_s25), 1  ;;  %5835 = vset.pattern.permute.xlu1 %v8556_v2  ;;  %v5844_v6 = vld [vmem:[%s8551_s3 + $0x30] ss:$12 sps:$4 sm:$0xff]   ;;  %v5845_v7 = vld [vmem:[%s8551_s3 + $0x4c] ss:$12 sps:$4 sm:$0xff]  }
  0x10   : > { %606 = vmatpush1.bf16.msra.mxu0 %v5838_v1  ;;  %s5167_s13 = sshll.u32 %s8739_s25, 7  ;;  %v5847_v9 = vld [vmem:[%s8551_s3 + $0x48] ss:$12 sps:$4 sm:$0xff]   ;;  %v5848_v10 = vld [vmem:[%s8551_s3 + $0x64] ss:$12 sps:$4 sm:$0xff]   ;;  %s5168_s16 = sshll.u32 %s8739_s25, 8 }
  0x11   : > { %607 = vmatprep.subr.bf16.mxu0 %v5839_v3  ;;  %s6794_s18 = scalar_lea.vmem %s8548_s0, %s5167_s13  ;;  %v5850_v11 = vld [vmem:[%s8551_s3 + $0x60] ss:$12 sps:$4 sm:$0xff]   ;;  %v5851_v12 = vld [vmem:[%s8551_s3 + $0x7c] ss:$12 sps:$4 sm:$0xff]   ;;  %v5853_v13 = vld [vmem:[%s8551_s3 + $0x78] ss:$12 sps:$4 sm:$0xff]   ;;  %s6942_s20 = scalar_lea.vmem %s8549_s1, %s5168_s16 }
  0x12   : > { %v317_v8 = vld [vmem:[%s6794_s18] sm:$0xff]   ;;  %v5856_v15 = vld [vmem:[%s8551_s3 + $0x90] ss:$12 sps:$4 sm:$0xff]   ;;  %v5857_v16 = vld [vmem:[%s8551_s3 + $0xac] ss:$12 sps:$4 sm:$0xff]   ;;  %s4890_s21 = sshll.u32 %s8739_s25, 1  ;;  %s8481_s17 = scalar_lea.vmem %s8555_s7, %s5167_s13 }
  0x13   : > { %5745 = vmatprep.mubr.bf16.mxu1 %v317_v8  ;;  %v5854_v14 = vld [vmem:[%s8551_s3 + $0x94] ss:$12 sps:$4 sm:$0xff]   ;;  %v5878_v20 = vld [vmem:[%s8551_s3 + $0x38] ss:$12 sps:$4 sm:$0xff]   ;;  %v5879_v21 = vld [vmem:[%s8551_s3 + $0x50] ss:$12 sps:$4 sm:$0xff]   ;;  %s310_s26 = scalar_lea.vmem %s8550_s2, %s4890_s21 }
  0x14   : > { %608 = vmatpush1.bf16.msra.mxu0 %v5841_v4  ;;  %v5876_v17 = vld [vmem:[%s8551_s3 + $0x8] ss:$12 sps:$4 sm:$0xff]   ;;  %v5877_v18 = vld [vmem:[%s8551_s3 + $0x20] ss:$12 sps:$4 sm:$0xff]   ;;  %v5882_v26 = vld [vmem:[%s8551_s3 + $0x98] ss:$12 sps:$4 sm:$0xff]  }
  0x15   : > { %609 = vmatprep.subr.bf16.mxu0 %v5842_v5  ;;  %v5859_v19 = vld [vmem:[%s8551_s3 + $0xa8] ss:$12 sps:$4 sm:$0xff]   ;;  %5729 = vmatprep.subr.bf16.mxu1 %v5876_v17  ;;  %v5881_v24 = vld [vmem:[%s8551_s3 + $0x80] ss:$12 sps:$4 sm:$0xff]   ;;  %v5883_v27 = vld [vmem:[%s8551_s3 + $0xb0] ss:$12 sps:$4 sm:$0xff]  }
  0x16   : > { %5730 = vmatpush3.bf16.msra.mxu1 %v5876_v17  ;;  %v319_v22 = vld [vmem:[%s6794_s18 + $0x8] sm:$0xff]   ;;  %v321_v25 = vld [vmem:[%s6794_s18 + $0x10] sm:$0xff]   ;;  %v323_v28 = vld [vmem:[%s6794_s18 + $0x18] sm:$0xff]  }
  0x17   : > { %5731 = vmatprep.subr.bf16.mxu1 %v5877_v18  ;;  %v5880_v23 = vld [vmem:[%s8551_s3 + $0x68] ss:$12 sps:$4 sm:$0xff]   ;;  %v325_v29 = vld [vmem:[%s6794_s18 + $0x20] sm:$0xff]   ;;  %v331_v32 = vld [vmem:[%s6794_s18 + $0x38] sm:$0xff]  }
  0x18   : > { %610 = vmatpush1.bf16.msra.mxu0 %v5844_v6  ;;  %v327_v30 = vld [vmem:[%s6794_s18 + $0x28] sm:$0xff]   ;;  %v329_v31 = vld [vmem:[%s6794_s18 + $0x30] sm:$0xff]   ;;  %v333_v33 = vld [vmem:[%s6794_s18 + $0x40] sm:$0xff]  }
  0x19   : > { %611 = vmatprep.subr.bf16.mxu0 %v5845_v7  ;;  %v335_v34 = vld [vmem:[%s6794_s18 + $0x48] sm:$0xff]   ;;  %v337_v35 = vld [vmem:[%s6794_s18 + $0x50] sm:$0xff]   ;;  %v339_v36 = vld [vmem:[%s6794_s18 + $0x58] sm:$0xff]  }
  0x1a   : > { %5732 = vmatpush3.bf16.msra.mxu1 %v5877_v18  ;;  %v341_v37 = vld [vmem:[%s6794_s18 + $0x60] sm:$0xff]   ;;  %v343_v38 = vld [vmem:[%s6794_s18 + $0x68] sm:$0xff]   ;;  %v345_v39 = vld [vmem:[%s6794_s18 + $0x70] sm:$0xff]  }
  0x1b   : > { %5733 = vmatprep.subr.bf16.mxu1 %v5878_v20  ;;  %v347_v40 = vld [vmem:[%s6794_s18 + $0x78] sm:$0xff]  }
  0x1c   : > { %612 = vmatpush1.bf16.msra.mxu0 %v5847_v9 }
  0x1d   : > { %613 = vmatprep.subr.bf16.mxu0 %v5848_v10 }
  0x1e   : > { %5734 = vmatpush3.bf16.msra.mxu1 %v5878_v20 }
  0x1f   : > { %5735 = vmatprep.subr.bf16.mxu1 %v5879_v21 }
  0x20   : > { %614 = vmatpush1.bf16.msra.mxu0 %v5850_v11 }
  0x21   : > { %615 = vmatprep.subr.bf16.mxu0 %v5851_v12 }
  0x22   : > { %5736 = vmatpush3.bf16.msra.mxu1 %v5879_v21 }
  0x23   : > { %5737 = vmatprep.subr.bf16.mxu1 %v5880_v23 }
  0x24   : > { %616 = vmatpush1.bf16.msra.mxu0 %v5853_v13 }
  0x25   : > { %617 = vmatprep.subr.bf16.mxu0 %v5854_v14 }
  0x26   : > { %5738 = vmatpush3.bf16.msra.mxu1 %v5880_v23 }
  0x27   : > { %5739 = vmatprep.subr.bf16.mxu1 %v5881_v24 }
  0x28   : > { %618 = vmatpush1.bf16.msra.mxu0 %v5856_v15 }
  0x29   : > { %619 = vmatprep.subr.bf16.mxu0 %v5857_v16 }
  0x2a   : > { %5740 = vmatpush3.bf16.msra.mxu1 %v5881_v24 }
  0x2b   : > { %5741 = vmatprep.subr.bf16.mxu1 %v5882_v26 }
  0x2c   : > { %620 = vmatpush1.bf16.msra.mxu0 %v5859_v19 }
  0x2e   : > { %5742 = vmatpush3.bf16.msra.mxu1 %v5882_v26 }
  0x2f   : > { %638 = vmatmul.mubr.bf16.vlgmr.msra.gmra.mrb[0].mxu0 %v317_v8  ;;  %5743 = vmatprep.subr.bf16.mxu1 %v5883_v27 }
  0x30   : > { %647 = vmatprep.mubr.bf16.mxu0 %v8556_v2 }
  0x32   : > { %5744 = vmatpush3.bf16.msra.mxu1 %v5883_v27  ;;  %v1203_v27 = vld [vmem:[%s6942_s20 + $0x10] sm:$0xff] }
  0x33   : > { %1256 = vperm.xlu1 %5835, %v1203_v27  }
  0x35   : > { %5746 = vmatmul.mubr.bf16.vlgmr.msra.gmra.mrb[0].mxu1 %v319_v22 }
  0x36   : > { %5749 = vmatprep.mubr.bf16.mxu1 %v321_v25 }
  0x37   : > { %648 = vmatmul.mubr.bf16.gmra.mrb[4].mxu0 %v319_v22  ;;  %v1201_v22 = vld [vmem:[%s6942_s20] sm:$0xff] }
  0x38   : > { %657 = vmatprep.mubr.bf16.mxu0 %v8556_v2  ;;  %1246 = vperm.xlu0 %5834, %v1201_v22  }
  0x3d   : > { %5750 = vmatmul.mubr.bf16.gmra.mrb[4].mxu1 %v323_v28 }
  0x3e   : > { %5753 = vmatprep.mubr.bf16.mxu1 %v325_v29 }
  0x3f   : > { %658 = vmatmul.mubr.bf16.gmra.mrb[8].mxu0 %v321_v25 }
  0x40   : > { %667 = vmatprep.mubr.bf16.mxu0 %v8556_v2 }
  0x45   : > { %5754 = vmatmul.mubr.bf16.gmra.mrb[8].mxu1 %v327_v30 }
  0x46   : > { %5757 = vmatprep.mubr.bf16.mxu1 %v329_v31 }
  0x47   : > { %668 = vmatmul.mubr.bf16.gmra.mrb[12].mxu0 %v323_v28  ;;  %v1202_v28 = vld [vmem:[%s6942_s20 + $0x8] sm:$0xff] }
  0x48   : > { %677 = vmatprep.mubr.bf16.mxu0 %v8556_v2  ;;  %1251 = vperm.xlu0 %5834, %v1202_v28  }
  0x4d   : > { %5758 = vmatmul.mubr.bf16.gmra.mrb[12].mxu1 %v331_v32 }
  0x4e   : > { %5761 = vmatprep.mubr.bf16.mxu1 %v333_v33 }
  0x4f   : > { %678 = vmatmul.mubr.bf16.gmra.mrb[16].mxu0 %v325_v29  ;;  %v1204_v29 = vld [vmem:[%s6942_s20 + $0x18] sm:$0xff] }
  0x50   : > { %687 = vmatprep.mubr.bf16.mxu0 %v8556_v2  ;;  %1261 = vperm.xlu1 %5835, %v1204_v29  }
  0x55   : > { %5762 = vmatmul.mubr.bf16.gmra.mrb[16].mxu1 %v335_v34 }
  0x56   : > { %5765 = vmatprep.mubr.bf16.mxu1 %v337_v35 }
  0x57   : > { %688 = vmatmul.mubr.bf16.gmra.mrb[20].mxu0 %v327_v30  ;;  %v1205_v30 = vld [vmem:[%s6942_s20 + $0x20] sm:$0xff] }
  0x58   : > { %697 = vmatprep.mubr.bf16.mxu0 %v8556_v2  ;;  %1266 = vperm.xlu0 %5834, %v1205_v30   ;;  %v1218_v30 = vld [vmem:[%s6942_s20 + $0x88] sm:$0xff] }
  0x5d   : > { %5766 = vmatmul.mubr.bf16.gmra.mrb[20].mxu1 %v339_v36 }
  0x5e   : > { %5769 = vmatprep.mubr.bf16.mxu1 %v341_v37 }
  0x5f   : > { %698 = vmatmul.mubr.bf16.gmra.mrb[24].mxu0 %v329_v31 }
  0x60   : > { %707 = vmatprep.mubr.bf16.mxu0 %v8556_v2 }
  0x65   : > { %5770 = vmatmul.mubr.bf16.gmra.mrb[24].mxu1 %v343_v38 }
  0x66   : > { %5773 = vmatprep.mubr.bf16.mxu1 %v345_v39 }
  0x67   : > { %708 = vmatmul.mubr.bf16.gmra.mrb[28].mxu0 %v331_v32 }
  0x68   : > { %717 = vmatprep.mubr.bf16.mxu0 %v8556_v2 }
  0x6d   : > { %5774 = vmatmul.mubr.bf16.gmra.mrb[28].mxu1 %v347_v40 }
  0x6f   : > { %718 = vmatmul.mubr.bf16.gmra.mrb[32].mxu0 %v333_v33 }
  0x70   : > { %727 = vmatprep.mubr.bf16.mxu0 %v8556_v2 }
  0x77   : > { %728 = vmatmul.mubr.bf16.gmra.mrb[36].mxu0 %v335_v34 }
  0x78   : > { %737 = vmatprep.mubr.bf16.mxu0 %v8556_v2 }
  0x7f   : > { %738 = vmatmul.mubr.bf16.gmra.mrb[40].mxu0 %v337_v35 }
  0x80   : > { %747 = vmatprep.mubr.bf16.mxu0 %v8556_v2 }
  0x87   : > { %748 = vmatmul.mubr.bf16.gmra.mrb[44].mxu0 %v339_v36 }
  0x88   : > { %757 = vmatprep.mubr.bf16.mxu0 %v8556_v2 }
  0x8f   : > { %758 = vmatmul.mubr.bf16.gmra.mrb[48].mxu0 %v341_v37  ;;  %v1206_v37 = vld [vmem:[%s6942_s20 + $0x28] sm:$0xff] }
  0x90   : > { %767 = vmatprep.mubr.bf16.mxu0 %v8556_v2  ;;  %1271 = vperm.xlu1 %5835, %v1206_v37  }
  0x97   : > { %768 = vmatmul.mubr.bf16.gmra.mrb[52].mxu0 %v343_v38  ;;  %v1207_v38 = vld [vmem:[%s6942_s20 + $0x30] sm:$0xff] }
  0x98   : > { %777 = vmatprep.mubr.bf16.mxu0 %v8556_v2  ;;  %1276 = vperm.xlu0 %5834, %v1207_v38   ;;  %v1222_v38 = vld [vmem:[%s6942_s20 + $0xa8] sm:$0xff] }
  0x9f   : > { %778 = vmatmul.mubr.bf16.gmra.mrb[56].mxu0 %v345_v39  ;;  %v1208_v39 = vld [vmem:[%s6942_s20 + $0x38] sm:$0xff] }
  0xa0   : > { %787 = vmatprep.mubr.bf16.mxu0 %v8556_v2  ;;  %1281 = vperm.xlu1 %5835, %v1208_v39   ;;  %v1223_v39 = vld [vmem:[%s6942_s20 + $0xb0] sm:$0xff] }
  0xa7   : > { %788 = vmatmul.mubr.bf16.gmra.mrb[60].mxu0 %v347_v40 }
 0x102   : > { %v639_v41 = vpop.f32.mrb[0].mxu0 }
 0x103   : > { %v6881_v42 = vpop.f32.mrb[1].mxu0 }
 0x104   : > { %v643_v43 = vpop.f32.mrb[2].mxu0 }
 0x105   : > { %v6883_v44 = vpack.c.bf16 %v643_v43, %v639_v41  ;;  %v6885_v45 = vpop.f32.mrb[3].mxu0  ;;  %v1209_v41 = vld [vmem:[%s6942_s20 + $0x40] sm:$0xff] }
 0x106   : > { %v960_v46 = vpack.c.bf16 %v6885_v45, %v6881_v42  ;;  %1286 = vperm.xlu0 %5834, %v1209_v41   ;;  %v1212_v42 = vld [vmem:[%s6942_s20 + $0x58] sm:$0xff] }
 0x107   : > { %5337 = vmatprep.mubr.bf16.mxu1 %v6883_v44 }
 0x10a   : > { %v649_v47 = vpop.f32.mrb[4].mxu0 }
 0x10b   : > { %v6890_v48 = vpop.f32.mrb[5].mxu0 }
 0x10c   : > { %v653_v49 = vpop.f32.mrb[6].mxu0 }
 0x10d   : > { %v6892_v50 = vpack.c.bf16 %v653_v49, %v649_v47  ;;  %v6894_v51 = vpop.f32.mrb[7].mxu0 }
 0x10e   : > { %v963_v52 = vpack.c.bf16 %v6894_v51, %v6890_v48  ;;  %v1216_v48 = vld [vmem:[%s6942_s20 + $0x78] sm:$0xff] }
 0x112   : > { %v659_v53 = vpop.f32.mrb[8].mxu0 }
 0x113   : > { %v6898_v54 = vpop.f32.mrb[9].mxu0 }
 0x114   : > { %v663_v55 = vpop.f32.mrb[10].mxu0 }
 0x115   : > { %v6900_v56 = vpack.c.bf16 %v663_v55, %v659_v53  ;;  %v6902_v57 = vpop.f32.mrb[11].mxu0 }
 0x116   : > { %v966_v58 = vpack.c.bf16 %v6902_v57, %v6898_v54  ;;  %v1220_v54 = vld [vmem:[%s6942_s20 + $0x98] sm:$0xff] }
 0x11a   : > { %v669_v59 = vpop.f32.mrb[12].mxu0 }
 0x11b   : > { %v6906_v60 = vpop.f32.mrb[13].mxu0 }
 0x11c   : > { %v673_v61 = vpop.f32.mrb[14].mxu0 }
 0x11d   : > { %v6908_v62 = vpack.c.bf16 %v673_v61, %v669_v59  ;;  %v6910_v63 = vpop.f32.mrb[15].mxu0  ;;  %v1210_v59 = vld [vmem:[%s6942_s20 + $0x48] sm:$0xff]  ;;  %v1211_v61 = vld [vmem:[%s6942_s20 + $0x50] sm:$0xff] }
 0x11e   : > { %v969_v0 = vpack.c.bf16 %v6910_v63, %v6906_v60  ;;  %1291 = vperm.xlu1 %5835, %v1210_v59   ;;  %1296 = vperm.xlu0 %5834, %v1211_v61   ;;  %v1224_v60 = vld [vmem:[%s6942_s20 + $0xb8] sm:$0xff]  ;;  %v1227_v59 = vld [vmem:[%s6942_s20 + $0xd0] sm:$0xff] }
 0x122   : > { %v679_v1 = vpop.f32.mrb[16].mxu0  ;;  %1301 = vperm.xlu1 %5835, %v1212_v42  }
 0x123   : > { %v6914_v3 = vpop.f32.mrb[17].mxu0 }
 0x124   : > { %v683_v4 = vpop.f32.mrb[18].mxu0 }
 0x125   : > { %v6916_v5 = vpack.c.bf16 %v683_v4, %v679_v1  ;;  %v6918_v6 = vpop.f32.mrb[19].mxu0 }
 0x126   : > { %v972_v7 = vpack.c.bf16 %v6918_v6, %v6914_v3  ;;  %v1228_v3 = vld [vmem:[%s6942_s20 + $0xd8] sm:$0xff] }
 0x12a   : > { %v689_v8 = vpop.f32.mrb[20].mxu0 }
 0x12b   : > { %v6922_v9 = vpop.f32.mrb[21].mxu0 }
 0x12c   : > { %v693_v10 = vpop.f32.mrb[22].mxu0 }
 0x12d   : > { %v6924_v11 = vpack.c.bf16 %v693_v10, %v689_v8  ;;  %v6926_v12 = vpop.f32.mrb[23].mxu0 }
 0x12e   : > { %v975_v13 = vpack.c.bf16 %v6926_v12, %v6922_v9 }
 0x132   : > { %v699_v14 = vpop.f32.mrb[24].mxu0 }
 0x133   : > { %v6930_v15 = vpop.f32.mrb[25].mxu0 }
 0x134   : > { %v703_v16 = vpop.f32.mrb[26].mxu0 }
 0x135   : > { %v6932_v17 = vpack.c.bf16 %v703_v16, %v699_v14  ;;  %v6934_v18 = vpop.f32.mrb[27].mxu0  ;;  %v1214_v16 = vld [vmem:[%s6942_s20 + $0x68] sm:$0xff] }
 0x136   : > { %v978_v19 = vpack.c.bf16 %v6934_v18, %v6930_v15  ;;  %1311 = vperm.xlu1 %5835, %v1214_v16  }
 0x13a   : > { %v709_v20 = vpop.f32.mrb[28].mxu0  ;;  %1321 = vperm.xlu1 %5835, %v1216_v48  }
 0x13b   : > { %v6944_v21 = vpop.f32.mrb[29].mxu0 }
 0x13c   : > { %v713_v23 = vpop.f32.mrb[30].mxu0 }
 0x13d   : > { %v6947_v24 = vpack.c.bf16 %v713_v23, %v709_v20  ;;  %v6949_v25 = vpop.f32.mrb[31].mxu0  ;;  %v1215_v20 = vld [vmem:[%s6942_s20 + $0x70] sm:$0xff] }
 0x13e   : > { %v981_v26 = vpack.c.bf16 %v6949_v25, %v6944_v21  ;;  %1331 = vperm.xlu1 %5835, %v1218_v30  }
 0x142   : > { %v719_v31 = vpop.f32.mrb[32].mxu0  ;;  %1341 = vperm.xlu1 %5835, %v1220_v54  }
 0x143   : > { %v721_v32 = vpop.f32.mrb[33].mxu0 }
 0x144   : > { %v723_v33 = vpop.f32.mrb[34].mxu0 }
 0x145   : > { %v6957_v34 = vpack.c.bf16 %v723_v33, %v719_v31  ;;  %v725_v35 = vpop.f32.mrb[35].mxu0  ;;  %v1219_v31 = vld [vmem:[%s6942_s20 + $0x90] sm:$0xff] }
 0x146   : > { %v984_v36 = vpack.c.bf16 %v725_v35, %v721_v32  ;;  %1351 = vperm.xlu1 %5835, %v1222_v38  }
 0x148   : > { %5321 = vmatprep.subr.bf16.mxu1 %v984_v36 }
 0x149   : > { %5322 = vmatpush3.bf16.xpose.msra.mxu1 %v960_v46  ;;  %v1213_v46 = vld [vmem:[%s6942_s20 + $0x60] sm:$0xff] }
 0x14a   : > { %v729_v40 = vpop.f32.mrb[36].mxu0  ;;  %1306 = vperm.xlu0 %5834, %v1213_v46   ;;  %1361 = vperm.xlu1 %5835, %v1224_v60  }
 0x14b   : > { %v731_v43 = vpop.f32.mrb[37].mxu0 }
 0x14c   : > { %v733_v47 = vpop.f32.mrb[38].mxu0 }
 0x14d   : > { %v6966_v49 = vpack.c.bf16 %v733_v47, %v729_v40  ;;  %v735_v53 = vpop.f32.mrb[39].mxu0 }
 0x14e   : > { %v987_v55 = vpack.c.bf16 %v735_v53, %v731_v43  ;;  %1316 = vperm.xlu0 %5834, %v1215_v20   ;;  %v5747_v20 = vpop.f32.mrb[0].mxu1 }
 0x14f   : > { %v832_v48 = vpop.f32.mrb[1].mxu1 }
 0x150   : > { %5323 = vmatprep.subr.bf16.mxu1 %v987_v55  ;;  %v1226_v55 = vld [vmem:[%s6942_s20 + $0xc8] sm:$0xff] }
 0x151   : > { %5324 = vmatpush3.bf16.xpose.msra.mxu1 %v963_v52  ;;  %v1217_v52 = vld [vmem:[%s6942_s20 + $0x80] sm:$0xff]  ;;  %1371 = vperm.xlu1 %5835, %v1226_v55  }
 0x152   : > { %v739_v45 = vpop.f32.mrb[40].mxu0  ;;  %1326 = vperm.xlu0 %5834, %v1217_v52  }
 0x153   : > { %v741_v1 = vpop.f32.mrb[41].mxu0 }
 0x154   : > { %v743_v4 = vpop.f32.mrb[42].mxu0 }
 0x155   : > { %v6975_v8 = vpack.c.bf16 %v743_v4, %v739_v45  ;;  %v745_v10 = vpop.f32.mrb[43].mxu0  ;;  %1381 = vperm.xlu1 %5835, %v1228_v3   ;;  %v1230_v4 = vld [vmem:[%s6942_s20 + $0xe8] sm:$0xff] }
 0x156   : > { %v990_v14 = vpack.c.bf16 %v745_v10, %v741_v1  ;;  %1336 = vperm.xlu0 %5834, %v1219_v31  }
 0x158   : > { %5325 = vmatprep.subr.bf16.mxu1 %v990_v14 }
 0x159   : > { %5326 = vmatpush3.bf16.xpose.msra.mxu1 %v966_v58  ;;  %v1221_v58 = vld [vmem:[%s6942_s20 + $0xa0] sm:$0xff]  ;;  %1391 = vperm.xlu1 %5835, %v1230_v4  }
 0x15a   : > { %v749_v51 = vpop.f32.mrb[44].mxu0  ;;  %1346 = vperm.xlu0 %5834, %v1221_v58  }
 0x15b   : > { %v751_v22 = vpop.f32.mrb[45].mxu0 }
 0x15c   : > { %v753_v23 = vpop.f32.mrb[46].mxu0 }
 0x15d   : > { %v6984_v27 = vpack.c.bf16 %v753_v23, %v749_v51  ;;  %v755_v28 = vpop.f32.mrb[47].mxu0  ;;  %v5748_v51 = vpop.f32.mrb[2].mxu1 }
 0x15e   : > { %v993_v29 = vpack.c.bf16 %v755_v28, %v751_v22  ;;  %1356 = vperm.xlu0 %5834, %v1223_v39   ;;  %v964_v52 = vpack.c.bf16 %v5748_v51, %v5747_v20  ;;  %v835_v22 = vpop.f32.mrb[3].mxu1 }
 0x15f   : > { %v961_v23 = vpack.c.bf16 %v835_v22, %v832_v48  ;;  %v5751_v15 = vpop.f32.mrb[4].mxu1 }
 0x160   : > { %5327 = vmatprep.subr.bf16.mxu1 %v993_v29  ;;  %v848_v18 = vpop.f32.mrb[5].mxu1 }
 0x161   : > { %5328 = vmatpush3.bf16.xpose.msra.mxu1 %v969_v0  ;;  %v1225_v0 = vld [vmem:[%s6942_s20 + $0xc0] sm:$0xff] }
 0x162   : > { %v759_v57 = vpop.f32.mrb[48].mxu0  ;;  %1366 = vperm.xlu0 %5834, %v1225_v0  }
 0x163   : > { %v761_v32 = vpop.f32.mrb[49].mxu0 }
 0x164   : > { %v763_v33 = vpop.f32.mrb[50].mxu0 }
 0x165   : > { %v6993_v35 = vpack.c.bf16 %v763_v33, %v759_v57  ;;  %v765_v36 = vpop.f32.mrb[51].mxu0 }
 0x166   : > { %v996_v37 = vpack.c.bf16 %v765_v36, %v761_v32  ;;  %1376 = vperm.xlu0 %5834, %v1227_v59  }
 0x168   : > { %5329 = vmatprep.subr.bf16.mxu1 %v996_v37 }
 0x169   : > { %5330 = vmatpush3.bf16.xpose.msra.mxu1 %v972_v7  ;;  %v1229_v7 = vld [vmem:[%s6942_s20 + $0xe0] sm:$0xff] }
 0x16a   : > { %v769_v63 = vpop.f32.mrb[52].mxu0  ;;  %1386 = vperm.xlu0 %5834, %v1229_v7  }
 0x16b   : > { %v771_v40 = vpop.f32.mrb[53].mxu0 }
 0x16c   : > { %v773_v41 = vpop.f32.mrb[54].mxu0 }
 0x16d   : > { %v7002_v43 = vpack.c.bf16 %v773_v41, %v769_v63  ;;  %v775_v47 = vpop.f32.mrb[55].mxu0 }
 0x16e   : > { %v999_v53 = vpack.c.bf16 %v775_v47, %v771_v40 }
 0x170   : > { %5331 = vmatprep.subr.bf16.mxu1 %v999_v53 }
 0x171   : > { %5332 = vmatpush3.bf16.xpose.msra.mxu1 %v975_v13 }
 0x172   : > { %v779_v6 = vpop.f32.mrb[56].mxu0 }
 0x173   : > { %v781_v61 = vpop.f32.mrb[57].mxu0 }
 0x174   : > { %v783_v42 = vpop.f32.mrb[58].mxu0 }
 0x175   : > { %v7011_v45 = vpack.c.bf16 %v783_v42, %v779_v6  ;;  %v785_v46 = vpop.f32.mrb[59].mxu0 }
 0x176   : > { %v1002_v1 = vpack.c.bf16 %v785_v46, %v781_v61 }
 0x178   : > { %5333 = vmatprep.subr.bf16.mxu1 %v1002_v1 }
 0x179   : > { %5334 = vmatpush3.bf16.xpose.msra.mxu1 %v978_v19  ;;  %v5752_v19 = vpop.f32.mrb[6].mxu1 }
 0x17a   : > { %v789_v9 = vpop.f32.mrb[60].mxu0  ;;  %v970_v28 = vpack.c.bf16 %v5752_v19, %v5751_v15  ;;  %v851_v29 = vpop.f32.mrb[7].mxu1 }
 0x17b   : > { %v791_v12 = vpop.f32.mrb[61].mxu0  ;;  %v967_v30 = vpack.c.bf16 %v851_v29, %v848_v18  ;;  %v5755_v31 = vpop.f32.mrb[8].mxu1 }
 0x17c   : > { %v793_v13 = vpop.f32.mrb[62].mxu0  ;;  %v864_v54 = vpop.f32.mrb[9].mxu1 }
 0x17d   : > { %v7017_v10 = vpack.c.bf16 %v793_v13, %v789_v9  ;;  %v795_v14 = vpop.f32.mrb[63].mxu0  ;;  %v5756_v57 = vpop.f32.mrb[10].mxu1 }
 0x17e   : > { %v1005_v16 = vpack.c.bf16 %v795_v14, %v791_v12  ;;  %v976_v21 = vpack.c.bf16 %v5756_v57, %v5755_v31  ;;  %v867_v25 = vpop.f32.mrb[11].mxu1 }
 0x17f   : > { %v5759_v58 = vpop.f32.mrb[12].mxu1 }
 0x180   : > { %5335 = vmatprep.subr.bf16.mxu1 %v1005_v16  ;;  %v880_v32 = vpop.f32.mrb[13].mxu1 }
 0x181   : > { %5336 = vmatpush3.bf16.xpose.msra.mxu1 %v981_v26  ;;  %v973_v26 = vpack.c.bf16 %v867_v25, %v864_v54  ;;  %v5760_v33 = vpop.f32.mrb[14].mxu1 }
 0x182   : > { %v982_v36 = vpack.c.bf16 %v5760_v33, %v5759_v58  ;;  %v883_v37 = vpop.f32.mrb[15].mxu1 }
 0x183   : > { %v979_v38 = vpack.c.bf16 %v883_v37, %v880_v32  ;;  %v5763_v39 = vpop.f32.mrb[16].mxu1 }
 0x188   : > { %5338 = vmatmul.mubr.bf16.vlgmr.msra.gmra.mrb[32].mxu1 %v6883_v44  ;;  %v896_v44 = vpop.f32.mrb[17].mxu1 }
 0x189   : > { %5339 = vmatprep.mubr.bf16.mxu1 %v6892_v50  ;;  %v5764_v60 = vpop.f32.mrb[18].mxu1 }
 0x18a   : > { %v988_v63 = vpack.c.bf16 %v5764_v60, %v5763_v39  ;;  %v899_v0 = vpop.f32.mrb[19].mxu1 }
 0x18b   : > { %v985_v40 = vpack.c.bf16 %v899_v0, %v896_v44  ;;  %v5767_v41 = vpop.f32.mrb[20].mxu1 }
 0x18c   : > { %v912_v47 = vpop.f32.mrb[21].mxu1 }
 0x18d   : > { %5369 = vmatprep.subr.bf16.mxu0 %v985_v40  ;;  %v5768_v53 = vpop.f32.mrb[22].mxu1 }
 0x18e   : > { %5370 = vmatpush3.bf16.msra.mxu0 %v961_v23  ;;  %v994_v55 = vpack.c.bf16 %v5768_v53, %v5767_v41  ;;  %v915_v59 = vpop.f32.mrb[23].mxu1 }
 0x18f   : > { %5371 = vmatprep.subr.bf16.mxu0 %v988_v63  ;;  %v5771_v3 = vpop.f32.mrb[24].mxu1 }
 0x190   : > { %5340 = vmatmul.mubr.bf16.gmra.mrb[36].mxu1 %v6892_v50  ;;  %v991_v50 = vpack.c.bf16 %v915_v59, %v912_v47  ;;  %v928_v6 = vpop.f32.mrb[25].mxu1 }
 0x191   : > { %5341 = vmatprep.mubr.bf16.mxu1 %v6900_v56  ;;  %v5772_v7 = vpop.f32.mrb[26].mxu1 }
 0x192   : > { %5372 = vmatpush3.bf16.msra.mxu0 %v964_v52  ;;  %v1000_v61 = vpack.c.bf16 %v5772_v7, %v5771_v3  ;;  %v931_v42 = vpop.f32.mrb[27].mxu1 }
 0x193   : > { %5373 = vmatprep.subr.bf16.mxu0 %v991_v50  ;;  %v997_v46 = vpack.c.bf16 %v931_v42, %v928_v6  ;;  %v5775_v1 = vpop.f32.mrb[28].mxu1 }
 0x194   : > { %v944_v4 = vpop.f32.mrb[29].mxu1 }
 0x195   : > { %v5776_v9 = vpop.f32.mrb[30].mxu1 }
 0x196   : > { %5374 = vmatpush3.bf16.msra.mxu0 %v967_v30  ;;  %v1006_v12 = vpack.c.bf16 %v5776_v9, %v5775_v1  ;;  %v947_v13 = vpop.f32.mrb[31].mxu1 }
 0x197   : > { %5375 = vmatprep.subr.bf16.mxu0 %v994_v55 }
 0x198   : > { %5342 = vmatmul.mubr.bf16.gmra.mrb[40].mxu1 %v6900_v56  ;;  %v1003_v56 = vpack.c.bf16 %v947_v13, %v944_v4 }
 0x199   : > { %5343 = vmatprep.mubr.bf16.mxu1 %v6908_v62 }
 0x19a   : > { %5376 = vmatpush3.bf16.msra.mxu0 %v970_v28 }
 0x19b   : > { %5377 = vmatprep.subr.bf16.mxu0 %v997_v46 }
 0x19e   : > { %5378 = vmatpush3.bf16.msra.mxu0 %v973_v26 }
 0x19f   : > { %5379 = vmatprep.subr.bf16.mxu0 %v1000_v61 }
 0x1a0   : > { %5344 = vmatmul.mubr.bf16.gmra.mrb[44].mxu1 %v6908_v62  ;;  %v1234_v62 = vlaneseq }
 0x1a1   : > { %5345 = vmatprep.mubr.bf16.mxu1 %v6916_v5 }
 0x1a2   : > { %5380 = vmatpush3.bf16.msra.mxu0 %v976_v21 }
 0x1a3   : > { %5381 = vmatprep.subr.bf16.mxu0 %v1003_v56 }
 0x1a6   : > { %5382 = vmatpush3.bf16.msra.mxu0 %v979_v38 }
 0x1a7   : > { %5383 = vmatprep.subr.bf16.mxu0 %v1006_v12 }
 0x1a8   : > { %5346 = vmatmul.mubr.bf16.gmra.mrb[48].mxu1 %v6916_v5  ;;  %v1235_v5 = vshrl.u32 %v1234_v62, 7 }
 0x1a9   : > { %5347 = vmatprep.mubr.bf16.mxu1 %v6924_v11 }
 0x1aa   : > { %5384 = vmatpush3.bf16.msra.mxu0 %v982_v36 }
 0x1b0   : > { %5348 = vmatmul.mubr.bf16.gmra.mrb[52].mxu1 %v6924_v11  ;;  %v1236_v11 = vsub.s32 0, %v1235_v5 }
 0x1b1   : > { %5349 = vmatprep.mubr.bf16.mxu1 %v6932_v17 }
 0x1b8   : > { %5350 = vmatmul.mubr.bf16.gmra.mrb[56].mxu1 %v6932_v17  ;;  %v1200_v17 = vld [vmem:[%s310_s26] sm:$0x3] }
 0x1b9   : > { %5351 = vmatprep.mubr.bf16.mxu1 %v6947_v24 }
 0x1c0   : > { %5352 = vmatmul.mubr.bf16.gmra.mrb[60].mxu1 %v6947_v24  ;;  %v1240_v24 = vsub.s32 1, %v1235_v5 }
 0x1c1   : > { %5353 = vmatprep.mubr.bf16.mxu1 %v6957_v34 }
 0x1c8   : > { %5354 = vmatmul.mubr.bf16.gmra.mrb[64].mxu1 %v6957_v34  ;;  %v1247_v34 = vpop.permute.xlu0 %1246 }
 0x1c9   : > { %5355 = vmatprep.mubr.bf16.mxu1 %v6966_v49 }
 0x1d0   : > { %5356 = vmatmul.mubr.bf16.gmra.mrb[68].mxu1 %v6966_v49  ;;  %v7057_v49 = vrot.slane %v1200_v17, %v1236_v11 }
 0x1d1   : > { %5357 = vmatprep.mubr.bf16.mxu1 %v6975_v8 }
 0x1d2   : > { %vm1404_vm0 = vcmp.le.f32.partialorder %v7057_v49, %v1247_v34 }
 0x1d8   : > { %5358 = vmatmul.mubr.bf16.gmra.mrb[72].mxu1 %v6975_v8  ;;  %v7059_v8 = vrot.slane %v1200_v17, %v1240_v24 }
 0x1d9   : > { %5359 = vmatprep.mubr.bf16.mxu1 %v6984_v27 }
 0x1da   : > { %vm1405_vm1 = vcmp.le.f32.partialorder %v7059_v8, %v1247_v34 }
 0x1e0   : > { %5360 = vmatmul.mubr.bf16.gmra.mrb[76].mxu1 %v6984_v27  ;;  %v1252_v27 = vpop.permute.xlu0 %1251 }
 0x1e1   : > { %5361 = vmatprep.mubr.bf16.mxu1 %v6993_v35  ;;  %vm1406_vm2 = vcmp.le.f32.partialorder %v7057_v49, %v1252_v27  ;;  %vm1407_vm3 = vcmp.le.f32.partialorder %v7059_v8, %v1252_v27 }
 0x1e4   : > { %v1267_v21 = vpop.permute.xlu0 %1266 }
 0x1e5   : > { %vm1412_vm8 = vcmp.le.f32.partialorder %v7057_v49, %v1267_v21  ;;  %vm1413_vm9 = vcmp.le.f32.partialorder %v7059_v8, %v1267_v21 }
 0x1e8   : > { %5362 = vmatmul.mubr.bf16.gmra.mrb[80].mxu1 %v6993_v35  ;;  %v1277_v63 = vpop.permute.xlu0 %1276 }
 0x1e9   : > { %5363 = vmatprep.mubr.bf16.mxu1 %v7002_v43  ;;  %vm1416_vm12 = vcmp.le.f32.partialorder %v7057_v49, %v1277_v63  ;;  %vm1417_vm13 = vcmp.le.f32.partialorder %v7059_v8, %v1277_v63 }
 0x1ec   : > { %v1287_v42 = vpop.permute.xlu0 %1286 }
 0x1f0   : > { %5364 = vmatmul.mubr.bf16.gmra.mrb[84].mxu1 %v7002_v43  ;;  %v1257_v43 = vpop.permute.xlu1 %1256  ;;  %v1297_v24 = vpop.permute.xlu0 %1296 }
 0x1f1   : > { %5365 = vmatprep.mubr.bf16.mxu1 %v7011_v45  ;;  %vm1408_vm4 = vcmp.le.f32.partialorder %v7057_v49, %v1257_v43  ;;  %vm1409_vm5 = vcmp.le.f32.partialorder %v7059_v8, %v1257_v43 }
 0x1f4   : > { %v1262_v23 = vpop.permute.xlu1 %1261 }
 0x1f5   : > { %vm1410_vm6 = vcmp.le.f32.partialorder %v7057_v49, %v1262_v23  ;;  %vm1411_vm7 = vcmp.le.f32.partialorder %v7059_v8, %v1262_v23 }
 0x1f8   : > { %5366 = vmatmul.mubr.bf16.gmra.mrb[88].mxu1 %v7011_v45  ;;  %v1272_v26 = vpop.permute.xlu1 %1271 }
 0x1f9   : > { %5367 = vmatprep.mubr.bf16.mxu1 %v7017_v10  ;;  %vm1414_vm10 = vcmp.le.f32.partialorder %v7057_v49, %v1272_v26  ;;  %vm1415_vm11 = vcmp.le.f32.partialorder %v7059_v8, %v1272_v26 }
 0x1fc   : > { %v1282_v40 = vpop.permute.xlu1 %1281 }
 0x1fd   : > { %vm1418_vm14 = vcmp.le.f32.partialorder %v7057_v49, %v1282_v40  ;;  %vm1419_vm15 = vcmp.le.f32.partialorder %v7059_v8, %v1282_v40 }
 0x200   : > { %5368 = vmatmul.mubr.bf16.gmra.mrb[92].mxu1 %v7017_v10  ;;  %v1292_v1 = vpop.permute.xlu1 %1291 }
 0x204   : > { %v1302_v27 = vpop.permute.xlu1 %1301 }
 0x25b   : > { %v1041_v35 = vpop.f32.mrb[32].mxu1 }
 0x25c   : > { %v7064_v45 = vsel %vm1404_vm0, %v1041_v35, -1e+30  ;;  %v1043_v10 = vpop.f32.mrb[33].mxu1  ;;  %vm1420_vm0 = vcmp.le.f32.partialorder %v7057_v49, %v1287_v42 }
 0x25d   : > { %v7067_v14 = vsel %vm1405_vm1, %v1043_v10, -1e+30  ;;  %v1045_v16 = vpop.f32.mrb[34].mxu1  ;;  %vm1421_vm1 = vcmp.le.f32.partialorder %v7059_v8, %v1287_v42 }
 0x25e   : > { %v7069_v20 = vsel %vm1406_vm2, %v1045_v16, -1e+30  ;;  %v1047_v48 = vpop.f32.mrb[35].mxu1  ;;  %v1532_v51 = vmax.f32 %v7064_v45, %v7067_v14  ;;  %vm1422_vm2 = vcmp.le.f32.partialorder %v7057_v49, %v1292_v1 }
 0x25f   : > { %v7073_v52 = vsel %vm1407_vm3, %v1047_v48, -1e+30  ;;  %vm1423_vm3 = vcmp.le.f32.partialorder %v7059_v8, %v1292_v1 }
 0x260   : > { %1533 = vmax.xlane.f32.xlu0 %v1532_v51  ;;  %v1535_v22 = vmax.f32 %v7069_v20, %v7073_v52 }
 0x262   : > { %1536 = vmax.xlane.f32.xlu1 %v1535_v22 }
 0x263   : > { %v1051_v15 = vpop.f32.mrb[36].mxu1 }
 0x264   : > { %v7080_v18 = vsel %vm1408_vm4, %v1051_v15, -1e+30  ;;  %v1053_v19 = vpop.f32.mrb[37].mxu1  ;;  %vm1424_vm4 = vcmp.le.f32.partialorder %v7057_v49, %v1297_v24 }
 0x265   : > { %v7083_v28 = vsel %vm1409_vm5, %v1053_v19, -1e+30  ;;  %v1055_v29 = vpop.f32.mrb[38].mxu1  ;;  %vm1425_vm5 = vcmp.le.f32.partialorder %v7059_v8, %v1297_v24  ;;  %v1307_v19 = vpop.permute.xlu0 %1306 }
 0x266   : > { %v7085_v30 = vsel %vm1410_vm6, %v1055_v29, -1e+30  ;;  %v1057_v31 = vpop.f32.mrb[39].mxu1  ;;  %v1538_v54 = vmax.f32 %v7080_v18, %v7083_v28  ;;  %vm1426_vm6 = vcmp.le.f32.partialorder %v7057_v49, %v1302_v27 }
 0x267   : > { %v7089_v57 = vsel %vm1411_vm7, %v1057_v31, -1e+30  ;;  %vm1427_vm7 = vcmp.le.f32.partialorder %v7059_v8, %v1302_v27  ;;  %v1312_v31 = vpop.permute.xlu1 %1311 }
 0x268   : > { %1539 = vmax.xlane.f32.xlu0 %v1538_v54  ;;  %v1541_v25 = vmax.f32 %v7085_v30, %v7089_v57 }
 0x26a   : > { %1542 = vmax.xlane.f32.xlu1 %v1541_v25 }
 0x26b   : > { %v1061_v58 = vpop.f32.mrb[40].mxu1  ;;  %v1322_v27 = vpop.permute.xlu1 %1321 }
 0x26c   : > { %v7096_v32 = vsel %vm1412_vm8, %v1061_v58, -1e+30  ;;  %v1063_v33 = vpop.f32.mrb[41].mxu1  ;;  %vm1428_vm8 = vcmp.le.f32.partialorder %v7057_v49, %v1307_v19 }
 0x26d   : > { %v7099_v36 = vsel %vm1413_vm9, %v1063_v33, -1e+30  ;;  %v1065_v37 = vpop.f32.mrb[42].mxu1  ;;  %vm1429_vm9 = vcmp.le.f32.partialorder %v7059_v8, %v1307_v19 }
 0x26e   : > { %v7101_v38 = vsel %vm1414_vm10, %v1065_v37, -1e+30  ;;  %v1067_v39 = vpop.f32.mrb[43].mxu1  ;;  %v1544_v44 = vmax.f32 %v7096_v32, %v7099_v36  ;;  %vm1430_vm10 = vcmp.le.f32.partialorder %v7057_v49, %v1312_v31 }
 0x26f   : > { %v7105_v60 = vsel %vm1415_vm11, %v1067_v39, -1e+30  ;;  %vm1431_vm11 = vcmp.le.f32.partialorder %v7059_v8, %v1312_v31  ;;  %v1332_v19 = vpop.permute.xlu1 %1331 }
 0x270   : > { %1545 = vmax.xlane.f32.xlu0 %v1544_v44  ;;  %v1547_v0 = vmax.f32 %v7101_v38, %v7105_v60 }
 0x272   : > { %1548 = vmax.xlane.f32.xlu1 %v1547_v0 }
 0x273   : > { %v1071_v41 = vpop.f32.mrb[44].mxu1 }
 0x274   : > { %v7112_v47 = vsel %vm1416_vm12, %v1071_v41, -1e+30  ;;  %v1073_v53 = vpop.f32.mrb[45].mxu1 }
 0x275   : > { %v7115_v55 = vsel %vm1417_vm13, %v1073_v53, -1e+30  ;;  %v1075_v59 = vpop.f32.mrb[46].mxu1 }
 0x276   : > { %v7117_v50 = vsel %vm1418_vm14, %v1075_v59, -1e+30  ;;  %v1077_v3 = vpop.f32.mrb[47].mxu1  ;;  %v1550_v6 = vmax.f32 %v7112_v47, %v7115_v55  ;;  %vm1434_vm14 = vcmp.le.f32.partialorder %v7057_v49, %v1322_v27 }
 0x277   : > { %v7121_v7 = vsel %vm1419_vm15, %v1077_v3, -1e+30  ;;  %vm1435_vm15 = vcmp.le.f32.partialorder %v7059_v8, %v1322_v27 }
 0x278   : > { %1551 = vmax.xlane.f32.xlu0 %v1550_v6  ;;  %v1553_v61 = vmax.f32 %v7117_v50, %v7121_v7 }
 0x27a   : > { %1554 = vmax.xlane.f32.xlu1 %v1553_v61  ;;  %v1232_v61 = vld [vmem:[%s6942_s20 + $0xf8] sm:$0xff] }
 0x27b   : > { %v1081_v46 = vpop.f32.mrb[48].mxu1 }
 0x27c   : > { %v7126_v4 = vsel %vm1420_vm0, %v1081_v46, -1e+30  ;;  %v1083_v9 = vpop.f32.mrb[49].mxu1  ;;  %v1231_v46 = vld [vmem:[%s6942_s20 + $0xf0] sm:$0xff] }
 0x27d   : > { %v7129_v12 = vsel %vm1421_vm1, %v1083_v9, -1e+30  ;;  %v1085_v13 = vpop.f32.mrb[50].mxu1 }
 0x27e   : > { %v7132_v56 = vsel %vm1422_vm2, %v1085_v13, -1e+30  ;;  %v1087_v62 = vpop.f32.mrb[51].mxu1  ;;  %v1556_v5 = vmax.f32 %v7126_v4, %v7129_v12 }
 0x27f   : > { %v7137_v11 = vsel %vm1423_vm3, %v1087_v62, -1e+30 }
 0x280   : > { %1557 = vmax.xlane.f32.xlu0 %v1556_v5  ;;  %v1559_v17 = vmax.f32 %v7132_v56, %v7137_v11  ;;  %v1317_v5 = vpop.permute.xlu0 %1316 }
 0x281   : > { %vm1432_vm12 = vcmp.le.f32.partialorder %v7057_v49, %v1317_v5  ;;  %vm1433_vm13 = vcmp.le.f32.partialorder %v7059_v8, %v1317_v5 }
 0x282   : > { %1560 = vmax.xlane.f32.xlu1 %v1559_v17 }
 0x283   : > { %v1091_v34 = vpop.f32.mrb[52].mxu1 }
 0x284   : > { %v7142_v35 = vsel %vm1424_vm4, %v1091_v34, -1e+30  ;;  %v1093_v43 = vpop.f32.mrb[53].mxu1  ;;  %vm1438_vm4 = vcmp.le.f32.partialorder %v7057_v49, %v1332_v19 }
 0x285   : > { %v7145_v10 = vsel %vm1425_vm5, %v1093_v43, -1e+30  ;;  %v1095_v16 = vpop.f32.mrb[54].mxu1  ;;  %v1327_v43 = vpop.permute.xlu0 %1326  ;;  %vm1439_vm5 = vcmp.le.f32.partialorder %v7059_v8, %v1332_v19 }
 0x286   : > { %v7148_v48 = vsel %vm1426_vm6, %v1095_v16, -1e+30  ;;  %v1097_v51 = vpop.f32.mrb[55].mxu1  ;;  %v1562_v22 = vmax.f32 %v7142_v35, %v7145_v10  ;;  %vm1436_vm0 = vcmp.le.f32.partialorder %v7057_v49, %v1327_v43  ;;  %vm1437_vm1 = vcmp.le.f32.partialorder %v7059_v8, %v1327_v43 }
 0x287   : > { %v7153_v23 = vsel %vm1427_vm7, %v1097_v51, -1e+30 }
 0x288   : > { %1563 = vmax.xlane.f32.xlu0 %v1562_v22  ;;  %v1565_v15 = vmax.f32 %v7148_v48, %v7153_v23 }
 0x28a   : > { %1566 = vmax.xlane.f32.xlu1 %v1565_v15 }
 0x28b   : > { %v1101_v29 = vpop.f32.mrb[56].mxu1 }
 0x28c   : > { %v7158_v54 = vsel %vm1428_vm8, %v1101_v29, -1e+30  ;;  %v1103_v21 = vpop.f32.mrb[57].mxu1  ;;  %v1337_v29 = vpop.permute.xlu0 %1336 }
 0x28d   : > { %8617 = vst [vmem:[#allocation2_spill] sm:$0xff] %v7158_v54  ;;  %v7161_v25 = vsel %vm1429_vm9, %v1103_v21, -1e+30  ;;  %v1105_v26 = vpop.f32.mrb[58].mxu1  ;;  %vm1440_vm2 = vcmp.le.f32.partialorder %v7057_v49, %v1337_v29  ;;  %vm1441_vm3 = vcmp.le.f32.partialorder %v7059_v8, %v1337_v29 }
 0x28e   : > { %8618 = vst [vmem:[#allocation3_spill] sm:$0xff] %v7161_v25  ;;  %v7164_v58 = vsel %vm1430_vm10, %v1105_v26, -1e+30  ;;  %v1107_v33 = vpop.f32.mrb[59].mxu1  ;;  %v1568_v37 = vmax.f32 %v7158_v54, %v7161_v25  ;;  %v1342_v26 = vpop.permute.xlu1 %1341 }
 0x28f   : > { %8619 = vst [vmem:[#allocation4_spill] sm:$0xff] %v7164_v58  ;;  %v7169_v39 = vsel %vm1431_vm11, %v1107_v33, -1e+30  ;;  %vm1442_vm8 = vcmp.le.f32.partialorder %v7057_v49, %v1342_v26  ;;  %vm1443_vm9 = vcmp.le.f32.partialorder %v7059_v8, %v1342_v26 }
 0x290   : > { %8620 = vst [vmem:[#allocation5_spill] sm:$0xff] %v7169_v39  ;;  %1569 = vmax.xlane.f32.xlu0 %v1568_v37  ;;  %v1571_v44 = vmax.f32 %v7164_v58, %v7169_v39  ;;  %v1347_v37 = vpop.permute.xlu0 %1346 }
 0x291   : > { %vm1444_vm6 = vcmp.le.f32.partialorder %v7057_v49, %v1347_v37  ;;  %vm1445_vm7 = vcmp.le.f32.partialorder %v7059_v8, %v1347_v37 }
 0x292   : > { %1572 = vmax.xlane.f32.xlu1 %v1571_v44  ;;  %v1352_v58 = vpop.permute.xlu1 %1351 }
 0x293   : > { %v1111_v63 = vpop.f32.mrb[60].mxu1 }
 0x294   : > { %v1113_v0 = vpop.f32.mrb[61].mxu1 }
 0x295   : > { %v1115_v40 = vpop.f32.mrb[62].mxu1 }
 0x296   : > { %v1117_v41 = vpop.f32.mrb[63].mxu1  ;;  %v7207_v2 = vsel %vm1434_vm14, %v1115_v40, -1e+30 }
 0x297   : > { %v7209_v39 = vsel %vm1435_vm15, %v1117_v41, -1e+30 }
 0x298   : > { %8623 = vst [vmem:[#allocation8_spill] sm:$0xff] %v7209_v39  ;;  %v1577_v41 = vmax.f32 %v7207_v2, %v7209_v39 }
 0x29b   : > { %v1121_v53 = vpop.f32.mrb[64].mxu1 }
 0x29c   : > { %v1123_v59 = vpop.f32.mrb[65].mxu1  ;;  %v7217_v5 = vsel %vm1436_vm0, %v1121_v53, -1e+30 }
 0x29d   : > { %v1125_v3 = vpop.f32.mrb[66].mxu1  ;;  %v7219_v54 = vsel %vm1437_vm1, %v1123_v59, -1e+30 }
 0x29e   : > { %v1127_v6 = vpop.f32.mrb[67].mxu1  ;;  %v1580_v59 = vmax.f32 %v7217_v5, %v7219_v54  ;;  %v7239_v29 = vsel %vm1438_vm4, %v1125_v3, -1e+30 }
 0x2a3   : > { %1401 = vperm.xlu1 %5835, %v1232_v61   ;;  %v1131_v42 = vpop.f32.mrb[68].mxu1  ;;  %v7201_v61 = vsel %vm1432_vm12, %v1111_v63, -1e+30  ;;  %vm1446_vm12 = vcmp.le.f32.partialorder %v7057_v49, %v1352_v58 }
 0x2a4   : > { %v1133_v1 = vpop.f32.mrb[69].mxu1  ;;  %8621 = vst [vmem:[#allocation6_spill] sm:$0xff] %v7201_v61  ;;  %v7229_v43 = vsel %vm1440_vm2, %v1131_v42, -1e+30 }
 0x2a5   : > { %v7175_v9 = vpop.f32.mrb[70].mxu1 }
 0x2a6   : > { %1396 = vperm.xlu0 %5834, %v1231_v46   ;;  %v7177_v13 = vpop.f32.mrb[71].mxu1  ;;  %v7203_v46 = vsel %vm1433_vm13, %v1113_v0, -1e+30  ;;  %v1357_v0 = vpop.permute.xlu0 %1356  ;;  %v7256_v37 = vsel %vm1442_vm8, %v7175_v9, -1e+30  ;;  %vm1447_vm13 = vcmp.le.f32.partialorder %v7059_v8, %v1352_v58 }
 0x2a7   : > { %8622 = vst [vmem:[#allocation7_spill] sm:$0xff] %v7203_v46  ;;  %v1574_v63 = vmax.f32 %v7201_v61, %v7203_v46  ;;  %v7231_v46 = vsel %vm1441_vm3, %v1133_v1, -1e+30  ;;  %v1362_v61 = vpop.permute.xlu1 %1361  ;;  %vm1448_vm10 = vcmp.le.f32.partialorder %v7057_v49, %v1357_v0  ;;  %vm1449_vm11 = vcmp.le.f32.partialorder %v7059_v8, %v1357_v0 }
 0x2a8   : > { %v1586_v42 = vmax.f32 %v7229_v43, %v7231_v46  ;;  %vm1450_vm0 = vcmp.le.f32.partialorder %v7057_v49, %v1362_v61  ;;  %vm1451_vm1 = vcmp.le.f32.partialorder %v7059_v8, %v1362_v61 }
 0x2aa   : > { %v1367_v1 = vpop.permute.xlu0 %1366 }
 0x2ab   : > { %v1141_v62 = vpop.f32.mrb[72].mxu1  ;;  %vm1452_vm14 = vcmp.le.f32.partialorder %v7057_v49, %v1367_v1  ;;  %vm1453_vm15 = vcmp.le.f32.partialorder %v7059_v8, %v1367_v1 }
 0x2ac   : > { %v1143_v17 = vpop.f32.mrb[73].mxu1  ;;  %v7247_v39 = vsel %vm1444_vm6, %v1141_v62, -1e+30 }
 0x2ad   : > { %v7179_v24 = vpop.f32.mrb[74].mxu1  ;;  %v7249_v19 = vsel %vm1445_vm7, %v1143_v17, -1e+30 }
 0x2ae   : > { %v7181_v34 = vpop.f32.mrb[75].mxu1  ;;  %v1592_v17 = vmax.f32 %v7247_v39, %v7249_v19  ;;  %v1377_v0 = vpop.permute.xlu0 %1376 }
 0x2af   : > { %vm1456_vm2 = vcmp.le.f32.partialorder %v7057_v49, %v1377_v0  ;;  %vm1457_vm3 = vcmp.le.f32.partialorder %v7059_v8, %v1377_v0 }
 0x2b3   : > { %v7183_v16 = vpop.f32.mrb[76].mxu1 }
 0x2b4   : > { %v7185_v51 = vpop.f32.mrb[77].mxu1  ;;  %v7266_v26 = vsel %vm1448_vm10, %v7183_v16, -1e+30  ;;  %v7279_v16 = vsel %vm1447_vm13, %v7181_v34, -1e+30 }
 0x2b5   : > { %v7187_v22 = vpop.f32.mrb[78].mxu1  ;;  %8626 = vst [vmem:[#allocation11_spill] sm:$0xff] %v7279_v16 }
 0x2b6   : > { %v7189_v15 = vpop.f32.mrb[79].mxu1  ;;  %v7298_v1 = vsel %vm1450_vm0, %v7187_v22, -1e+30 }
 0x2bb   : > { %v7191_v31 = vpop.f32.mrb[80].mxu1 }
 0x2bc   : > { %v7193_v21 = vpop.f32.mrb[81].mxu1  ;;  %v7286_v58 = vsel %vm1452_vm14, %v7191_v31, -1e+30 }
 0x2bd   : > { %v7195_v33 = vpop.f32.mrb[82].mxu1 }
 0x2be   : > { %v7197_v44 = vpop.f32.mrb[83].mxu1 }
 0x2c3   : > { %v7213_v25 = vpop.f32.mrb[84].mxu1 }
 0x2c4   : > { %v7221_v27 = vpop.f32.mrb[85].mxu1  ;;  %v7312_v22 = vsel %vm1456_vm2, %v7213_v25, -1e+30 }
 0x2c5   : > { %1575 = vmax.xlane.f32.xlu0 %v1574_v63  ;;  %v7225_v40 = vpop.f32.mrb[86].mxu1  ;;  %v7241_v63 = vsel %vm1439_vm5, %v1127_v6, -1e+30 }
 0x2c6   : > { %v7233_v53 = vpop.f32.mrb[87].mxu1  ;;  %8624 = vst [vmem:[#allocation9_spill] sm:$0xff] %v7241_v63  ;;  %v1583_v6 = vmax.f32 %v7239_v29, %v7241_v63  ;;  %v1372_v63 = vpop.permute.xlu1 %1371 }
 0x2c7   : > { %1578 = vmax.xlane.f32.xlu1 %v1577_v41  ;;  %v7259_v41 = vsel %vm1443_vm9, %v7177_v13, -1e+30  ;;  %vm1454_vm4 = vcmp.le.f32.partialorder %v7057_v49, %v1372_v63  ;;  %vm1455_vm5 = vcmp.le.f32.partialorder %v7059_v8, %v1372_v63 }
 0x2c8   : > { %v1589_v13 = vmax.f32 %v7256_v37, %v7259_v41 }
 0x2c9   : > { %1581 = vmax.xlane.f32.xlu0 %v1580_v59 }
 0x2cb   : > { %1587 = vmax.xlane.f32.xlu1 %v1586_v42  ;;  %v1181_v3 = vpop.f32.mrb[88].mxu1  ;;  %v7269_v42 = vsel %vm1449_vm11, %v7185_v51, -1e+30 }
 0x2cc   : > { %v1183_v59 = vpop.f32.mrb[89].mxu1  ;;  %v1598_v51 = vmax.f32 %v7266_v26, %v7269_v42 }
 0x2cd   : > { %1584 = vmax.xlane.f32.xlu0 %v1583_v6  ;;  %v1185_v62 = vpop.f32.mrb[90].mxu1  ;;  %v7276_v6 = vsel %vm1446_vm12, %v7179_v24, -1e+30 }
 0x2ce   : > { %v1187_v9 = vpop.f32.mrb[91].mxu1  ;;  %8625 = vst [vmem:[#allocation10_spill] sm:$0xff] %v7276_v6  ;;  %v1595_v34 = vmax.f32 %v7276_v6, %v7279_v16  ;;  %v1387_v16 = vpop.permute.xlu0 %1386 }
 0x2cf   : > { %1593 = vmax.xlane.f32.xlu1 %v1592_v17  ;;  %v7289_v17 = vsel %vm1453_vm15, %v7193_v21, -1e+30  ;;  %v1382_v21 = vpop.permute.xlu1 %1381  ;;  %vm1460_vm6 = vcmp.le.f32.partialorder %v7057_v49, %v1387_v16  ;;  %vm1461_vm7 = vcmp.le.f32.partialorder %v7059_v8, %v1387_v16 }
 0x2d0   : > { %8627 = vst [vmem:[#allocation12_spill] sm:$0xff] %v7289_v17  ;;  %v7335_v63 = vsel %vm1461_vm7, %v1183_v59, -1e+30  ;;  %vm1458_vm8 = vcmp.le.f32.partialorder %v7057_v49, %v1382_v21  ;;  %vm1459_vm9 = vcmp.le.f32.partialorder %v7059_v8, %v1382_v21 }
 0x2d1   : > { %1590 = vmax.xlane.f32.xlu0 %v1589_v13  ;;  %v7301_v13 = vsel %vm1451_vm1, %v7189_v15, -1e+30  ;;  %v7315_v15 = vsel %vm1457_vm3, %v7221_v27, -1e+30  ;;  %v7333_v27 = vsel %vm1460_vm6, %v1181_v3, -1e+30 }
 0x2d2   : > { %v1601_v0 = vmax.f32 %v7298_v1, %v7301_v13  ;;  %v1610_v25 = vmax.f32 %v7312_v22, %v7315_v15  ;;  %8628 = vst [vmem:[#allocation13_spill] sm:$0xff] %v7335_v63  ;;  %v7345_v16 = vsel %vm1459_vm9, %v7233_v53, -1e+30  ;;  %v1616_v3 = vmax.f32 %v7333_v27, %v7335_v63 }
 0x2d3   : > { %1599 = vmax.xlane.f32.xlu1 %v1598_v51  ;;  %v7293_v24 = vpop.f32.mrb[92].mxu1  ;;  %v1604_v51 = vmax.f32 %v7286_v58, %v7289_v17  ;;  %v7327_v17 = vsel %vm1455_vm5, %v7197_v44, -1e+30  ;;  %v1392_v44 = vpop.permute.xlu1 %1391  ;;  %8630 = vst [vmem:[#allocation15_spill] sm:$0xff] %v7345_v16 }
 0x2d4   : > { %v7303_v31 = vpop.f32.mrb[93].mxu1  ;;  %vm1462_vm10 = vcmp.le.f32.partialorder %v7057_v49, %v1392_v44  ;;  %vm1463_vm11 = vcmp.le.f32.partialorder %v7059_v8, %v1392_v44 }
 0x2d5   : > { %1596 = vmax.xlane.f32.xlu0 %v1595_v34  ;;  %v7307_v61 = vpop.f32.mrb[94].mxu1  ;;  %v7324_v34 = vsel %vm1454_vm4, %v7195_v33, -1e+30  ;;  %v7353_v21 = vsel %vm1462_vm10, %v1185_v62, -1e+30 }
 0x2d6   : > { %v7317_v6 = vpop.f32.mrb[95].mxu1  ;;  %v1607_v33 = vmax.f32 %v7324_v34, %v7327_v17 }
 0x2d7   : > { %1605 = vmax.xlane.f32.xlu1 %v1604_v51  ;;  %v7342_v51 = vsel %vm1458_vm8, %v7225_v40, -1e+30 }
 0x2d8   : > { %8629 = vst [vmem:[#allocation14_spill] sm:$0xff] %v7342_v51  ;;  %v1613_v59 = vmax.f32 %v7342_v51, %v7345_v16 }
 0x2d9   : > { %1602 = vmax.xlane.f32.xlu0 %v1601_v0  ;;  %v7355_v0 = vsel %vm1463_vm11, %v1187_v9, -1e+30 }
 0x2da   : > { %8631 = vst [vmem:[#allocation16_spill] sm:$0xff] %v7355_v0  ;;  %v1619_v40 = vmax.f32 %v7353_v21, %v7355_v0 }
 0x2db   : > { %1611 = vmax.xlane.f32.xlu1 %v1610_v25 }
 0x2dd   : > { %1608 = vmax.xlane.f32.xlu0 %v1607_v33 }
 0x2df   : > { %1617 = vmax.xlane.f32.xlu1 %v1616_v3 }
 0x2e1   : > { %1614 = vmax.xlane.f32.xlu0 %v1613_v59 }
 0x2e5   : > { %1620 = vmax.xlane.f32.xlu0 %v1619_v40 }
 0x2ed   : > { %v1534_v53 = vpop.xlane.xlu0 %1533 }
 0x2ee   : > { %v1628_v25 = vsub.f32 %v7064_v45, %v1534_v53  ;;  %v1629_v33 = vsub.f32 %v7067_v14, %v1534_v53 }
 0x2ef   : > { %v1537_v63 = vpop.xlane.xlu1 %1536 }
 0x2f0   : > { %v1692_v44 = vmul.f32 1.442695, %v1628_v25  ;;  %v1630_v3 = vsub.f32 %v7069_v20, %v1537_v63  ;;  %v1631_v16 = vsub.f32 %v7073_v52, %v1537_v63  ;;  %v1694_v62 = vmul.f32 1.442695, %v1629_v33 }
 0x2f2   : > { %v1696_v51 = vmul.f32 1.442695, %v1630_v3  ;;  %v1698_v9 = vmul.f32 1.442695, %v1631_v16  ;;  %5988 = vpow2.f32 %v1692_v44 }
 0x2f4   : > { %5990 = vpow2.f32 %v1696_v51 }
 0x2f5   : > { %5992 = vpow2.f32 %v1698_v9  ;;  %v1540_v59 = vpop.xlane.xlu0 %1539 }
 0x2f6   : > { %5994 = vpow2.f32 %v1694_v62  ;;  %v1632_v40 = vsub.f32 %v7080_v18, %v1540_v59  ;;  %v1633_v45 = vsub.f32 %v7083_v28, %v1540_v59 }
 0x2f7   : > { %v1543_v0 = vpop.xlane.xlu1 %1542 }
 0x2f8   : > { %v1700_v14 = vmul.f32 1.442695, %v1632_v40  ;;  %v1634_v53 = vsub.f32 %v7085_v30, %v1543_v0  ;;  %v1635_v20 = vsub.f32 %v7089_v57, %v1543_v0  ;;  %v1702_v25 = vmul.f32 1.442695, %v1633_v45 }
 0x2fa   : > { %v1704_v52 = vmul.f32 1.442695, %v1634_v53  ;;  %v1706_v63 = vmul.f32 1.442695, %v1635_v20  ;;  %5996 = vpow2.f32 %v1700_v14 }
 0x2fc   : > { %5998 = vpow2.f32 %v1704_v52  ;;  %v7367_v16 = vpop.eup %5988 }
 0x2fd   : > { %6000 = vpow2.f32 %v1706_v63  ;;  %v1546_v51 = vpop.xlane.xlu0 %1545 }
 0x2fe   : > { %v7369_v33 = vpop.eup %5990  ;;  %6002 = vpow2.f32 %v1702_v25  ;;  %v1636_v18 = vsub.f32 %v7096_v32, %v1546_v51  ;;  %v1637_v28 = vsub.f32 %v7099_v36, %v1546_v51 }
 0x2ff   : > { %v7373_v44 = vpop.eup %5992  ;;  %v1549_v30 = vpop.xlane.xlu1 %1548  ;;  %v1916_v9 = vpack.c.bf16 %v7369_v33, %v7367_v16 }
 0x300   : > { %v7375_v57 = vpop.eup %5994  ;;  %v1708_v0 = vmul.f32 1.442695, %v1636_v18  ;;  %v1638_v3 = vsub.f32 %v7101_v38, %v1549_v30  ;;  %v1639_v62 = vsub.f32 %v7105_v60, %v1549_v30  ;;  %v1710_v40 = vmul.f32 1.442695, %v1637_v28 }
 0x301   : > { %v1917_v59 = vpack.c.bf16 %v7373_v44, %v7375_v57 }
 0x302   : > { %v1712_v32 = vmul.f32 1.442695, %v1638_v3  ;;  %v1714_v45 = vmul.f32 1.442695, %v1639_v62  ;;  %6004 = vpow2.f32 %v1708_v0 }
 0x303   : > { %1980 = vmatprep.mubr.bf16.mxu0 %v1917_v59 }
 0x304   : > { %6006 = vpow2.f32 %v1712_v32  ;;  %1981 = vmatmul.mubr.bf16.vlgmr.msra.gmra.mrb[64].mxu0 %v1916_v9  ;;  %v7383_v36 = vpop.eup %5996 }
 0x305   : > { %6008 = vpow2.f32 %v1714_v45  ;;  %v1552_v14 = vpop.xlane.xlu0 %1551 }
 0x306   : > { %v7385_v38 = vpop.eup %5998  ;;  %6010 = vpow2.f32 %v1710_v40  ;;  %v1640_v60 = vsub.f32 %v7112_v47, %v1552_v14  ;;  %v1641_v53 = vsub.f32 %v7115_v55, %v1552_v14 }
 0x307   : > { %v7389_v20 = vpop.eup %6000  ;;  %v1555_v25 = vpop.xlane.xlu1 %1554  ;;  %v1918_v28 = vpack.c.bf16 %v7385_v38, %v7383_v36 }
 0x308   : > { %v7391_v52 = vpop.eup %6002  ;;  %v1716_v63 = vmul.f32 1.442695, %v1640_v60  ;;  %v1642_v51 = vsub.f32 %v7117_v50, %v1555_v25  ;;  %v1643_v18 = vsub.f32 %v7121_v7, %v1555_v25  ;;  %v1718_v0 = vmul.f32 1.442695, %v1641_v53 }
 0x309   : > { %v1919_v30 = vpack.c.bf16 %v7389_v20, %v7391_v52 }
 0x30a   : > { %v1720_v47 = vmul.f32 1.442695, %v1642_v51  ;;  %v1722_v3 = vmul.f32 1.442695, %v1643_v18  ;;  %6012 = vpow2.f32 %v1716_v63 }
 0x30b   : > { %1988 = vmatprep.mubr.bf16.mxu0 %v1919_v30 }
 0x30c   : > { %6014 = vpow2.f32 %v1720_v47  ;;  %1989 = vmatmul.mubr.bf16.gmra.mrb[68].mxu0 %v1918_v28  ;;  %v7399_v55 = vpop.eup %6004 }
 0x30d   : > { %6016 = vpow2.f32 %v1722_v3  ;;  %v1558_v62 = vpop.xlane.xlu0 %1557 }
 0x30e   : > { %v7401_v50 = vpop.eup %6006  ;;  %6018 = vpow2.f32 %v1718_v0  ;;  %v1644_v7 = vsub.f32 %v7126_v4, %v1558_v62  ;;  %v1645_v9 = vsub.f32 %v7129_v12, %v1558_v62 }
 0x30f   : > { %v7405_v59 = vpop.eup %6008  ;;  %v1561_v40 = vpop.xlane.xlu1 %1560  ;;  %v1920_v53 = vpack.c.bf16 %v7401_v50, %v7399_v55 }
 0x310   : > { %v7407_v32 = vpop.eup %6010  ;;  %v1724_v45 = vmul.f32 1.442695, %v1644_v7  ;;  %v1646_v14 = vsub.f32 %v7132_v56, %v1561_v40  ;;  %v1647_v60 = vsub.f32 %v7137_v11, %v1561_v40  ;;  %v1726_v63 = vmul.f32 1.442695, %v1645_v9 }
 0x311   : > { %v1921_v25 = vpack.c.bf16 %v7405_v59, %v7407_v32 }
 0x312   : > { %v1728_v4 = vmul.f32 1.442695, %v1646_v14  ;;  %v1730_v51 = vmul.f32 1.442695, %v1647_v60  ;;  %6020 = vpow2.f32 %v1724_v45 }
 0x313   : > { %1996 = vmatprep.mubr.bf16.mxu0 %v1921_v25  ;;  %v8632_v25 = vld [vmem:[#allocation2_spill] sm:$0xff] }
 0x314   : > { %6022 = vpow2.f32 %v1728_v4  ;;  %1997 = vmatmul.mubr.bf16.gmra.mrb[72].mxu0 %v1920_v53  ;;  %v7415_v12 = vpop.eup %6012 }
 0x315   : > { %6024 = vpow2.f32 %v1730_v51  ;;  %v1564_v18 = vpop.xlane.xlu0 %1563 }
 0x316   : > { %v7417_v56 = vpop.eup %6014  ;;  %6026 = vpow2.f32 %v1726_v63  ;;  %v1648_v11 = vsub.f32 %v7142_v35, %v1564_v18  ;;  %v1649_v28 = vsub.f32 %v7145_v10, %v1564_v18  ;;  %v8633_v63 = vld [vmem:[#allocation3_spill] sm:$0xff] }
 0x317   : > { %v7421_v30 = vpop.eup %6016  ;;  %v1567_v0 = vpop.xlane.xlu1 %1566  ;;  %v1922_v47 = vpack.c.bf16 %v7417_v56, %v7415_v12 }
 0x318   : > { %v7425_v3 = vpop.eup %6018  ;;  %v1732_v62 = vmul.f32 1.442695, %v1648_v11  ;;  %v1734_v7 = vmul.f32 1.442695, %v1649_v28  ;;  %v1650_v9 = vsub.f32 %v7148_v48, %v1567_v0  ;;  %v1651_v40 = vsub.f32 %v7153_v23, %v1567_v0 }
 0x319   : > { %v1923_v45 = vpack.c.bf16 %v7421_v30, %v7425_v3 }
 0x31a   : > { %6028 = vpow2.f32 %v1732_v62  ;;  %v1736_v35 = vmul.f32 1.442695, %v1650_v9  ;;  %v1738_v10 = vmul.f32 1.442695, %v1651_v40 }
 0x31b   : > { %6030 = vpow2.f32 %v1734_v7  ;;  %2004 = vmatprep.mubr.bf16.mxu0 %v1923_v45  ;;  %v8635_v7 = vld [vmem:[#allocation5_spill] sm:$0xff] }
 0x31c   : > { %6032 = vpow2.f32 %v1736_v35  ;;  %2005 = vmatmul.mubr.bf16.gmra.mrb[76].mxu0 %v1922_v47  ;;  %v7431_v14 = vpop.eup %6020  ;;  %v8634_v47 = vld [vmem:[#allocation4_spill] sm:$0xff] }
 0x31d   : > { %6034 = vpow2.f32 %v1738_v10  ;;  %v1570_v60 = vpop.xlane.xlu0 %1569 }
 0x31e   : > { %v7433_v53 = vpop.eup %6022  ;;  %v1652_v48 = vsub.f32 %v8632_v25, %v1570_v60  ;;  %v1653_v23 = vsub.f32 %v8633_v63, %v1570_v60 }
 0x31f   : > { %v7437_v4 = vpop.eup %6024  ;;  %v1573_v51 = vpop.xlane.xlu1 %1572  ;;  %v1924_v18 = vpack.c.bf16 %v7433_v53, %v7431_v14 }
 0x320   : > { %v7441_v11 = vpop.eup %6026  ;;  %v1740_v28 = vmul.f32 1.442695, %v1652_v48  ;;  %v1742_v0 = vmul.f32 1.442695, %v1653_v23  ;;  %v1654_v62 = vsub.f32 %v8634_v47, %v1573_v51  ;;  %v1655_v9 = vsub.f32 %v8635_v7, %v1573_v51 }
 0x321   : > { %v1925_v40 = vpack.c.bf16 %v7437_v4, %v7441_v11 }
 0x322   : > { %6036 = vpow2.f32 %v1740_v28  ;;  %v1744_v45 = vmul.f32 1.442695, %v1654_v62  ;;  %v1746_v35 = vmul.f32 1.442695, %v1655_v9  ;;  %v1829_v9 = vadd.f32 %v7389_v20, %v7385_v38  ;;  %v5884_v38 = vld [vmem:[%s8552_s4] sm:$0xff]  }
 0x323   : > { %6038 = vpow2.f32 %v1742_v0  ;;  %2012 = vmatprep.mubr.bf16.mxu0 %v1925_v40  ;;  %v1402_v10 = vpop.permute.xlu1 %1401  ;;  %v1844_v20 = vadd.f32 %v7441_v11, %v7431_v14  ;;  %5777 = vmatprep.subr.bf16.mxu1 %v5884_v38 }
 0x324   : > { %v6029_v60 = vpop.eup %6028  ;;  %6040 = vpow2.f32 %v1744_v45  ;;  %2013 = vmatmul.mubr.bf16.gmra.mrb[80].mxu0 %v1924_v18  ;;  %vm1466_vm12 = vcmp.le.f32.partialorder %v7057_v49, %v1402_v10  ;;  %vm1467_vm13 = vcmp.le.f32.partialorder %v7059_v8, %v1402_v10  ;;  %v1826_v10 = vadd.f32 %v7391_v52, %v7383_v36  ;;  %5778 = vmatpush3.bf16.msra.mxu1 %v5884_v38 }
 0x325   : > { %v6031_v25 = vpop.eup %6030  ;;  %6042 = vpow2.f32 %v1746_v35  ;;  %v1397_v48 = vpop.permute.xlu0 %1396  ;;  %v7450_v63 = vsel %vm1466_vm12, %v7307_v61, -1e+30  ;;  %v7453_v23 = vsel %vm1467_vm13, %v7317_v6, -1e+30  ;;  %v1847_v36 = vadd.f32 %v7437_v4, %v7433_v53  ;;  %v8637_v53 = vld [vmem:[#allocation7_spill] sm:$0xff] }
 0x326   : > { %v6033_v51 = vpop.eup %6032  ;;  %vm1464_vm14 = vcmp.le.f32.partialorder %v7057_v49, %v1397_v48  ;;  %vm1465_vm15 = vcmp.le.f32.partialorder %v7059_v8, %v1397_v48  ;;  %v1625_v18 = vmax.f32 %v7450_v63, %v7453_v23  ;;  %v1823_v49 = vadd.f32 %v7373_v44, %v7369_v33 }
 0x327   : > { %v6035_v28 = vpop.eup %6034  ;;  %v7460_v0 = vsel %vm1464_vm14, %v7293_v24, -1e+30  ;;  %v7463_v47 = vsel %vm1465_vm15, %v7303_v31, -1e+30  ;;  %v1926_v62 = vpack.c.bf16 %v6033_v51, %v6029_v60  ;;  %v1820_v24 = vadd.f32 %v7375_v57, %v7367_v16 }
 0x328   : > { %1626 = vmax.xlane.f32.xlu0 %v1625_v18  ;;  %v1927_v61 = vpack.c.bf16 %v6035_v28, %v6031_v25  ;;  %v1622_v6 = vmax.f32 %v7460_v0, %v7463_v47  ;;  %v1835_v33 = vadd.f32 %v7405_v59, %v7401_v50  ;;  %v1832_v16 = vadd.f32 %v7407_v32, %v7399_v55  ;;  %v5885_v32 = vld [vmem:[%s8552_s4 + $0x8] sm:$0xff]  }
 0x329   : > { %v1841_v44 = vadd.f32 %v7421_v30, %v7417_v56  ;;  %v1838_v57 = vadd.f32 %v7425_v3, %v7415_v12  ;;  %v1853_v52 = vadd.f32 %v6035_v28, %v6033_v51  ;;  %v1850_v55 = vadd.f32 %v6031_v25, %v6029_v60  ;;  %5779 = vmatprep.subr.bf16.mxu1 %v5885_v32  ;;  %v5886_v12 = vld [vmem:[%s8552_s4 + $0x10] sm:$0xff]   ;;  %v5887_v30 = vld [vmem:[%s8552_s4 + $0x18] sm:$0xff]   ;;  %v8636_v3 = vld [vmem:[#allocation6_spill] sm:$0xff] }
 0x32a   : > { %2020 = vmatprep.mubr.bf16.mxu0 %v1927_v61  ;;  %1623 = vmax.xlane.f32.xlu1 %v1622_v6  ;;  %v8638_v51 = vld [vmem:[#allocation8_spill] sm:$0xff] }
 0x32b   : > { %5780 = vmatpush3.bf16.msra.mxu1 %v5885_v32  ;;  %v5890_v32 = vld [vmem:[%s8552_s4 + $0x30] sm:$0xff]  }
 0x32c   : > { %v6037_v8 = vpop.eup %6036  ;;  %2021 = vmatmul.mubr.bf16.gmra.mrb[84].mxu0 %v1926_v62  ;;  %1824 = vadd.xlane.f32.xlu0 %v1823_v49 }
 0x32d   : > { %v6039_v7 = vpop.eup %6038  ;;  %5781 = vmatprep.subr.bf16.mxu1 %v5886_v12 }
 0x32e   : > { %v6041_v31 = vpop.eup %6040  ;;  %1821 = vadd.xlane.f32.xlu1 %v1820_v24  ;;  %v1856_v59 = vadd.f32 %v6039_v7, %v6037_v8 }
 0x32f   : > { %v6043_v40 = vpop.eup %6042  ;;  %v1928_v35 = vpack.c.bf16 %v6041_v31, %v6037_v8  ;;  %5782 = vmatpush3.bf16.msra.mxu1 %v5886_v12 }
 0x330   : > { %1830 = vadd.xlane.f32.xlu0 %v1829_v9  ;;  %v1929_v45 = vpack.c.bf16 %v6043_v40, %v6039_v7  ;;  %v1859_v50 = vadd.f32 %v6043_v40, %v6041_v31  ;;  %5783 = vmatprep.subr.bf16.mxu1 %v5887_v30 }
 0x332   : > { %2028 = vmatprep.mubr.bf16.mxu0 %v1929_v45  ;;  %1827 = vadd.xlane.f32.xlu1 %v1826_v10 }
 0x333   : > { %5784 = vmatpush3.bf16.msra.mxu1 %v5887_v30 }
 0x334   : > { %2029 = vmatmul.mubr.bf16.gmra.mrb[88].mxu0 %v1928_v35  ;;  %1836 = vadd.xlane.f32.xlu0 %v1835_v33 }
 0x336   : > { %1833 = vadd.xlane.f32.xlu1 %v1832_v16 }
 0x338   : > { %1842 = vadd.xlane.f32.xlu0 %v1841_v44  ;;  %v5889_v44 = vld [vmem:[%s8552_s4 + $0x28] sm:$0xff]  }
 0x33a   : > { %1839 = vadd.xlane.f32.xlu1 %v1838_v57 }
 0x33c   : > { %1848 = vadd.xlane.f32.xlu0 %v1847_v36 }
 0x33e   : > { %1845 = vadd.xlane.f32.xlu1 %v1844_v20 }
 0x340   : > { %1854 = vadd.xlane.f32.xlu0 %v1853_v52 }
 0x342   : > { %1851 = vadd.xlane.f32.xlu1 %v1850_v55 }
 0x344   : > { %1860 = vadd.xlane.f32.xlu0 %v1859_v50 }
 0x346   : > { %1857 = vadd.xlane.f32.xlu1 %v1856_v59 }
 0x352   : > { %v1576_v56 = vpop.xlane.xlu0 %1575 }
 0x353   : > { %v1656_v14 = vsub.f32 %v8636_v3, %v1576_v56  ;;  %v1657_v4 = vsub.f32 %v8637_v53, %v1576_v56 }
 0x354   : > { %v1579_v11 = vpop.xlane.xlu1 %1578 }
 0x355   : > { %v1748_v60 = vmul.f32 1.442695, %v1656_v14  ;;  %v1750_v25 = vmul.f32 1.442695, %v1657_v4  ;;  %v1658_v48 = vsub.f32 %v7207_v2, %v1579_v11  ;;  %v1659_v18 = vsub.f32 %v8638_v51, %v1579_v11  ;;  %v5888_v2 = vld [vmem:[%s8552_s4 + $0x20] sm:$0xff]  }
 0x356   : > { %v1582_v28 = vpop.xlane.xlu0 %1581  ;;  %5785 = vmatprep.subr.bf16.mxu1 %v5888_v2  ;;  %v8640_v14 = vld [vmem:[#allocation10_spill] sm:$0xff] }
 0x357   : > { %6044 = vpow2.f32 %v1748_v60  ;;  %v1752_v61 = vmul.f32 1.442695, %v1658_v48  ;;  %v1754_v62 = vmul.f32 1.442695, %v1659_v18  ;;  %v1660_v6 = vsub.f32 %v7217_v5, %v1582_v28  ;;  %5786 = vmatpush3.bf16.msra.mxu1 %v5888_v2 }
 0x358   : > { %6046 = vpow2.f32 %v1750_v25  ;;  %v1661_v49 = vsub.f32 %v7219_v54, %v1582_v28  ;;  %v1588_v8 = vpop.xlane.xlu1 %1587  ;;  %v8639_v54 = vld [vmem:[#allocation9_spill] sm:$0xff]  ;;  %5787 = vmatprep.subr.bf16.mxu1 %v5889_v44  ;;  %v8642_v28 = vld [vmem:[#allocation12_spill] sm:$0xff] }
 0x359   : > { %6048 = vpow2.f32 %v1752_v61  ;;  %v1756_v24 = vmul.f32 1.442695, %v1660_v6  ;;  %v1664_v7 = vsub.f32 %v7229_v43, %v1588_v8  ;;  %v1665_v31 = vsub.f32 %v7231_v46, %v1588_v8 }
 0x35a   : > { %6050 = vpow2.f32 %v1754_v62  ;;  %v1758_v9 = vmul.f32 1.442695, %v1661_v49  ;;  %v1585_v40 = vpop.xlane.xlu0 %1584  ;;  %v5891_v62 = vld [vmem:[%s8552_s4 + $0x38] sm:$0xff]  }
 0x35b   : > { %6052 = vpow2.f32 %v1756_v24  ;;  %v1764_v45 = vmul.f32 1.442695, %v1664_v7  ;;  %v1766_v5 = vmul.f32 1.442695, %v1665_v31  ;;  %v1662_v35 = vsub.f32 %v7239_v29, %v1585_v40  ;;  %5788 = vmatpush3.bf16.msra.mxu1 %v5889_v44 }
 0x35c   : > { %6054 = vpow2.f32 %v1758_v9  ;;  %v1663_v10 = vsub.f32 %v8639_v54, %v1585_v40  ;;  %v1594_v33 = vpop.xlane.xlu1 %1593  ;;  %5789 = vmatprep.subr.bf16.mxu1 %v5890_v32 }
 0x35d   : > { %6056 = vpow2.f32 %v1764_v45  ;;  %v1760_v46 = vmul.f32 1.442695, %v1662_v35  ;;  %v1668_v43 = vsub.f32 %v7247_v39, %v1594_v33  ;;  %v1669_v16 = vsub.f32 %v7249_v19, %v1594_v33 }
 0x35e   : > { %6058 = vpow2.f32 %v1766_v5  ;;  %v1762_v57 = vmul.f32 1.442695, %v1663_v10  ;;  %v1591_v36 = vpop.xlane.xlu0 %1590 }
 0x35f   : > { %6060 = vpow2.f32 %v1760_v46  ;;  %v1772_v29 = vmul.f32 1.442695, %v1668_v43  ;;  %v1774_v38 = vmul.f32 1.442695, %v1669_v16  ;;  %v1666_v20 = vsub.f32 %v7256_v37, %v1591_v36  ;;  %5790 = vmatpush3.bf16.msra.mxu1 %v5890_v32 }
 0x360   : > { %6062 = vpow2.f32 %v1762_v57  ;;  %v1667_v52 = vsub.f32 %v7259_v41, %v1591_v36  ;;  %v1600_v55 = vpop.xlane.xlu1 %1599  ;;  %5791 = vmatprep.subr.bf16.mxu1 %v5891_v62 }
 0x361   : > { %v6045_v39 = vpop.eup %6044  ;;  %6064 = vpow2.f32 %v1772_v29  ;;  %v1768_v19 = vmul.f32 1.442695, %v1666_v20  ;;  %v1672_v50 = vsub.f32 %v7266_v26, %v1600_v55  ;;  %v1673_v59 = vsub.f32 %v7269_v42, %v1600_v55  ;;  %v8641_v26 = vld [vmem:[#allocation11_spill] sm:$0xff] }
 0x362   : > { %v6047_v12 = vpop.eup %6046  ;;  %6066 = vpow2.f32 %v1774_v38  ;;  %v1770_v37 = vmul.f32 1.442695, %v1667_v52  ;;  %v1597_v56 = vpop.xlane.xlu0 %1596 }
 0x363   : > { %v6049_v30 = vpop.eup %6048  ;;  %6068 = vpow2.f32 %v1768_v19  ;;  %v1780_v41 = vmul.f32 1.442695, %v1672_v50  ;;  %v1782_v3 = vmul.f32 1.442695, %v1673_v59  ;;  %v1670_v53 = vsub.f32 %v8640_v14, %v1597_v56  ;;  %5792 = vmatpush3.bf16.msra.mxu1 %v5891_v62  ;;  %v8643_v50 = vld [vmem:[#allocation13_spill] sm:$0xff] }
 0x364   : > { %v6051_v4 = vpop.eup %6050  ;;  %6070 = vpow2.f32 %v1770_v37  ;;  %v1671_v11 = vsub.f32 %v8641_v26, %v1597_v56  ;;  %v1606_v42 = vpop.xlane.xlu1 %1605  ;;  %v1862_v60 = vadd.f32 %v6047_v12, %v6045_v39  ;;  %v1930_v25 = vpack.c.bf16 %v6049_v30, %v6045_v39 }
 0x365   : > { %v7526_v48 = vpop.eup %6052  ;;  %6072 = vpow2.f32 %v1780_v41  ;;  %v1776_v51 = vmul.f32 1.442695, %v1670_v53  ;;  %v1676_v18 = vsub.f32 %v7286_v58, %v1606_v42  ;;  %v1677_v61 = vsub.f32 %v8642_v28, %v1606_v42  ;;  %v8645_v53 = vld [vmem:[#allocation15_spill] sm:$0xff] }
 0x366   : > { %v6055_v6 = vpop.eup %6054  ;;  %6074 = vpow2.f32 %v1782_v3  ;;  %v1778_v49 = vmul.f32 1.442695, %v1671_v11  ;;  %1863 = vadd.xlane.f32.xlu1 %v1862_v60  ;;  %v1931_v8 = vpack.c.bf16 %v6051_v4, %v6047_v12  ;;  %v1603_v24 = vpop.xlane.xlu0 %1602  ;;  %v1865_v7 = vadd.f32 %v6051_v4, %v6049_v30 }
 0x367   : > { %v7533_v31 = vpop.eup %6056  ;;  %6076 = vpow2.f32 %v1776_v51  ;;  %v1788_v2 = vmul.f32 1.442695, %v1676_v18  ;;  %v1790_v9 = vmul.f32 1.442695, %v1677_v61  ;;  %v1674_v58 = vsub.f32 %v7298_v1, %v1603_v24  ;;  %v8646_v61 = vld [vmem:[#allocation16_spill] sm:$0xff] }
 0x368   : > { %v6059_v40 = vpop.eup %6058  ;;  %6078 = vpow2.f32 %v1778_v49  ;;  %2036 = vmatprep.mubr.bf16.mxu0 %v1931_v8  ;;  %v1675_v45 = vsub.f32 %v7301_v13, %v1603_v24  ;;  %1866 = vadd.xlane.f32.xlu0 %v1865_v7  ;;  %v1612_v5 = vpop.xlane.xlu1 %1611  ;;  %v1868_v35 = vadd.f32 %v6055_v6, %v7526_v48 }
 0x369   : > { %v6061_v54 = vpop.eup %6060  ;;  %6080 = vpow2.f32 %v1788_v2  ;;  %v1784_v10 = vmul.f32 1.442695, %v1674_v58  ;;  %2037 = vmatmul.mubr.bf16.gmra.mrb[92].mxu0 %v1930_v25  ;;  %v1680_v33 = vsub.f32 %v7312_v22, %v1612_v5  ;;  %v1681_v46 = vsub.f32 %v7315_v15, %v1612_v5 }
 0x36a   : > { %v6063_v1 = vpop.eup %6062  ;;  %6082 = vpow2.f32 %v1790_v9  ;;  %v1786_v43 = vmul.f32 1.442695, %v1675_v45  ;;  %1869 = vadd.xlane.f32.xlu1 %v1868_v35  ;;  %v1609_v16 = vpop.xlane.xlu0 %1608  ;;  %v1874_v13 = vadd.f32 %v6059_v40, %v7533_v31  ;;  %v1932_v37 = vpack.c.bf16 %v6061_v54, %v7526_v48 }
 0x36b   : > { %v7541_v44 = vpop.eup %6064  ;;  %6084 = vpow2.f32 %v1784_v10  ;;  %v1796_v57 = vmul.f32 1.442695, %v1680_v33  ;;  %v1798_v36 = vmul.f32 1.442695, %v1681_v46  ;;  %v1678_v29 = vsub.f32 %v7324_v34, %v1609_v16 }
 0x36c   : > { %v7544_v38 = vpop.eup %6066  ;;  %6086 = vpow2.f32 %v1786_v43  ;;  %v1679_v22 = vsub.f32 %v7327_v17, %v1609_v16  ;;  %v1933_v15 = vpack.c.bf16 %v6063_v1, %v6055_v6  ;;  %v1618_v20 = vpop.xlane.xlu1 %1617  ;;  %v1871_v52 = vadd.f32 %v6063_v1, %v6061_v54 }
 0x36d   : > { %v6069_v55 = vpop.eup %6068  ;;  %6088 = vpow2.f32 %v1796_v57  ;;  %v1792_v39 = vmul.f32 1.442695, %v1678_v29  ;;  %v1684_v19 = vsub.f32 %v7333_v27, %v1618_v20  ;;  %v1685_v59 = vsub.f32 %v8643_v50, %v1618_v20  ;;  %v8644_v27 = vld [vmem:[#allocation14_spill] sm:$0xff] }
 0x36e   : > { %v6071_v32 = vpop.eup %6070  ;;  %6090 = vpow2.f32 %v1798_v36  ;;  %v1794_v12 = vmul.f32 1.442695, %v1679_v22  ;;  %2044 = vmatprep.mubr.bf16.mxu0 %v1933_v15  ;;  %1875 = vadd.xlane.f32.xlu1 %v1874_v13  ;;  %v1615_v34 = vpop.xlane.xlu0 %1614  ;;  %v1880_v17 = vadd.f32 %v7544_v38, %v7541_v44 }
 0x36f   : > { %v7552_v56 = vpop.eup %6072  ;;  %6092 = vpow2.f32 %v1792_v39  ;;  %v1804_v30 = vmul.f32 1.442695, %v1684_v19  ;;  %v1806_v41 = vmul.f32 1.442695, %v1685_v59  ;;  %1872 = vadd.xlane.f32.xlu0 %v1871_v52  ;;  %v1682_v3 = vsub.f32 %v8644_v27, %v1615_v34 }
 0x370   : > { %v6075_v14 = vpop.eup %6074  ;;  %6094 = vpow2.f32 %v1794_v12  ;;  %v1683_v4 = vsub.f32 %v8645_v53, %v1615_v34  ;;  %v1935_v26 = vpack.c.bf16 %v6071_v32, %v6059_v40  ;;  %v1877_v11 = vadd.f32 %v6071_v32, %v6069_v55 }
 0x371   : > { %v6077_v42 = vpop.eup %6076  ;;  %6096 = vpow2.f32 %v1804_v30  ;;  %v1800_v60 = vmul.f32 1.442695, %v1682_v3  ;;  %2045 = vmatmul.mubr.bf16.gmra.mrb[96].mxu0 %v1932_v37  ;;  %v1886_v8 = vadd.f32 %v6075_v14, %v7552_v56  ;;  %v1934_v40 = vpack.c.bf16 %v6069_v55, %v7533_v31 }
 0x372   : > { %v6079_v25 = vpop.eup %6078  ;;  %6098 = vpow2.f32 %v1806_v41  ;;  %v1802_v48 = vmul.f32 1.442695, %v1683_v4  ;;  %2052 = vmatprep.mubr.bf16.mxu0 %v1935_v26  ;;  %1881 = vadd.xlane.f32.xlu1 %v1880_v17  ;;  %v1621_v51 = vpop.xlane.xlu0 %1620  ;;  %v1936_v31 = vpack.c.bf16 %v6077_v42, %v7541_v44 }
 0x373   : > { %v6081_v18 = vpop.eup %6080  ;;  %6100 = vpow2.f32 %v1800_v60  ;;  %1878 = vadd.xlane.f32.xlu0 %v1877_v11  ;;  %v1686_v28 = vsub.f32 %v7353_v21, %v1621_v51  ;;  %v1687_v62 = vsub.f32 %v8646_v61, %v1621_v51  ;;  %v1883_v6 = vadd.f32 %v6079_v25, %v6077_v42 }
 0x374   : > { %v6083_v49 = vpop.eup %6082  ;;  %6102 = vpow2.f32 %v1802_v48  ;;  %v1937_v21 = vpack.c.bf16 %v6079_v25, %v7544_v38 }
 0x375   : > { %v6085_v24 = vpop.eup %6084  ;;  %v1808_v7 = vmul.f32 1.442695, %v1686_v28  ;;  %v1810_v2 = vmul.f32 1.442695, %v1687_v62  ;;  %v1892_v35 = vadd.f32 %v6083_v49, %v6081_v18 }
 0x376   : > { %v6087_v9 = vpop.eup %6086  ;;  %1887 = vadd.xlane.f32.xlu1 %v1886_v8  ;;  %v1938_v20 = vpack.c.bf16 %v6085_v24, %v7552_v56 }
 0x377   : > { %v6089_v58 = vpop.eup %6088  ;;  %6104 = vpow2.f32 %v1808_v7  ;;  %1884 = vadd.xlane.f32.xlu0 %v1883_v6  ;;  %v1889_v45 = vadd.f32 %v6087_v9, %v6085_v24  ;;  %v1939_v36 = vpack.c.bf16 %v6087_v9, %v6075_v14 }
 0x378   : > { %v6091_v5 = vpop.eup %6090  ;;  %6106 = vpow2.f32 %v1810_v2 }
 0x379   : > { %v6093_v54 = vpop.eup %6092  ;;  %2053 = vmatmul.mubr.bf16.gmra.mrb[100].mxu0 %v1934_v40  ;;  %v1898_v43 = vadd.f32 %v6091_v5, %v6089_v58 }
 0x37a   : > { %v6095_v10 = vpop.eup %6094  ;;  %2060 = vmatprep.mubr.bf16.mxu0 %v1937_v21  ;;  %1893 = vadd.xlane.f32.xlu1 %v1892_v35  ;;  %v1940_v55 = vpack.c.bf16 %v6093_v54, %v6081_v18 }
 0x37b   : > { %v6097_v33 = vpop.eup %6096  ;;  %1890 = vadd.xlane.f32.xlu0 %v1889_v45  ;;  %v1895_v46 = vadd.f32 %v6095_v10, %v6093_v54  ;;  %v1941_v52 = vpack.c.bf16 %v6095_v10, %v6083_v49 }
 0x37c   : > { %v6099_v1 = vpop.eup %6098 }
 0x37d   : > { %v6101_v16 = vpop.eup %6100  ;;  %v1904_v29 = vadd.f32 %v6099_v1, %v6097_v33 }
 0x37e   : > { %v6103_v13 = vpop.eup %6102  ;;  %1899 = vadd.xlane.f32.xlu1 %v1898_v43  ;;  %v1942_v44 = vpack.c.bf16 %v6101_v16, %v6089_v58 }
 0x37f   : > { %1896 = vadd.xlane.f32.xlu0 %v1895_v46  ;;  %v1901_v57 = vadd.f32 %v6103_v13, %v6101_v16  ;;  %v1943_v39 = vpack.c.bf16 %v6103_v13, %v6091_v5 }
 0x381   : > { %v6105_v38 = vpop.eup %6104  ;;  %2061 = vmatmul.mubr.bf16.gmra.mrb[104].mxu0 %v1936_v31 }
 0x382   : > { %v6107_v22 = vpop.eup %6106  ;;  %2068 = vmatprep.mubr.bf16.mxu0 %v1939_v36  ;;  %1905 = vadd.xlane.f32.xlu1 %v1904_v29  ;;  %v1944_v50 = vpack.c.bf16 %v6105_v38, %v6097_v33 }
 0x383   : > { %1902 = vadd.xlane.f32.xlu0 %v1901_v57  ;;  %v1907_v15 = vadd.f32 %v6107_v22, %v6105_v38  ;;  %v1945_v19 = vpack.c.bf16 %v6107_v22, %v6099_v1 }
 0x387   : > { %1908 = vadd.xlane.f32.xlu0 %v1907_v15 }
 0x389   : > { %2069 = vmatmul.mubr.bf16.gmra.mrb[108].mxu0 %v1938_v20 }
 0x38a   : > { %2076 = vmatprep.mubr.bf16.mxu0 %v1941_v52 }
 0x391   : > { %2077 = vmatmul.mubr.bf16.gmra.mrb[112].mxu0 %v1940_v55 }
 0x392   : > { %2084 = vmatprep.mubr.bf16.mxu0 %v1943_v39 }
 0x399   : > { %2085 = vmatmul.mubr.bf16.gmra.mrb[116].mxu0 %v1942_v44 }
 0x39a   : > { %2092 = vmatprep.mubr.bf16.mxu0 %v1945_v19 }
 0x3a1   : > { %2093 = vmatmul.mubr.bf16.gmra.mrb[120].mxu0 %v1944_v50 }
 0x3b5   : > { %v1627_v59 = vpop.xlane.xlu0 %1626 }
 0x3b6   : > { %v1690_v32 = vsub.f32 %v7450_v63, %v1627_v59  ;;  %v1691_v12 = vsub.f32 %v7453_v23, %v1627_v59 }
 0x3b7   : > { %v1624_v34 = vpop.xlane.xlu1 %1623 }
 0x3b8   : > { %v1816_v37 = vmul.f32 1.442695, %v1690_v32  ;;  %v1818_v17 = vmul.f32 1.442695, %v1691_v12  ;;  %v1688_v56 = vsub.f32 %v7460_v0, %v1624_v34  ;;  %v1689_v30 = vsub.f32 %v7463_v47, %v1624_v34 }
 0x3b9   : > { %v8647_v0 = vmov 0   ;;  %v1825_v47 = vpop.xlane.xlu0 %1824 }
 0x3ba   : > { %6108 = vpow2.f32 %v1816_v37  ;;  %v1812_v41 = vmul.f32 1.442695, %v1688_v56  ;;  %v1814_v27 = vmul.f32 1.442695, %v1689_v30 }
 0x3bb   : > { %6110 = vpow2.f32 %v1818_v17  ;;  %v1822_v42 = vpop.xlane.xlu1 %1821 }
 0x3bc   : > { %6112 = vpow2.f32 %v1812_v41 }
 0x3bd   : > { %6114 = vpow2.f32 %v1814_v27  ;;  %v1831_v60 = vpop.xlane.xlu0 %1830 }
 0x3be   : > { %6116 = vrcp.f32 %v1825_v47 }
 0x3bf   : > { %6118 = vrcp.f32 %v1822_v42  ;;  %v1828_v25 = vpop.xlane.xlu1 %1827 }
 0x3c0   : > { %6120 = vrcp.f32 %v1831_v60 }
 0x3c1   : > { %6122 = vrcp.f32 %v1828_v25  ;;  %v1837_v7 = vpop.xlane.xlu0 %1836 }
 0x3c2   : > { %6124 = vrcp.f32 %v1837_v7 }
 0x3c3   : > { %v1834_v2 = vpop.xlane.xlu1 %1833 }
 0x3c4   : > { %v6109_v3 = vpop.eup %6108  ;;  %6126 = vrcp.f32 %v1834_v2 }
 0x3c5   : > { %v6111_v14 = vpop.eup %6110  ;;  %v1843_v1 = vpop.xlane.xlu0 %1842 }
 0x3c6   : > { %v6113_v53 = vpop.eup %6112  ;;  %v1913_v4 = vadd.f32 %v6111_v14, %v6109_v3  ;;  %6128 = vrcp.f32 %v1843_v1 }
 0x3c7   : > { %v6115_v63 = vpop.eup %6114  ;;  %v1946_v26 = vpack.c.bf16 %v6109_v3, %v6113_v53  ;;  %v1840_v43 = vpop.xlane.xlu1 %1839 }
 0x3c8   : > { %1914 = vadd.xlane.f32.xlu0 %v1913_v4  ;;  %v1910_v23 = vadd.f32 %v6115_v63, %v6113_v53  ;;  %v1947_v11 = vpack.c.bf16 %v6111_v14, %v6115_v63  ;;  %v6117_v62 = vpop.eup %6116  ;;  %6130 = vrcp.f32 %v1840_v43 }
 0x3c9   : > { %v6119_v49 = vpop.eup %6118  ;;  %v1849_v55 = vpop.xlane.xlu0 %1848 }
 0x3ca   : > { %1911 = vadd.xlane.f32.xlu1 %v1910_v23  ;;  %2100 = vmatprep.mubr.bf16.mxu0 %v1947_v11  ;;  %v6121_v35 = vpop.eup %6120  ;;  %6132 = vrcp.f32 %v1849_v55  ;;  %v5910_v55 = vld [vmem:[%s8553_s5 + $0x60] ss:$16 sps:$4 sm:$0xff]  }
 0x3cb   : > { %2101 = vmatmul.mubr.bf16.gmra.mrb[124].mxu0 %v1946_v26  ;;  %v6123_v10 = vpop.eup %6122  ;;  %v1846_v39 = vpop.xlane.xlu1 %1845 }
 0x3cc   : > { %2718 = vmatprep.mubr.bf16.mxu0 %v8647_v0  ;;  %v6125_v38 = vpop.eup %6124  ;;  %6134 = vrcp.f32 %v1846_v39  ;;  %v5907_v39 = vld [vmem:[%s8553_s5 + $0x48] ss:$16 sps:$4 sm:$0xff]  }
 0x3cd   : > { %v1855_v41 = vpop.xlane.xlu0 %1854 }
 0x3ce   : > { %v6127_v15 = vpop.eup %6126  ;;  %6136 = vrcp.f32 %v1855_v41  ;;  %v5925_v41 = vld [vmem:[%s8553_s5 + $0xa8] ss:$16 sps:$4 sm:$0xff]  }
 0x3cf   : > { %v1852_v27 = vpop.xlane.xlu1 %1851 }
 0x3d0   : > { %v6129_v34 = vpop.eup %6128  ;;  %6138 = vrcp.f32 %v1852_v27 }
 0x3d1   : > { %v1861_v25 = vpop.xlane.xlu0 %1860 }
 0x3d2   : > { %v6131_v17 = vpop.eup %6130  ;;  %6140 = vrcp.f32 %v1861_v25 }
 0x3d4   : > { %v6133_v23 = vpop.eup %6132 }
 0x3d6   : > { %v6135_v47 = vpop.eup %6134 }
 0x3d7   : > { %v5385_v48 = vpop.f32.mrb[64].mxu0 }
 0x3d8   : > { %v5386_v51 = vpop.f32.mrb[65].mxu0 }
 0x3d9   : > { %v5387_v18 = vadd.f32 %v5386_v51, %v5385_v48  ;;  %v5388_v28 = vpop.f32.mrb[66].mxu0  ;;  %v5892_v48 = vld [vmem:[%s8553_s5] ss:$16 sps:$4 sm:$0xff]   ;;  %v5894_v51 = vld [vmem:[%s8553_s5 + $0x4] ss:$16 sps:$4 sm:$0xff]  }
 0x3da   : > { %v5389_v61 = vpop.f32.mrb[67].mxu0  ;;  %2686 = vmatprep.subr.bf16.mxu0 %v5894_v51  ;;  %v5939_v51 = vld [vmem:[%s8553_s5 + $0xec] ss:$16 sps:$4 sm:$0xff]  }
 0x3db   : > { %v5390_v6 = vadd.f32 %v5389_v61, %v5388_v28  ;;  %v2141_v8 = vmul.f32 %v6119_v49, %v5387_v18  ;;  %v1858_v18 = vpop.xlane.xlu1 %1857  ;;  %2687 = vmatpush1.bf16.msra.mxu0 %v5892_v48  ;;  %v5936_v48 = vld [vmem:[%s8553_s5 + $0xe4] ss:$16 sps:$4 sm:$0xff]  }
 0x3dc   : > { %6142 = vrcp.f32 %v1858_v18 }
 0x3dd   : > { %v2142_v24 = vmul.f32 %v6117_v62, %v5390_v6 }
 0x3df   : > { %v5391_v9 = vpop.f32.mrb[68].mxu0  ;;  %v2205_v58 = vpack.c.bf16 %v2142_v24, %v2141_v8  ;;  %v6137_v24 = vpop.eup %6136 }
 0x3e0   : > { %v5392_v40 = vpop.f32.mrb[69].mxu0  ;;  %v6139_v2 = vpop.eup %6138 }
 0x3e1   : > { %v5393_v45 = vadd.f32 %v5392_v40, %v5391_v9  ;;  %v5394_v5 = vpop.f32.mrb[70].mxu0  ;;  %5793 = vmatprep.mubr.bf16.mxu1 %v2205_v58 }
 0x3e2   : > { %v5395_v21 = vpop.f32.mrb[71].mxu0 }
 0x3e3   : > { %v5396_v54 = vadd.f32 %v5395_v21, %v5394_v5  ;;  %v2143_v33 = vmul.f32 %v6123_v10, %v5393_v45  ;;  %v6141_v10 = vpop.eup %6140 }
 0x3e5   : > { %v2144_v46 = vmul.f32 %v6121_v35, %v5396_v54 }
 0x3e7   : > { %v2206_v16 = vpack.c.bf16 %v2144_v46, %v2143_v33  ;;  %v5397_v13 = vpop.f32.mrb[72].mxu0  ;;  %v6143_v46 = vpop.eup %6142 }
 0x3e8   : > { %v5398_v31 = vpop.f32.mrb[73].mxu0 }
 0x3e9   : > { %v5399_v57 = vadd.f32 %v5398_v31, %v5397_v13  ;;  %v5400_v36 = vpop.f32.mrb[74].mxu0  ;;  %5794 = vmatmul.mubr.bf16.vlgmr.msra.gmra.mrb[96].mxu1 %v2206_v16  ;;  %v5895_v13 = vld [vmem:[%s8553_s5 + $0x20] ss:$16 sps:$4 sm:$0xff]   ;;  %v5897_v31 = vld [vmem:[%s8553_s5 + $0x24] ss:$16 sps:$4 sm:$0xff]  }
 0x3ea   : > { %v5401_v29 = vpop.f32.mrb[75].mxu0  ;;  %2688 = vmatprep.subr.bf16.mxu0 %v5897_v31 }
 0x3eb   : > { %v5402_v22 = vadd.f32 %v5401_v29, %v5400_v36  ;;  %v2145_v20 = vmul.f32 %v6127_v15, %v5399_v57  ;;  %v5898_v57 = vld [vmem:[%s8553_s5 + $0x8] ss:$16 sps:$4 sm:$0xff]   ;;  %v5900_v36 = vld [vmem:[%s8553_s5 + $0xc] ss:$16 sps:$4 sm:$0xff]   ;;  %2689 = vmatpush1.bf16.msra.mxu0 %v5895_v13  ;;  %v5906_v15 = vld [vmem:[%s8553_s5 + $0x44] ss:$16 sps:$4 sm:$0xff]  }
 0x3ec   : > { %v5903_v29 = vld [vmem:[%s8553_s5 + $0x2c] ss:$16 sps:$4 sm:$0xff]   ;;  %2879 = vmatprep.subr.bf16.mxu1 %v5900_v36  ;;  %2690 = vmatprep.subr.bf16.mxu0 %v5906_v15 }
 0x3ed   : > { %v2146_v52 = vmul.f32 %v6125_v38, %v5402_v22  ;;  %2880 = vmatpush1.bf16.msra.mxu1 %v5898_v57  ;;  %v5901_v38 = vld [vmem:[%s8553_s5 + $0x28] ss:$16 sps:$4 sm:$0xff]   ;;  %v5904_v22 = vld [vmem:[%s8553_s5 + $0x40] ss:$16 sps:$4 sm:$0xff]  }
 0x3ee   : > { %2881 = vmatprep.subr.bf16.mxu1 %v5903_v29 }
 0x3ef   : > { %v5403_v44 = vpop.f32.mrb[76].mxu0  ;;  %v2207_v19 = vpack.c.bf16 %v2146_v52, %v2145_v20  ;;  %v5909_v20 = vld [vmem:[%s8553_s5 + $0x4c] ss:$16 sps:$4 sm:$0xff]   ;;  %v5912_v52 = vld [vmem:[%s8553_s5 + $0x64] ss:$16 sps:$4 sm:$0xff]   ;;  %2691 = vmatpush1.bf16.msra.mxu0 %v5904_v22 }
 0x3f0   : > { %v5404_v50 = vpop.f32.mrb[77].mxu0  ;;  %2692 = vmatprep.subr.bf16.mxu0 %v5912_v52 }
 0x3f1   : > { %v5405_v59 = vadd.f32 %v5404_v50, %v5403_v44  ;;  %v5406_v32 = vpop.f32.mrb[78].mxu0  ;;  %5797 = vmatprep.mubr.bf16.mxu1 %v2207_v19  ;;  %2882 = vmatpush1.bf16.msra.mxu1 %v5901_v38  ;;  %v5918_v44 = vld [vmem:[%s8553_s5 + $0x84] ss:$16 sps:$4 sm:$0xff]   ;;  %v5915_v19 = vld [vmem:[%s8553_s5 + $0x6c] ss:$16 sps:$4 sm:$0xff]  }
 0x3f2   : > { %v5407_v12 = vpop.f32.mrb[79].mxu0  ;;  %2883 = vmatprep.subr.bf16.mxu1 %v5909_v20  ;;  %v5916_v50 = vld [vmem:[%s8553_s5 + $0x80] ss:$16 sps:$4 sm:$0xff]  }
 0x3f3   : > { %v5408_v37 = vadd.f32 %v5407_v12, %v5406_v32  ;;  %v2147_v56 = vmul.f32 %v6131_v17, %v5405_v59  ;;  %2693 = vmatpush1.bf16.msra.mxu0 %v5910_v55  ;;  %v5913_v59 = vld [vmem:[%s8553_s5 + $0x68] ss:$16 sps:$4 sm:$0xff]   ;;  %v5924_v32 = vld [vmem:[%s8553_s5 + $0xa4] ss:$16 sps:$4 sm:$0xff]   ;;  %v5921_v12 = vld [vmem:[%s8553_s5 + $0x8c] ss:$16 sps:$4 sm:$0xff]  }
 0x3f4   : > { %2694 = vmatprep.subr.bf16.mxu0 %v5918_v44 }
 0x3f5   : > { %v2148_v30 = vmul.f32 %v6129_v34, %v5408_v37  ;;  %2884 = vmatpush1.bf16.msra.mxu1 %v5907_v39  ;;  %v1864_v34 = vpop.xlane.xlu1 %1863  ;;  %v5922_v37 = vld [vmem:[%s8553_s5 + $0xa0] ss:$16 sps:$4 sm:$0xff]   ;;  %v1867_v17 = vpop.xlane.xlu0 %1866 }
 0x3f6   : > { %2885 = vmatprep.subr.bf16.mxu1 %v5915_v19  ;;  %6144 = vrcp.f32 %v1864_v34 }
 0x3f7   : > { %v5409_v3 = vpop.f32.mrb[80].mxu0  ;;  %v2208_v14 = vpack.c.bf16 %v2148_v30, %v2147_v56  ;;  %2695 = vmatpush1.bf16.msra.mxu0 %v5916_v50  ;;  %v5919_v56 = vld [vmem:[%s8553_s5 + $0x88] ss:$16 sps:$4 sm:$0xff]   ;;  %v5927_v30 = vld [vmem:[%s8553_s5 + $0xac] ss:$16 sps:$4 sm:$0xff]   ;;  %6146 = vrcp.f32 %v1867_v17 }
 0x3f8   : > { %v5410_v53 = vpop.f32.mrb[81].mxu0  ;;  %2696 = vmatprep.subr.bf16.mxu0 %v5924_v32 }
 0x3f9   : > { %v5411_v4 = vadd.f32 %v5410_v53, %v5409_v3  ;;  %v5412_v63 = vpop.f32.mrb[82].mxu0  ;;  %5798 = vmatmul.mubr.bf16.gmra.mrb[100].mxu1 %v2208_v14  ;;  %v1870_v27 = vpop.xlane.xlu1 %1869  ;;  %v5930_v53 = vld [vmem:[%s8553_s5 + $0xc4] ss:$16 sps:$4 sm:$0xff]  }
 0x3fa   : > { %v5413_v26 = vpop.f32.mrb[83].mxu0  ;;  %2886 = vmatpush1.bf16.msra.mxu1 %v5913_v59  ;;  %6148 = vrcp.f32 %v1870_v27 }
 0x3fb   : > { %v5414_v11 = vadd.f32 %v5413_v26, %v5412_v63  ;;  %v2149_v42 = vmul.f32 %v6135_v47, %v5411_v4  ;;  %2887 = vmatprep.subr.bf16.mxu1 %v5921_v12  ;;  %2697 = vmatpush1.bf16.msra.mxu0 %v5922_v37  ;;  %v5933_v4 = vld [vmem:[%s8553_s5 + $0xcc] ss:$16 sps:$4 sm:$0xff]   ;;  %v5928_v26 = vld [vmem:[%s8553_s5 + $0xc0] ss:$16 sps:$4 sm:$0xff]  }
 0x3fc   : > { %v1873_v3 = vpop.xlane.xlu0 %1872  ;;  %2698 = vmatprep.subr.bf16.mxu0 %v5930_v53 }
 0x3fd   : > { %v2150_v60 = vmul.f32 %v6133_v23, %v5414_v11  ;;  %v5931_v23 = vld [vmem:[%s8553_s5 + $0xc8] ss:$16 sps:$4 sm:$0xff]   ;;  %6150 = vrcp.f32 %v1873_v3 }
 0x3fe   : > { %2888 = vmatpush1.bf16.msra.mxu1 %v5919_v56 }
 0x3ff   : > { %v5415_v28 = vpop.f32.mrb[84].mxu0  ;;  %v2209_v61 = vpack.c.bf16 %v2150_v60, %v2149_v42  ;;  %2889 = vmatprep.subr.bf16.mxu1 %v5927_v30  ;;  %2699 = vmatpush1.bf16.msra.mxu0 %v5928_v26 }
 0x400   : > { %v5416_v62 = vpop.f32.mrb[85].mxu0  ;;  %v6145_v60 = vpop.eup %6144  ;;  %2700 = vmatprep.subr.bf16.mxu0 %v5936_v48 }
 0x401   : > { %v5417_v6 = vadd.f32 %v5416_v62, %v5415_v28  ;;  %v5418_v49 = vpop.f32.mrb[86].mxu0  ;;  %5801 = vmatprep.mubr.bf16.mxu1 %v2209_v61  ;;  %v6147_v18 = vpop.eup %6146  ;;  %v5934_v28 = vld [vmem:[%s8553_s5 + $0xe0] ss:$16 sps:$4 sm:$0xff]   ;;  %v5937_v61 = vld [vmem:[%s8553_s5 + $0xe8] ss:$16 sps:$4 sm:$0xff]  }
 0x402   : > { %v5419_v8 = vpop.f32.mrb[87].mxu0  ;;  %2890 = vmatpush1.bf16.msra.mxu1 %v5925_v41 }
 0x403   : > { %v5420_v7 = vadd.f32 %v5419_v8, %v5418_v49  ;;  %v2151_v9 = vmul.f32 %v6139_v2, %v5417_v6  ;;  %2891 = vmatprep.subr.bf16.mxu1 %v5933_v4  ;;  %v1876_v49 = vpop.xlane.xlu1 %1875  ;;  %2701 = vmatpush1.bf16.msra.mxu0 %v5934_v28  ;;  %v1879_v8 = vpop.xlane.xlu0 %1878 }
 0x404   : > { %6152 = vrcp.f32 %v1876_v49 }
 0x405   : > { %v2152_v58 = vmul.f32 %v6137_v24, %v5420_v7  ;;  %6154 = vrcp.f32 %v1879_v8 }
 0x406   : > { %2892 = vmatpush1.bf16.msra.mxu1 %v5931_v23 }
 0x407   : > { %v5421_v40 = vpop.f32.mrb[88].mxu0  ;;  %v2210_v45 = vpack.c.bf16 %v2152_v58, %v2151_v9  ;;  %2893 = vmatprep.subr.bf16.mxu1 %v5939_v51 }
 0x408   : > { %v5422_v5 = vpop.f32.mrb[89].mxu0 }
 0x409   : > { %v5423_v21 = vadd.f32 %v5422_v5, %v5421_v40  ;;  %v5424_v35 = vpop.f32.mrb[90].mxu0  ;;  %5802 = vmatmul.mubr.bf16.gmra.mrb[104].mxu1 %v2210_v45  ;;  %v6149_v45 = vpop.eup %6148 }
 0x40a   : > { %v5425_v54 = vpop.f32.mrb[91].mxu0  ;;  %2894 = vmatpush1.bf16.msra.mxu1 %v5937_v61 }
 0x40b   : > { %v5426_v33 = vadd.f32 %v5425_v54, %v5424_v35  ;;  %v2153_v1 = vmul.f32 %v6143_v46, %v5423_v21  ;;  %v6151_v21 = vpop.eup %6150 }
 0x40d   : > { %v2154_v43 = vmul.f32 %v6141_v10, %v5426_v33  ;;  %v1882_v10 = vpop.xlane.xlu1 %1881  ;;  %v1885_v33 = vpop.xlane.xlu0 %1884 }
 0x40e   : > { %6156 = vrcp.f32 %v1882_v10  ;;  %v6153_v57 = vpop.eup %6152 }
 0x40f   : > { %v2211_v16 = vpack.c.bf16 %v2154_v43, %v2153_v1  ;;  %6158 = vrcp.f32 %v1885_v33  ;;  %v6155_v29 = vpop.eup %6154 }
 0x411   : > { %5805 = vmatprep.mubr.bf16.mxu1 %v2211_v16  ;;  %v1888_v15 = vpop.xlane.xlu1 %1887  ;;  %v1891_v20 = vpop.xlane.xlu0 %1890 }
 0x412   : > { %6160 = vrcp.f32 %v1888_v15 }
 0x413   : > { %6162 = vrcp.f32 %v1891_v20 }
 0x415   : > { %v1894_v17 = vpop.xlane.xlu1 %1893  ;;  %v1897_v56 = vpop.xlane.xlu0 %1896 }
 0x416   : > { %6164 = vrcp.f32 %v1894_v17 }
 0x417   : > { %6166 = vrcp.f32 %v1897_v56 }
 0x418   : > { %v6157_v59 = vpop.eup %6156 }
 0x419   : > { %v6159_v12 = vpop.eup %6158 }
 0x41c   : > { %v6161_v4 = vpop.eup %6160 }
 0x41d   : > { %v6163_v26 = vpop.eup %6162 }
 0x420   : > { %v6165_v61 = vpop.eup %6164 }
 0x43c   : > { %v5427_v14 = vpop.f32.mrb[92].mxu0 }
 0x43d   : > { %v5428_v63 = vpop.f32.mrb[93].mxu0 }
 0x43e   : > { %v5429_v11 = vadd.f32 %v5428_v63, %v5427_v14  ;;  %v5430_v47 = vpop.f32.mrb[94].mxu0 }
 0x43f   : > { %v5431_v42 = vpop.f32.mrb[95].mxu0 }
 0x440   : > { %v5432_v25 = vadd.f32 %v5431_v42, %v5430_v47  ;;  %v2155_v62 = vmul.f32 %v6145_v60, %v5429_v11  ;;  %v1900_v47 = vpop.xlane.xlu1 %1899  ;;  %v1903_v42 = vpop.xlane.xlu0 %1902 }
 0x441   : > { %6168 = vrcp.f32 %v1900_v47 }
 0x442   : > { %v2156_v6 = vmul.f32 %v6147_v18, %v5432_v25  ;;  %6170 = vrcp.f32 %v1903_v42 }
 0x444   : > { %v5433_v24 = vpop.f32.mrb[96].mxu0  ;;  %v2212_v7 = vpack.c.bf16 %v2156_v6, %v2155_v62  ;;  %v6167_v6 = vpop.eup %6166 }
 0x445   : > { %v5434_v2 = vpop.f32.mrb[97].mxu0 }
 0x446   : > { %v5435_v9 = vadd.f32 %v5434_v2, %v5433_v24  ;;  %v5436_v58 = vpop.f32.mrb[98].mxu0  ;;  %5806 = vmatmul.mubr.bf16.gmra.mrb[108].mxu1 %v2212_v7  ;;  %v1906_v24 = vpop.xlane.xlu1 %1905 }
 0x447   : > { %v5437_v40 = vpop.f32.mrb[99].mxu0  ;;  %v1909_v7 = vpop.xlane.xlu0 %1908  ;;  %6172 = vrcp.f32 %v1906_v24  ;;  %v6695_v24 = vld [vmem:[%s6794_s18 + $0x18] sm:$0xff]  }
 0x448   : > { %v5438_v5 = vadd.f32 %v5437_v40, %v5436_v58  ;;  %v2157_v35 = vmul.f32 %v6149_v45, %v5435_v9  ;;  %6174 = vrcp.f32 %v1909_v7  ;;  %v2180_v7 = vunpack.c.h.bf16 %v6695_v24 }
 0x44a   : > { %v2158_v54 = vmul.f32 %v6151_v21, %v5438_v5 }
 0x44b   : > { %v6169_v21 = vpop.eup %6168 }
 0x44c   : > { %v5439_v46 = vpop.f32.mrb[100].mxu0  ;;  %v2213_v1 = vpack.c.bf16 %v2158_v54, %v2157_v35  ;;  %v6171_v54 = vpop.eup %6170 }
 0x44d   : > { %v5440_v43 = vpop.f32.mrb[101].mxu0 }
 0x44e   : > { %v5441_v16 = vadd.f32 %v5440_v43, %v5439_v46  ;;  %v5442_v13 = vpop.f32.mrb[102].mxu0  ;;  %5809 = vmatprep.mubr.bf16.mxu1 %v2213_v1 }
 0x44f   : > { %v5443_v31 = vpop.f32.mrb[103].mxu0 }
 0x450   : > { %v5444_v36 = vadd.f32 %v5443_v31, %v5442_v13  ;;  %v2159_v38 = vmul.f32 %v6153_v57, %v5441_v16 }
 0x451   : > { %v6173_v57 = vpop.eup %6172 }
 0x452   : > { %v2160_v22 = vmul.f32 %v6155_v29, %v5444_v36  ;;  %v6175_v29 = vpop.eup %6174 }
 0x454   : > { %v5445_v52 = vpop.f32.mrb[104].mxu0  ;;  %v2214_v55 = vpack.c.bf16 %v2160_v22, %v2159_v38 }
 0x455   : > { %v5446_v39 = vpop.f32.mrb[105].mxu0  ;;  %v1915_v20 = vpop.xlane.xlu0 %1914 }
 0x456   : > { %v5447_v44 = vadd.f32 %v5446_v39, %v5445_v52  ;;  %v5448_v19 = vpop.f32.mrb[106].mxu0  ;;  %5810 = vmatmul.mubr.bf16.gmra.mrb[112].mxu1 %v2214_v55  ;;  %6176 = vrcp.f32 %v1915_v20  ;;  %v5942_v20 = vld [vmem:[%s8554_s6] sm:$0xff]  }
 0x457   : > { %v5449_v50 = vpop.f32.mrb[107].mxu0  ;;  %v1912_v52 = vpop.xlane.xlu1 %1911 }
 0x458   : > { %v5450_v32 = vadd.f32 %v5449_v50, %v5448_v19  ;;  %v2161_v34 = vmul.f32 %v6157_v59, %v5447_v44  ;;  %6178 = vrcp.f32 %v1912_v52  ;;  %v5943_v52 = vld [vmem:[%s8554_s6 + $0x80] sm:$0xff]  }
 0x45a   : > { %v2162_v37 = vmul.f32 %v6159_v12, %v5450_v32 }
 0x45c   : > { %v5451_v30 = vpop.f32.mrb[108].mxu0  ;;  %v2215_v41 = vpack.c.bf16 %v2162_v37, %v2161_v34 }
 0x45d   : > { %v5452_v27 = vpop.f32.mrb[109].mxu0 }
 0x45e   : > { %v5453_v3 = vadd.f32 %v5452_v27, %v5451_v30  ;;  %v5454_v14 = vpop.f32.mrb[110].mxu0  ;;  %5813 = vmatprep.mubr.bf16.mxu1 %v2215_v41  ;;  %v6692_v30 = vld [vmem:[%s6794_s18] sm:$0xff]  }
 0x45f   : > { %v5455_v53 = vpop.f32.mrb[111].mxu0  ;;  %v2173_v41 = vunpack.c.l.bf16 %v6692_v30  ;;  %v2174_v27 = vunpack.c.h.bf16 %v6692_v30  ;;  %v5944_v30 = vld [vmem:[%s8554_s6 + $0x48] sm:$0xff]  }
 0x460   : > { %v5456_v63 = vadd.f32 %v5455_v53, %v5454_v14  ;;  %v2163_v23 = vmul.f32 %v6161_v4, %v5453_v3  ;;  %v6177_v59 = vpop.eup %6176 }
 0x462   : > { %v2164_v11 = vmul.f32 %v6163_v26, %v5456_v63  ;;  %v6179_v12 = vpop.eup %6178  ;;  %v6693_v26 = vld [vmem:[%s6794_s18 + $0x8] sm:$0xff]  }
 0x463   : > { %v2175_v47 = vunpack.c.l.bf16 %v6693_v26 }
 0x464   : > { %v5457_v60 = vpop.f32.mrb[112].mxu0  ;;  %v2216_v25 = vpack.c.bf16 %v2164_v11, %v2163_v23  ;;  %v2176_v23 = vunpack.c.h.bf16 %v6693_v26 }
 0x465   : > { %v5458_v48 = vpop.f32.mrb[113].mxu0 }
 0x466   : > { %v5459_v51 = vadd.f32 %v5458_v48, %v5457_v60  ;;  %v5460_v18 = vpop.f32.mrb[114].mxu0  ;;  %5814 = vmatmul.mubr.bf16.gmra.mrb[116].mxu1 %v2216_v25 }
 0x467   : > { %v5461_v28 = vpop.f32.mrb[115].mxu0 }
 0x468   : > { %v5462_v62 = vadd.f32 %v5461_v28, %v5460_v18  ;;  %v2165_v49 = vmul.f32 %v6165_v61, %v5459_v51  ;;  %v6694_v51 = vld [vmem:[%s6794_s18 + $0x10] sm:$0xff]  }
 0x469   : > { %v2177_v18 = vunpack.c.l.bf16 %v6694_v51  ;;  %v2178_v28 = vunpack.c.h.bf16 %v6694_v51 }
 0x46a   : > { %v2166_v8 = vmul.f32 %v6167_v6, %v5462_v62 }
 0x46c   : > { %v5463_v2 = vpop.f32.mrb[116].mxu0  ;;  %v2217_v9 = vpack.c.bf16 %v2166_v8, %v2165_v49 }
 0x46d   : > { %v5464_v58 = vpop.f32.mrb[117].mxu0 }
 0x46e   : > { %v5465_v40 = vadd.f32 %v5464_v58, %v5463_v2  ;;  %v5466_v45 = vpop.f32.mrb[118].mxu0  ;;  %5817 = vmatprep.mubr.bf16.mxu1 %v2217_v9  ;;  %v2179_v9 = vunpack.c.l.bf16 %v6695_v24 }
 0x46f   : > { %v5467_v5 = vpop.f32.mrb[119].mxu0 }
 0x470   : > { %v5468_v35 = vadd.f32 %v5467_v5, %v5466_v45  ;;  %v2167_v10 = vmul.f32 %v6169_v21, %v5465_v40  ;;  %v6696_v21 = vld [vmem:[%s6794_s18 + $0x20] sm:$0xff]  }
 0x472   : > { %v2168_v33 = vmul.f32 %v6171_v54, %v5468_v35  ;;  %v2181_v35 = vunpack.c.l.bf16 %v6696_v21  ;;  %v2182_v54 = vunpack.c.h.bf16 %v6696_v21  ;;  %v5951_v21 = vld [vmem:[%s8554_s6 + $0x90] sm:$0xff]  }
 0x474   : > { %v5469_v46 = vpop.f32.mrb[120].mxu0  ;;  %v2218_v1 = vpack.c.bf16 %v2168_v33, %v2167_v10 }
 0x475   : > { %v5470_v43 = vpop.f32.mrb[121].mxu0 }
 0x476   : > { %v5471_v16 = vadd.f32 %v5470_v43, %v5469_v46  ;;  %v5472_v13 = vpop.f32.mrb[122].mxu0  ;;  %5818 = vmatmul.mubr.bf16.gmra.mrb[120].mxu1 %v2218_v1 }
 0x477   : > { %v5473_v31 = vpop.f32.mrb[123].mxu0 }
 0x478   : > { %v5474_v36 = vadd.f32 %v5473_v31, %v5472_v13  ;;  %v2169_v38 = vmul.f32 %v6173_v57, %v5471_v16  ;;  %v6697_v16 = vld [vmem:[%s6794_s18 + $0x28] sm:$0xff]  }
 0x479   : > { %v2184_v13 = vunpack.c.h.bf16 %v6697_v16  ;;  %v2183_v57 = vunpack.c.l.bf16 %v6697_v16  ;;  %v5955_v16 = vld [vmem:[%s8554_s6 + $0x98] sm:$0xff]  }
 0x47a   : > { %v2170_v22 = vmul.f32 %v6175_v29, %v5474_v36 }
 0x47c   : > { %v2219_v15 = vpack.c.bf16 %v2170_v22, %v2169_v38  ;;  %v5940_v22 = vld [vmem:[%s8554_s6 + $0x40] sm:$0xff]  }
 0x47d   : > { %5505 = vmatprep.subr.bf16.mxu0 %v5940_v22 }
 0x47e   : > { %5821 = vmatprep.mubr.bf16.mxu1 %v2219_v15  ;;  %v5941_v15 = vld [vmem:[%s8554_s6 + $0xc0] sm:$0xff]  }
 0x47f   : > { %5617 = vmatprep.subr.bf16.mxu1 %v5941_v15  ;;  %v5956_v15 = vld [vmem:[%s8554_s6 + $0x60] sm:$0xff]  }
 0x49e   : > { %v5475_v55 = vpop.f32.mrb[124].mxu0 }
 0x49f   : > { %v5476_v39 = vpop.f32.mrb[125].mxu0 }
 0x4a0   : > { %v5477_v44 = vadd.f32 %v5476_v39, %v5475_v55  ;;  %v5478_v19 = vpop.f32.mrb[126].mxu0  ;;  %v6698_v39 = vld [vmem:[%s6794_s18 + $0x30] sm:$0xff]  }
 0x4a1   : > { %v5479_v50 = vpop.f32.mrb[127].mxu0 }
 0x4a2   : > { %v5480_v32 = vadd.f32 %v5479_v50, %v5478_v19  ;;  %v2171_v34 = vmul.f32 %v6179_v12, %v5477_v44  ;;  %v2185_v44 = vunpack.c.l.bf16 %v6698_v39  ;;  %v2186_v19 = vunpack.c.h.bf16 %v6698_v39  ;;  %v5959_v39 = vld [vmem:[%s8554_s6 + $0xa0] sm:$0xff]  }
 0x4a4   : > { %v2172_v37 = vmul.f32 %v6177_v59, %v5480_v32 }
 0x4a6   : > { %v2220_v17 = vpack.c.bf16 %v2172_v37, %v2171_v34  ;;  %v6699_v37 = vld [vmem:[%s6794_s18 + $0x38] sm:$0xff]  }
 0x4a8   : > { %5822 = vmatmul.mubr.bf16.gmra.mrb[124].mxu1 %v2220_v17  ;;  %v2188_v17 = vunpack.c.h.bf16 %v6699_v37 }
 0x4a9   : > { %2911 = vmatprep.mubr.bf16.mxu1 %v8647_v0 }
 0x4bc   : > { %v5795_v56 = vpop.f32.mrb[96].mxu1 }
 0x4bd   : > { %v2319_v3 = vpop.f32.mrb[97].mxu1  ;;  %v7677_v60 = vadd.f32 %v5795_v56, %v2175_v47  ;;  %v6700_v47 = vld [vmem:[%s6794_s18 + $0x40] sm:$0xff]  }
 0x4be   : > { %v5796_v14 = vpop.f32.mrb[98].mxu1  ;;  %v7666_v4 = vadd.f32 %v2319_v3, %v2173_v41  ;;  %v5945_v41 = vld [vmem:[%s8554_s6 + $0xc8] sm:$0xff]  }
 0x4bf   : > { %v2322_v53 = vpop.f32.mrb[99].mxu1  ;;  %v7675_v42 = vadd.f32 %v5796_v14, %v2176_v23  ;;  %8651 = vst [vmem:[#allocation5_spill] sm:$0xff] %v7677_v60  ;;  %v5946_v3 = vld [vmem:[%s8554_s6 + $0x8] sm:$0xff]  }
 0x4c0   : > { %8648 = vst [vmem:[#allocation2_spill] sm:$0xff] %v7666_v4  ;;  %v7668_v63 = vadd.f32 %v2322_v53, %v2174_v27  ;;  %v2187_v27 = vunpack.c.l.bf16 %v6699_v37  ;;  %v5947_v14 = vld [vmem:[%s8554_s6 + $0x88] sm:$0xff]  }
 0x4c1   : > { %8650 = vst [vmem:[#allocation4_spill] sm:$0xff] %v7675_v42  ;;  %v2479_v25 = vpack.c.bf16 %v7675_v42, %v7677_v60  ;;  %v5961_v37 = vld [vmem:[%s8554_s6 + $0xe8] sm:$0xff]  }
 0x4c2   : > { %8649 = vst [vmem:[#allocation3_spill] sm:$0xff] %v7668_v63  ;;  %v2478_v11 = vpack.c.bf16 %v7668_v63, %v7666_v4 }
 0x4c4   : > { %2719 = vmatmul.mubr.bf16.vlgmr.msra.gmra.mrb[128].mxu0 %v2478_v11  ;;  %2912 = vmatmul.mubr.bf16.vlgmr.msra.gmra.mrb[128].mxu1 %v2478_v11 }
 0x4c5   : > { %2728 = vmatprep.mubr.bf16.mxu0 %v8647_v0  ;;  %2921 = vmatprep.mubr.bf16.mxu1 %v8647_v0 }
 0x4c6   : > { %5506 = vmatpush3.bf16.msra.mxu0 %v5942_v20  ;;  %5618 = vmatpush3.bf16.msra.mxu1 %v5943_v52  ;;  %v5957_v20 = vld [vmem:[%s8554_s6 + $0xe0] sm:$0xff]  }
 0x4c7   : > { %5507 = vmatprep.subr.bf16.mxu0 %v5944_v30  ;;  %5619 = vmatprep.subr.bf16.mxu1 %v5945_v41  ;;  %v6703_v30 = vld [vmem:[%s6794_s18 + $0x58] sm:$0xff]  }
 0x4c8   : > { %v2196_v41 = vunpack.c.h.bf16 %v6703_v30 }
 0x4ca   : > { %5508 = vmatpush3.bf16.msra.mxu0 %v5946_v3  ;;  %5620 = vmatpush3.bf16.msra.mxu1 %v5947_v14  ;;  %v2195_v3 = vunpack.c.l.bf16 %v6703_v30 }
 0x4cc   : > { %v5799_v48 = vpop.f32.mrb[100].mxu1  ;;  %2729 = vmatmul.mubr.bf16.gmra.mrb[132].mxu0 %v2479_v25  ;;  %2922 = vmatmul.mubr.bf16.gmra.mrb[132].mxu1 %v2479_v25  ;;  %v2189_v25 = vunpack.c.l.bf16 %v6700_v47 }
 0x4cd   : > { %v2335_v61 = vpop.f32.mrb[101].mxu1  ;;  %2738 = vmatprep.mubr.bf16.mxu0 %v8647_v0  ;;  %2931 = vmatprep.mubr.bf16.mxu1 %v8647_v0  ;;  %v7695_v40 = vadd.f32 %v5799_v48, %v2179_v9  ;;  %v2190_v48 = vunpack.c.h.bf16 %v6700_v47  ;;  %v5948_v9 = vld [vmem:[%s8554_s6 + $0x50] sm:$0xff]  }
 0x4ce   : > { %v5800_v62 = vpop.f32.mrb[102].mxu1  ;;  %v7684_v49 = vadd.f32 %v2335_v61, %v2177_v18  ;;  %5509 = vmatprep.subr.bf16.mxu0 %v5948_v9  ;;  %v5965_v9 = vld [vmem:[%s8554_s6 + $0xf0] sm:$0xff]  }
 0x4cf   : > { %v2338_v6 = vpop.f32.mrb[103].mxu1  ;;  %v7693_v58 = vadd.f32 %v5800_v62, %v2180_v7  ;;  %8655 = vst [vmem:[#allocation9_spill] sm:$0xff] %v7695_v40 }
 0x4d0   : > { %8652 = vst [vmem:[#allocation6_spill] sm:$0xff] %v7684_v49  ;;  %v7686_v8 = vadd.f32 %v2338_v6, %v2178_v28  ;;  %v6701_v6 = vld [vmem:[%s6794_s18 + $0x48] sm:$0xff]  }
 0x4d1   : > { %8654 = vst [vmem:[#allocation8_spill] sm:$0xff] %v7693_v58  ;;  %v2481_v45 = vpack.c.bf16 %v7693_v58, %v7695_v40  ;;  %v2192_v24 = vunpack.c.h.bf16 %v6701_v6 }
 0x4d2   : > { %8653 = vst [vmem:[#allocation7_spill] sm:$0xff] %v7686_v8  ;;  %v2480_v2 = vpack.c.bf16 %v7686_v8, %v7684_v49 }
 0x4d4   : > { %2739 = vmatmul.mubr.bf16.gmra.mrb[136].mxu0 %v2480_v2  ;;  %2932 = vmatmul.mubr.bf16.gmra.mrb[136].mxu1 %v2480_v2  ;;  %v2191_v2 = vunpack.c.l.bf16 %v6701_v6 }
 0x4d5   : > { %2748 = vmatprep.mubr.bf16.mxu0 %v8647_v0  ;;  %2941 = vmatprep.mubr.bf16.mxu1 %v8647_v0 }
 0x4dc   : > { %v5803_v5 = vpop.f32.mrb[104].mxu1  ;;  %2749 = vmatmul.mubr.bf16.gmra.mrb[140].mxu0 %v2481_v45  ;;  %2942 = vmatmul.mubr.bf16.gmra.mrb[140].mxu1 %v2481_v45  ;;  %v5949_v45 = vld [vmem:[%s8554_s6 + $0xd0] sm:$0xff]  }
 0x4dd   : > { %v2351_v10 = vpop.f32.mrb[105].mxu1  ;;  %2758 = vmatprep.mubr.bf16.mxu0 %v8647_v0  ;;  %2951 = vmatprep.mubr.bf16.mxu1 %v8647_v0  ;;  %v7713_v29 = vadd.f32 %v5803_v5, %v2183_v57  ;;  %v5950_v5 = vld [vmem:[%s8554_s6 + $0x10] sm:$0xff]  }
 0x4de   : > { %v5804_v33 = vpop.f32.mrb[106].mxu1  ;;  %v7702_v1 = vadd.f32 %v2351_v10, %v2181_v35  ;;  %5621 = vmatprep.subr.bf16.mxu1 %v5949_v45  ;;  %5510 = vmatpush3.bf16.msra.mxu0 %v5950_v5  ;;  %v5952_v10 = vld [vmem:[%s8554_s6 + $0x58] sm:$0xff]   ;;  %v6702_v57 = vld [vmem:[%s6794_s18 + $0x50] sm:$0xff]   ;;  %v6705_v45 = vld [vmem:[%s6794_s18 + $0x68] sm:$0xff]  }
 0x4df   : > { %v2354_v46 = vpop.f32.mrb[107].mxu1  ;;  %v7711_v36 = vadd.f32 %v5804_v33, %v2184_v13  ;;  %8659 = vst [vmem:[#allocation13_spill] sm:$0xff] %v7713_v29  ;;  %5622 = vmatpush3.bf16.msra.mxu1 %v5951_v21  ;;  %v5953_v33 = vld [vmem:[%s8554_s6 + $0xd8] sm:$0xff]   ;;  %5511 = vmatprep.subr.bf16.mxu0 %v5952_v10  ;;  %v2194_v22 = vunpack.c.h.bf16 %v6702_v57  ;;  %v2200_v5 = vunpack.c.h.bf16 %v6705_v45  ;;  %v5966_v10 = vld [vmem:[%s8554_s6 + $0x30] sm:$0xff]  }
 0x4e0   : > { %8656 = vst [vmem:[#allocation10_spill] sm:$0xff] %v7702_v1  ;;  %v7704_v43 = vadd.f32 %v2354_v46, %v2182_v54  ;;  %v5954_v46 = vld [vmem:[%s8554_s6 + $0x18] sm:$0xff]   ;;  %5623 = vmatprep.subr.bf16.mxu1 %v5953_v33  ;;  %v5967_v33 = vld [vmem:[%s8554_s6 + $0xb0] sm:$0xff]  }
 0x4e1   : > { %8658 = vst [vmem:[#allocation12_spill] sm:$0xff] %v7711_v36  ;;  %v2483_v38 = vpack.c.bf16 %v7711_v36, %v7713_v29 }
 0x4e2   : > { %8657 = vst [vmem:[#allocation11_spill] sm:$0xff] %v7704_v43  ;;  %v2482_v31 = vpack.c.bf16 %v7704_v43, %v7702_v1  ;;  %5512 = vmatpush3.bf16.msra.mxu0 %v5954_v46  ;;  %v2199_v46 = vunpack.c.l.bf16 %v6705_v45 }
 0x4e3   : > { %5624 = vmatpush3.bf16.msra.mxu1 %v5955_v16  ;;  %5513 = vmatprep.subr.bf16.mxu0 %v5956_v15  ;;  %v5968_v16 = vld [vmem:[%s8554_s6 + $0x78] sm:$0xff]  }
 0x4e4   : > { %2759 = vmatmul.mubr.bf16.gmra.mrb[144].mxu0 %v2482_v31  ;;  %2952 = vmatmul.mubr.bf16.gmra.mrb[144].mxu1 %v2482_v31 }
 0x4e5   : > { %2768 = vmatprep.mubr.bf16.mxu0 %v8647_v0  ;;  %2961 = vmatprep.mubr.bf16.mxu1 %v8647_v0 }
 0x4e6   : > { %5625 = vmatprep.subr.bf16.mxu1 %v5957_v20 }
 0x4e7   : > { %5626 = vmatpush3.bf16.msra.mxu1 %v5959_v39 }
 0x4e8   : > { %5627 = vmatprep.subr.bf16.mxu1 %v5961_v37 }
 0x4ec   : > { %2769 = vmatmul.mubr.bf16.gmra.mrb[148].mxu0 %v2483_v38  ;;  %2962 = vmatmul.mubr.bf16.gmra.mrb[148].mxu1 %v2483_v38  ;;  %v2193_v38 = vunpack.c.l.bf16 %v6702_v57  ;;  %v5970_v57 = vld [vmem:[%s8554_s6 + $0x38] sm:$0xff]  }
 0x4ed   : > { %2778 = vmatprep.mubr.bf16.mxu0 %v8647_v0  ;;  %2971 = vmatprep.mubr.bf16.mxu1 %v8647_v0 }
 0x519   : > { %v5807_v55 = vpop.f32.mrb[108].mxu1 }
 0x51a   : > { %v2367_v50 = vpop.f32.mrb[109].mxu1  ;;  %v7755_v26 = vadd.f32 %v5807_v55, %v2187_v27  ;;  %v5958_v55 = vld [vmem:[%s8554_s6 + $0x20] sm:$0xff]  }
 0x51b   : > { %v5808_v59 = vpop.f32.mrb[110].mxu1  ;;  %v7732_v12 = vadd.f32 %v2367_v50, %v2185_v44  ;;  %5514 = vmatpush3.bf16.msra.mxu0 %v5958_v55 }
 0x51c   : > { %v2370_v32 = vpop.f32.mrb[111].mxu1  ;;  %v7753_v53 = vadd.f32 %v5808_v59, %v2188_v17  ;;  %8663 = vst [vmem:[#allocation17_spill] sm:$0xff] %v7755_v26  ;;  %v5962_v17 = vld [vmem:[%s8554_s6 + $0x28] sm:$0xff]  }
 0x51d   : > { %8660 = vst [vmem:[#allocation14_spill] sm:$0xff] %v7732_v12  ;;  %v7734_v34 = vadd.f32 %v2370_v32, %v2186_v19  ;;  %v5960_v32 = vld [vmem:[%s8554_s6 + $0x68] sm:$0xff]  }
 0x51e   : > { %8662 = vst [vmem:[#allocation16_spill] sm:$0xff] %v7753_v53  ;;  %v2485_v23 = vpack.c.bf16 %v7753_v53, %v7755_v26  ;;  %5515 = vmatprep.subr.bf16.mxu0 %v5960_v32 }
 0x51f   : > { %8661 = vst [vmem:[#allocation15_spill] sm:$0xff] %v7734_v34  ;;  %v2484_v56 = vpack.c.bf16 %v7734_v34, %v7732_v12  ;;  %5516 = vmatpush3.bf16.msra.mxu0 %v5962_v17 }
 0x521   : > { %2779 = vmatmul.mubr.bf16.gmra.mrb[152].mxu0 %v2484_v56  ;;  %2972 = vmatmul.mubr.bf16.gmra.mrb[152].mxu1 %v2484_v56  ;;  %v5963_v56 = vld [vmem:[%s8554_s6 + $0xa8] sm:$0xff]  }
 0x522   : > { %2788 = vmatprep.mubr.bf16.mxu0 %v8647_v0  ;;  %2981 = vmatprep.mubr.bf16.mxu1 %v8647_v0 }
 0x523   : > { %5628 = vmatpush3.bf16.msra.mxu1 %v5963_v56  ;;  %v6707_v56 = vld [vmem:[%s6794_s18 + $0x78] sm:$0xff]  }
 0x524   : > { %5629 = vmatprep.subr.bf16.mxu1 %v5965_v9  ;;  %v2204_v30 = vunpack.c.h.bf16 %v6707_v56 }
 0x527   : > { %5630 = vmatpush3.bf16.msra.mxu1 %v5967_v33 }
 0x529   : > { %v5811_v11 = vpop.f32.mrb[112].mxu1  ;;  %2789 = vmatmul.mubr.bf16.gmra.mrb[156].mxu0 %v2485_v23  ;;  %2982 = vmatmul.mubr.bf16.gmra.mrb[156].mxu1 %v2485_v23 }
 0x52a   : > { %v2383_v51 = vpop.f32.mrb[113].mxu1  ;;  %2798 = vmatprep.mubr.bf16.mxu0 %v8647_v0  ;;  %2991 = vmatprep.mubr.bf16.mxu1 %v8647_v0  ;;  %v7785_v54 = vadd.f32 %v5811_v11, %v2191_v2  ;;  %v5964_v2 = vld [vmem:[%s8554_s6 + $0x70] sm:$0xff]  }
 0x52b   : > { %v5812_v18 = vpop.f32.mrb[114].mxu1  ;;  %v7762_v61 = vadd.f32 %v2383_v51, %v2189_v25  ;;  %v6704_v25 = vld [vmem:[%s6794_s18 + $0x60] sm:$0xff]   ;;  %5517 = vmatprep.subr.bf16.mxu0 %v5964_v2 }
 0x52c   : > { %v2386_v28 = vpop.f32.mrb[115].mxu1  ;;  %v7783_v35 = vadd.f32 %v5812_v18, %v2192_v24  ;;  %8667 = vst [vmem:[#allocation21_spill] sm:$0xff] %v7785_v54  ;;  %v2198_v51 = vunpack.c.h.bf16 %v6704_v25  ;;  %5518 = vmatpush3.bf16.msra.mxu0 %v5966_v10 }
 0x52d   : > { %8664 = vst [vmem:[#allocation18_spill] sm:$0xff] %v7762_v61  ;;  %v7764_v62 = vadd.f32 %v2386_v28, %v2190_v48  ;;  %v2197_v48 = vunpack.c.l.bf16 %v6704_v25  ;;  %5519 = vmatprep.subr.bf16.mxu0 %v5968_v16 }
 0x52e   : > { %8666 = vst [vmem:[#allocation20_spill] sm:$0xff] %v7783_v35  ;;  %v2487_v13 = vpack.c.bf16 %v7783_v35, %v7785_v54 }
 0x52f   : > { %8665 = vst [vmem:[#allocation19_spill] sm:$0xff] %v7764_v62  ;;  %v2486_v7 = vpack.c.bf16 %v7764_v62, %v7762_v61 }
 0x530   : > { %5520 = vmatpush3.bf16.msra.mxu0 %v5970_v57 }
 0x531   : > { %2799 = vmatmul.mubr.bf16.gmra.mrb[160].mxu0 %v2486_v7  ;;  %2992 = vmatmul.mubr.bf16.gmra.mrb[160].mxu1 %v2486_v7 }
 0x532   : > { %2808 = vmatprep.mubr.bf16.mxu0 %v8647_v0  ;;  %3001 = vmatprep.mubr.bf16.mxu1 %v8647_v0 }
 0x539   : > { %v5815_v31 = vpop.f32.mrb[116].mxu1  ;;  %2809 = vmatmul.mubr.bf16.gmra.mrb[164].mxu0 %v2487_v13  ;;  %3002 = vmatmul.mubr.bf16.gmra.mrb[164].mxu1 %v2487_v13  ;;  %v5969_v13 = vld [vmem:[%s8554_s6 + $0xf8] sm:$0xff]  }
 0x53a   : > { %v2399_v52 = vpop.f32.mrb[117].mxu1  ;;  %2818 = vmatprep.mubr.bf16.mxu0 %v8647_v0  ;;  %3011 = vmatprep.mubr.bf16.mxu1 %v8647_v0  ;;  %v7839_v23 = vadd.f32 %v5815_v31, %v2195_v3 }
 0x53b   : > { %v5816_v44 = vpop.f32.mrb[118].mxu1  ;;  %v7816_v50 = vadd.f32 %v2399_v52, %v2193_v38  ;;  %v5971_v38 = vld [vmem:[%s8554_s6 + $0xb8] sm:$0xff]   ;;  %5631 = vmatprep.subr.bf16.mxu1 %v5969_v13  ;;  %v6706_v52 = vld [vmem:[%s6794_s18 + $0x70] sm:$0xff]  }
 0x53c   : > { %v2402_v19 = vpop.f32.mrb[119].mxu1  ;;  %v7837_v14 = vadd.f32 %v5816_v44, %v2196_v41  ;;  %8671 = vst [vmem:[#allocation25_spill] sm:$0xff] %v7839_v23  ;;  %5632 = vmatpush3.bf16.msra.mxu1 %v5971_v38  ;;  %v2201_v55 = vunpack.c.l.bf16 %v6706_v52  ;;  %v2202_v39 = vunpack.c.h.bf16 %v6706_v52 }
 0x53d   : > { %8668 = vst [vmem:[#allocation22_spill] sm:$0xff] %v7816_v50  ;;  %v7818_v59 = vadd.f32 %v2402_v19, %v2194_v22 }
 0x53e   : > { %8670 = vst [vmem:[#allocation24_spill] sm:$0xff] %v7837_v14  ;;  %v2489_v11 = vpack.c.bf16 %v7837_v14, %v7839_v23 }
 0x53f   : > { %8669 = vst [vmem:[#allocation23_spill] sm:$0xff] %v7818_v59  ;;  %v2488_v27 = vpack.c.bf16 %v7818_v59, %v7816_v50 }
 0x541   : > { %2819 = vmatmul.mubr.bf16.gmra.mrb[168].mxu0 %v2488_v27  ;;  %3012 = vmatmul.mubr.bf16.gmra.mrb[168].mxu1 %v2488_v27  ;;  %v2203_v27 = vunpack.c.l.bf16 %v6707_v56 }
 0x542   : > { %2828 = vmatprep.mubr.bf16.mxu0 %v8647_v0  ;;  %3021 = vmatprep.mubr.bf16.mxu1 %v8647_v0 }
 0x549   : > { %v5819_v47 = vpop.f32.mrb[120].mxu1  ;;  %2829 = vmatmul.mubr.bf16.gmra.mrb[172].mxu0 %v2489_v11  ;;  %3022 = vmatmul.mubr.bf16.gmra.mrb[172].mxu1 %v2489_v11 }
 0x54a   : > { %v2415_v18 = vpop.f32.mrb[121].mxu1  ;;  %2838 = vmatprep.mubr.bf16.mxu0 %v8647_v0  ;;  %3031 = vmatprep.mubr.bf16.mxu1 %v8647_v0  ;;  %v7881_v22 = vadd.f32 %v5819_v47, %v2199_v46 }
 0x54b   : > { %v5820_v28 = vpop.f32.mrb[122].mxu1  ;;  %v7846_v24 = vadd.f32 %v2415_v18, %v2197_v48 }
 0x54c   : > { %v2418_v6 = vpop.f32.mrb[123].mxu1  ;;  %v7873_v31 = vadd.f32 %v5820_v28, %v2200_v5  ;;  %8675 = vst [vmem:[#allocation29_spill] sm:$0xff] %v7881_v22 }
 0x54d   : > { %8672 = vst [vmem:[#allocation26_spill] sm:$0xff] %v7846_v24  ;;  %v7848_v7 = vadd.f32 %v2418_v6, %v2198_v51 }
 0x54e   : > { %8674 = vst [vmem:[#allocation28_spill] sm:$0xff] %v7873_v31  ;;  %v2491_v15 = vpack.c.bf16 %v7873_v31, %v7881_v22 }
 0x54f   : > { %8673 = vst [vmem:[#allocation27_spill] sm:$0xff] %v7848_v7  ;;  %v2490_v21 = vpack.c.bf16 %v7848_v7, %v7846_v24 }
 0x551   : > { %2839 = vmatmul.mubr.bf16.gmra.mrb[176].mxu0 %v2490_v21  ;;  %3032 = vmatmul.mubr.bf16.gmra.mrb[176].mxu1 %v2490_v21 }
 0x552   : > { %2848 = vmatprep.mubr.bf16.mxu0 %v8647_v0  ;;  %3041 = vmatprep.mubr.bf16.mxu1 %v8647_v0 }
 0x559   : > { %2849 = vmatmul.mubr.bf16.gmra.mrb[180].mxu0 %v2491_v15  ;;  %3042 = vmatmul.mubr.bf16.gmra.mrb[180].mxu1 %v2491_v15 }
 0x55a   : > { %2858 = vmatprep.mubr.bf16.mxu0 %v8647_v0  ;;  %3051 = vmatprep.mubr.bf16.mxu1 %v8647_v0 }
 0x57b   : > { %v5823_v20 = vpop.f32.mrb[124].mxu1 }
 0x57c   : > { %v2431_v44 = vpop.f32.mrb[125].mxu1  ;;  %v7899_v11 = vadd.f32 %v5823_v20, %v2203_v27 }
 0x57d   : > { %v5824_v19 = vpop.f32.mrb[126].mxu1  ;;  %v7888_v37 = vadd.f32 %v2431_v44, %v2201_v55 }
 0x57e   : > { %v2434_v32 = vpop.f32.mrb[127].mxu1  ;;  %v7897_v3 = vadd.f32 %v5824_v19, %v2204_v30  ;;  %8679 = vst [vmem:[#allocation33_spill] sm:$0xff] %v7899_v11 }
 0x57f   : > { %8676 = vst [vmem:[#allocation30_spill] sm:$0xff] %v7888_v37  ;;  %v7890_v17 = vadd.f32 %v2434_v32, %v2202_v39 }
 0x580   : > { %8678 = vst [vmem:[#allocation32_spill] sm:$0xff] %v7897_v3  ;;  %v2493_v47 = vpack.c.bf16 %v7897_v3, %v7899_v11 }
 0x581   : > { %8677 = vst [vmem:[#allocation31_spill] sm:$0xff] %v7890_v17  ;;  %v2492_v41 = vpack.c.bf16 %v7890_v17, %v7888_v37 }
 0x583   : > { %2859 = vmatmul.mubr.bf16.gmra.mrb[184].mxu0 %v2492_v41  ;;  %3052 = vmatmul.mubr.bf16.gmra.mrb[184].mxu1 %v2492_v41 }
 0x584   : > { %2868 = vmatprep.mubr.bf16.mxu0 %v8647_v0  ;;  %3061 = vmatprep.mubr.bf16.mxu1 %v8647_v0 }
 0x58b   : > { %2869 = vmatmul.mubr.bf16.gmra.mrb[188].mxu0 %v2493_v47  ;;  %3062 = vmatmul.mubr.bf16.gmra.mrb[188].mxu1 %v2493_v47 }
 0x597   : > { %v7903_v25 = vpop.f32.mrb[128].mxu0  ;;  %v7905_v48 = vpop.f32.mrb[128].mxu1 }
 0x598   : > { %v4973_v51 = vmul.f32 -1.442695, %v7903_v25  ;;  %v4975_v18 = vmul.f32 -1.442695, %v7905_v48  ;;  %v7909_v28 = vpop.f32.mrb[129].mxu0  ;;  %v7911_v0 = vpop.f32.mrb[129].mxu1 }
 0x599   : > { %v4974_v6 = vmul.f32 -1.442695, %v7909_v28  ;;  %v4976_v2 = vmul.f32 -1.442695, %v7911_v0  ;;  %v7915_v9 = vpop.f32.mrb[130].mxu0  ;;  %v7917_v45 = vpop.f32.mrb[130].mxu1 }
 0x59a   : > { %6180 = vpow2.f32 %v4973_v51  ;;  %v4977_v5 = vmul.f32 -1.442695, %v7915_v9  ;;  %v7920_v21 = vpop.f32.mrb[131].mxu0  ;;  %v7922_v10 = vpop.f32.mrb[131].mxu1  ;;  %v4979_v33 = vmul.f32 -1.442695, %v7917_v45 }
 0x59b   : > { %6182 = vpow2.f32 %v4975_v18  ;;  %v4978_v46 = vmul.f32 -1.442695, %v7920_v21  ;;  %v4980_v16 = vmul.f32 -1.442695, %v7922_v10 }
 0x59c   : > { %6184 = vpow2.f32 %v4974_v6 }
 0x59d   : > { %6186 = vpow2.f32 %v4976_v2 }
 0x59e   : > { %6188 = vpow2.f32 %v4977_v5 }
 0x59f   : > { %6190 = vpow2.f32 %v4979_v33  ;;  %v7927_v13 = vpop.f32.mrb[132].mxu0  ;;  %v7929_v57 = vpop.f32.mrb[132].mxu1 }
 0x5a0   : > { %6192 = vpow2.f32 %v4978_v46  ;;  %v4981_v38 = vmul.f32 -1.442695, %v7927_v13  ;;  %v4983_v15 = vmul.f32 -1.442695, %v7929_v57  ;;  %v7933_v20 = vpop.f32.mrb[133].mxu0  ;;  %v7935_v52 = vpop.f32.mrb[133].mxu1 }
 0x5a1   : > { %6194 = vpow2.f32 %v4980_v16  ;;  %v4982_v55 = vmul.f32 -1.442695, %v7933_v20  ;;  %v4984_v39 = vmul.f32 -1.442695, %v7935_v52  ;;  %v7939_v44 = vpop.f32.mrb[134].mxu0  ;;  %v7941_v19 = vpop.f32.mrb[134].mxu1 }
 0x5a2   : > { %6196 = vpow2.f32 %v4981_v38  ;;  %v4985_v32 = vmul.f32 -1.442695, %v7939_v44  ;;  %v7944_v56 = vpop.f32.mrb[135].mxu0  ;;  %v7946_v30 = vpop.f32.mrb[135].mxu1  ;;  %v4987_v24 = vmul.f32 -1.442695, %v7941_v19 }
 0x5a3   : > { %6198 = vpow2.f32 %v4983_v15 }
 0x5a4   : > { %v6181_v41 = vpop.eup %6180  ;;  %6200 = vpow2.f32 %v4982_v55 }
 0x5a5   : > { %v6183_v27 = vpop.eup %6182  ;;  %v3456_v47 = vadd.f32 1.0, %v6181_v41  ;;  %6202 = vpow2.f32 %v4984_v39 }
 0x5a6   : > { %v6185_v51 = vpop.eup %6184  ;;  %v3458_v18 = vadd.f32 1.0, %v6183_v27  ;;  %6204 = vpow2.f32 %v4985_v32 }
 0x5a7   : > { %v6187_v6 = vpop.eup %6186  ;;  %6206 = vrcp.f32 %v3456_v47  ;;  %v3457_v2 = vadd.f32 1.0, %v6185_v51  ;;  %v7948_v5 = vpop.f32.mrb[136].mxu0 }
 0x5a8   : > { %v7950_v33 = vpop.f32.mrb[136].mxu1  ;;  %v6189_v46 = vpop.eup %6188  ;;  %6208 = vrcp.f32 %v3458_v18  ;;  %v3459_v16 = vadd.f32 1.0, %v6187_v6  ;;  %v4989_v23 = vmul.f32 -1.442695, %v7948_v5 }
 0x5a9   : > { %v7952_v38 = vpop.f32.mrb[137].mxu0  ;;  %v6191_v15 = vpop.eup %6190  ;;  %6210 = vrcp.f32 %v3457_v2  ;;  %v3460_v55 = vadd.f32 1.0, %v6189_v46  ;;  %v4991_v59 = vmul.f32 -1.442695, %v7950_v33 }
 0x5aa   : > { %v7954_v41 = vpop.f32.mrb[137].mxu1  ;;  %v7956_v39 = vpop.f32.mrb[138].mxu0  ;;  %6212 = vrcp.f32 %v3459_v16  ;;  %v3462_v27 = vadd.f32 1.0, %v6191_v15 }
 0x5ab   : > { %v6193_v32 = vpop.eup %6192  ;;  %v7958_v47 = vpop.f32.mrb[138].mxu1  ;;  %6214 = vrcp.f32 %v3460_v55  ;;  %v4992_v35 = vmul.f32 -1.442695, %v7954_v41  ;;  %v4993_v54 = vmul.f32 -1.442695, %v7956_v39 }
 0x5ac   : > { %v6195_v51 = vpop.eup %6194  ;;  %v3461_v3 = vadd.f32 1.0, %v6193_v32  ;;  %v7960_v11 = vpop.f32.mrb[139].mxu0  ;;  %6216 = vrcp.f32 %v3462_v27  ;;  %v4995_v53 = vmul.f32 -1.442695, %v7958_v47 }
 0x5ad   : > { %v7962_v18 = vpop.f32.mrb[139].mxu1  ;;  %v6197_v6 = vpop.eup %6196  ;;  %v3463_v2 = vadd.f32 1.0, %v6195_v51 }
 0x5ae   : > { %v6199_v46 = vpop.eup %6198  ;;  %6218 = vrcp.f32 %v3461_v3  ;;  %v3464_v17 = vadd.f32 1.0, %v6197_v6  ;;  %v4986_v6 = vmul.f32 -1.442695, %v7944_v56 }
 0x5af   : > { %v6201_v37 = vpop.eup %6200  ;;  %6220 = vrcp.f32 %v3463_v2  ;;  %v3466_v31 = vadd.f32 1.0, %v6199_v46  ;;  %v7964_v22 = vpop.f32.mrb[140].mxu0  ;;  %v4988_v46 = vmul.f32 -1.442695, %v7946_v30 }
 0x5b0   : > { %v6203_v16 = vpop.eup %6202  ;;  %6222 = vrcp.f32 %v3464_v17  ;;  %v3465_v15 = vadd.f32 1.0, %v6201_v37  ;;  %v7966_v55 = vpop.f32.mrb[140].mxu1 }
 0x5b1   : > { %v6205_v32 = vpop.eup %6204  ;;  %6224 = vrcp.f32 %v3466_v31  ;;  %v3467_v7 = vadd.f32 1.0, %v6203_v16  ;;  %v7969_v27 = vpop.f32.mrb[141].mxu0 }
 0x5b2   : > { %v6207_v51 = vpop.eup %6206  ;;  %6226 = vrcp.f32 %v3465_v15  ;;  %v3468_v3 = vadd.f32 1.0, %v6205_v32  ;;  %v7972_v2 = vpop.f32.mrb[141].mxu1 }
 0x5b3   : > { %v7974_v17 = vpop.f32.mrb[142].mxu0  ;;  %v6209_v37 = vpop.eup %6208  ;;  %6228 = vrcp.f32 %v3467_v7  ;;  %v4990_v7 = vmul.f32 -1.442695, %v7952_v38  ;;  %v3840_v61 = vmul.f32 %v6207_v51, %v7903_v25 }
 0x5b4   : > { %v7977_v14 = vpop.f32.mrb[142].mxu1  ;;  %v7979_v31 = vpop.f32.mrb[143].mxu0  ;;  %6230 = vrcp.f32 %v3468_v3 }
 0x5b5   : > { %v6211_v16 = vpop.eup %6210  ;;  %v7982_v15 = vpop.f32.mrb[143].mxu1  ;;  %6232 = vpow2.f32 %v4987_v24  ;;  %v3842_v24 = vmul.f32 %v6209_v37, %v7905_v48 }
 0x5b6   : > { %v6213_v32 = vpop.eup %6212  ;;  %6234 = vpow2.f32 %v4986_v6  ;;  %v4994_v6 = vmul.f32 -1.442695, %v7960_v11  ;;  %v3841_v25 = vmul.f32 %v6211_v16, %v7909_v28 }
 0x5b7   : > { %v6215_v50 = vpop.eup %6214  ;;  %6236 = vpow2.f32 %v4988_v46  ;;  %v7994_v12 = vpop.f32.mrb[144].mxu0 }
 0x5b8   : > { %v6217_v62 = vpop.eup %6216  ;;  %v3844_v3 = vmul.f32 %v6215_v50, %v7915_v9  ;;  %6238 = vpow2.f32 %v4989_v23  ;;  %v7996_v36 = vpop.f32.mrb[144].mxu1 }
 0x5b9   : > { %v6219_v26 = vpop.eup %6218  ;;  %v3846_v34 = vmul.f32 %v6217_v62, %v7917_v45  ;;  %6240 = vpow2.f32 %v4991_v59  ;;  %v8000_v9 = vpop.f32.mrb[145].mxu0  ;;  %v3843_v62 = vmul.f32 %v6213_v32, %v7911_v0 }
 0x5ba   : > { %v6221_v29 = vpop.eup %6220  ;;  %v3968_v51 = vpack.c.bf16 %v3844_v3, %v3840_v61  ;;  %v3845_v50 = vmul.f32 %v6219_v26, %v7920_v21  ;;  %v8002_v46 = vpop.f32.mrb[145].mxu1  ;;  %6242 = vpow2.f32 %v4990_v7  ;;  %v4996_v26 = vmul.f32 -1.442695, %v7962_v18 }
 0x5bb   : > { %v6223_v48 = vpop.eup %6222  ;;  %v3970_v23 = vpack.c.bf16 %v3846_v34, %v3842_v24  ;;  %v3847_v45 = vmul.f32 %v6221_v29, %v7922_v10  ;;  %v8006_v37 = vpop.f32.mrb[146].mxu0  ;;  %6244 = vpow2.f32 %v4992_v35  ;;  %v4997_v29 = vmul.f32 -1.442695, %v7964_v22 }
 0x5bc   : > { %v8008_v43 = vpop.f32.mrb[146].mxu1  ;;  %v8010_v28 = vpop.eup %6224  ;;  %v3969_v61 = vpack.c.bf16 %v3845_v50, %v3841_v25  ;;  %6246 = vpow2.f32 %v4993_v54  ;;  %v4999_v10 = vmul.f32 -1.442695, %v7966_v55  ;;  %v8024_v7 = vmul.f32 %v6223_v48, %v7927_v13 }
 0x5bd   : > { %v8013_v59 = vpop.f32.mrb[147].mxu0  ;;  %v8015_v21 = vpop.f32.mrb[147].mxu1  ;;  %v3971_v34 = vpack.c.bf16 %v3847_v45, %v3843_v62  ;;  %6248 = vpow2.f32 %v4995_v53 }
 0x5be   : > { %v8017_v16 = vpop.eup %6226  ;;  %4320 = vmatprep.mubr.bf16.mxu0 %v3969_v61  ;;  %6250 = vpow2.f32 %v4994_v6 }
 0x5bf   : > { %v8020_v0 = vpop.eup %6228  ;;  %4481 = vmatprep.mubr.bf16.mxu1 %v3971_v34  ;;  %4321 = vmatmul.mubr.bf16.vlgmr.msra.gmra.mrb[192].mxu0 %v3968_v51  ;;  %6252 = vpow2.f32 %v4996_v26  ;;  %v8029_v53 = vpop.f32.mrb[148].mxu0 }
 0x5c0   : > { %v6231_v32 = vpop.eup %6230  ;;  %4482 = vmatmul.mubr.bf16.vlgmr.msra.gmra.mrb[192].mxu1 %v3970_v23  ;;  %6254 = vpow2.f32 %v4997_v29  ;;  %v8031_v25 = vpop.f32.mrb[148].mxu1 }
 0x5c1   : > { %v6233_v35 = vpop.eup %6232  ;;  %v8027_v3 = vmul.f32 %v6231_v32, %v7939_v44  ;;  %6256 = vpow2.f32 %v4999_v10  ;;  %v8035_v13 = vpop.f32.mrb[149].mxu0 }
 0x5c2   : > { %v6235_v54 = vpop.eup %6234  ;;  %v3470_v24 = vadd.f32 1.0, %v6233_v35  ;;  %v8037_v48 = vpop.f32.mrb[149].mxu1 }
 0x5c3   : > { %v6237_v50 = vpop.eup %6236  ;;  %v3469_v51 = vadd.f32 1.0, %v6235_v54  ;;  %v8039_v23 = vpop.f32.mrb[150].mxu0 }
 0x5c4   : > { %v6239_v44 = vpop.eup %6238  ;;  %6258 = vrcp.f32 %v3470_v24  ;;  %v3471_v62 = vadd.f32 1.0, %v6237_v50  ;;  %v8041_v26 = vpop.f32.mrb[150].mxu1 }
 0x5c5   : > { %v6241_v45 = vpop.eup %6240  ;;  %6260 = vrcp.f32 %v3469_v51  ;;  %v3472_v61 = vadd.f32 1.0, %v6239_v44  ;;  %v8043_v32 = vpop.f32.mrb[151].mxu0 }
 0x5c6   : > { %v6243_v34 = vpop.eup %6242  ;;  %6262 = vrcp.f32 %v3471_v62  ;;  %v3474_v29 = vadd.f32 1.0, %v6241_v45  ;;  %v8045_v10 = vpop.f32.mrb[151].mxu1 }
 0x5c7   : > { %v6245_v35 = vpop.eup %6244  ;;  %6264 = vrcp.f32 %v3472_v61  ;;  %v3473_v54 = vadd.f32 1.0, %v6243_v34  ;;  %v4998_v61 = vmul.f32 -1.442695, %v7969_v27 }
 0x5c8   : > { %v6247_v6 = vpop.eup %6246  ;;  %6266 = vrcp.f32 %v3474_v29  ;;  %v3475_v24 = vadd.f32 1.0, %v6245_v35  ;;  %v5000_v29 = vmul.f32 -1.442695, %v7972_v2 }
 0x5c9   : > { %v6249_v50 = vpop.eup %6248  ;;  %6268 = vrcp.f32 %v3473_v54  ;;  %v3476_v1 = vadd.f32 1.0, %v6247_v6  ;;  %v3850_v6 = vmul.f32 %v8010_v28, %v7929_v57 }
 0x5ca   : > { %v6251_v51 = vpop.eup %6250  ;;  %6270 = vrcp.f32 %v3475_v24  ;;  %v3478_v44 = vadd.f32 1.0, %v6249_v50  ;;  %v5003_v24 = vmul.f32 -1.442695, %v7977_v14  ;;  %v3849_v50 = vmul.f32 %v8017_v16, %v7933_v20 }
 0x5cb   : > { %v6253_v58 = vpop.eup %6252  ;;  %6272 = vrcp.f32 %v3476_v1  ;;  %v3477_v62 = vadd.f32 1.0, %v6251_v51  ;;  %v5001_v1 = vmul.f32 -1.442695, %v7974_v17  ;;  %v5007_v16 = vmul.f32 -1.442695, %v7996_v36 }
 0x5cc   : > { %v6255_v45 = vpop.eup %6254  ;;  %6274 = vrcp.f32 %v3478_v44  ;;  %v3479_v40 = vadd.f32 1.0, %v6253_v58 }
 0x5cd   : > { %v6257_v8 = vpop.eup %6256  ;;  %6276 = vrcp.f32 %v3477_v62  ;;  %v3480_v49 = vadd.f32 1.0, %v6255_v45  ;;  %v3851_v62 = vmul.f32 %v8020_v0, %v7935_v52  ;;  %v5009_v0 = vmul.f32 -1.442695, %v8006_v37 }
 0x5ce   : > { %v6259_v34 = vpop.eup %6258  ;;  %6278 = vrcp.f32 %v3479_v40  ;;  %v5002_v40 = vmul.f32 -1.442695, %v7979_v31 }
 0x5cf   : > { %v6261_v35 = vpop.eup %6260  ;;  %v3854_v54 = vmul.f32 %v6259_v34, %v7941_v19  ;;  %6280 = vrcp.f32 %v3480_v49  ;;  %v5004_v34 = vmul.f32 -1.442695, %v7982_v15  ;;  %v5005_v49 = vmul.f32 -1.442695, %v7994_v12 }
 0x5d0   : > { %v6263_v58 = vpop.eup %6262  ;;  %v3853_v51 = vmul.f32 %v6261_v35, %v7944_v56  ;;  %6282 = vpow2.f32 %v4998_v61  ;;  %v5011_v61 = vmul.f32 -1.442695, %v8008_v43 }
 0x5d1   : > { %v6265_v44 = vpop.eup %6264  ;;  %v3974_v57 = vpack.c.bf16 %v3854_v54, %v3850_v6  ;;  %v3855_v19 = vmul.f32 %v6263_v58, %v7946_v30  ;;  %6284 = vpow2.f32 %v5000_v29  ;;  %v5006_v30 = vmul.f32 -1.442695, %v8000_v9 }
 0x5d2   : > { %v6267_v28 = vpop.eup %6266  ;;  %v3973_v45 = vpack.c.bf16 %v3853_v51, %v3849_v50  ;;  %6286 = vpow2.f32 %v5001_v1  ;;  %v8680_v29 = vpack.c.bf16 %v8027_v3, %v8024_v7  ;;  %v3856_v6 = vmul.f32 %v6265_v44, %v7948_v5 }
 0x5d3   : > { %v6269_v42 = vpop.eup %6268  ;;  %v3975_v20 = vpack.c.bf16 %v3855_v19, %v3851_v62  ;;  %6288 = vpow2.f32 %v5003_v24  ;;  %v3482_v1 = vadd.f32 1.0, %v6257_v8  ;;  %v3858_v58 = vmul.f32 %v6267_v28, %v7950_v33 }
 0x5d4   : > { %v6271_v56 = vpop.eup %6270  ;;  %4328 = vmatprep.mubr.bf16.mxu0 %v3973_v45  ;;  %6290 = vpow2.f32 %v5002_v40  ;;  %v5010_v51 = vmul.f32 -1.442695, %v8013_v59  ;;  %v3857_v7 = vmul.f32 %v6269_v42, %v7952_v38 }
 0x5d5   : > { %v6273_v52 = vpop.eup %6272  ;;  %4489 = vmatprep.mubr.bf16.mxu1 %v3975_v20  ;;  %4329 = vmatmul.mubr.bf16.gmra.mrb[196].mxu0 %v8680_v29  ;;  %6292 = vpow2.f32 %v5004_v34  ;;  %v3859_v5 = vmul.f32 %v6271_v56, %v7954_v41 }
 0x5d6   : > { %v6275_v35 = vpop.eup %6274  ;;  %v3860_v54 = vmul.f32 %v6273_v52, %v7956_v39  ;;  %4490 = vmatmul.mubr.bf16.gmra.mrb[196].mxu1 %v3974_v57  ;;  %6294 = vpow2.f32 %v5005_v49  ;;  %v5008_v49 = vmul.f32 -1.442695, %v8002_v46 }
 0x5d7   : > { %v6277_v24 = vpop.eup %6276  ;;  %v3862_v50 = vmul.f32 %v6275_v35, %v7958_v47  ;;  %6296 = vpow2.f32 %v5007_v16 }
 0x5d8   : > { %v6279_v40 = vpop.eup %6278  ;;  %v3976_v3 = vpack.c.bf16 %v3860_v54, %v3856_v6  ;;  %v3861_v62 = vmul.f32 %v6277_v24, %v7960_v11  ;;  %6298 = vpow2.f32 %v5006_v30 }
 0x5d9   : > { %v3978_v8 = vpack.c.bf16 %v3862_v50, %v3858_v58  ;;  %v3863_v39 = vmul.f32 %v6279_v40, %v7962_v18  ;;  %v6281_v44 = vpop.eup %6280  ;;  %6300 = vrcp.f32 %v3482_v1  ;;  %v5012_v50 = vmul.f32 -1.442695, %v8015_v21 }
 0x5da   : > { %v3977_v33 = vpack.c.bf16 %v3861_v62, %v3857_v7  ;;  %v6283_v47 = vpop.eup %6282  ;;  %6302 = vpow2.f32 %v5009_v0  ;;  %v5013_v7 = vmul.f32 -1.442695, %v8029_v53  ;;  %v5015_v62 = vmul.f32 -1.442695, %v8031_v25 }
 0x5db   : > { %v3979_v57 = vpack.c.bf16 %v3863_v39, %v3859_v5  ;;  %v6285_v19 = vpop.eup %6284  ;;  %v3481_v28 = vadd.f32 1.0, %v6283_v47  ;;  %6304 = vpow2.f32 %v5011_v61  ;;  %v5016_v39 = vmul.f32 -1.442695, %v8037_v48 }
 0x5dc   : > { %4336 = vmatprep.mubr.bf16.mxu0 %v3977_v33  ;;  %v6287_v42 = vpop.eup %6286  ;;  %v3483_v38 = vadd.f32 1.0, %v6285_v19  ;;  %6306 = vpow2.f32 %v5010_v51  ;;  %v5017_v33 = vmul.f32 -1.442695, %v8039_v23 }
 0x5dd   : > { %4497 = vmatprep.mubr.bf16.mxu1 %v3979_v57  ;;  %4337 = vmatmul.mubr.bf16.gmra.mrb[200].mxu0 %v3976_v3  ;;  %v6289_v11 = vpop.eup %6288  ;;  %6308 = vrcp.f32 %v3481_v28  ;;  %v3484_v41 = vadd.f32 1.0, %v6287_v42  ;;  %v3864_v57 = vmul.f32 %v6281_v44, %v7964_v22  ;;  %v5019_v28 = vmul.f32 -1.442695, %v8041_v26 }
 0x5de   : > { %4498 = vmatmul.mubr.bf16.gmra.mrb[200].mxu1 %v3978_v8  ;;  %v6291_v18 = vpop.eup %6290  ;;  %6310 = vrcp.f32 %v3483_v38  ;;  %v3486_v45 = vadd.f32 1.0, %v6289_v11  ;;  %v5014_v8 = vmul.f32 -1.442695, %v8035_v13 }
 0x5df   : > { %v6293_v34 = vpop.eup %6292  ;;  %6312 = vrcp.f32 %v3484_v41  ;;  %v3485_v20 = vadd.f32 1.0, %v6291_v18  ;;  %v5018_v41 = vmul.f32 -1.442695, %v8043_v32 }
 0x5e0   : > { %v6295_v56 = vpop.eup %6294  ;;  %6314 = vrcp.f32 %v3486_v45  ;;  %v3487_v16 = vadd.f32 1.0, %v6293_v34 }
 0x5e1   : > { %v6297_v52 = vpop.eup %6296  ;;  %6316 = vrcp.f32 %v3485_v20  ;;  %v3488_v30 = vadd.f32 1.0, %v6295_v56 }
 0x5e2   : > { %v6299_v0 = vpop.eup %6298  ;;  %6318 = vrcp.f32 %v3487_v16  ;;  %v3490_v61 = vadd.f32 1.0, %v6297_v52 }
 0x5e3   : > { %v6301_v29 = vpop.eup %6300  ;;  %v3489_v35 = vadd.f32 1.0, %v6299_v0  ;;  %6320 = vpow2.f32 %v5008_v49 }
 0x5e4   : > { %v6303_v6 = vpop.eup %6302  ;;  %6322 = vrcp.f32 %v3488_v30  ;;  %v3866_v38 = vmul.f32 %v6301_v29, %v7966_v55 }
 0x5e5   : > { %v6305_v54 = vpop.eup %6304  ;;  %6324 = vrcp.f32 %v3490_v61  ;;  %v3492_v1 = vadd.f32 1.0, %v6303_v6 }
 0x5e6   : > { %v6307_v24 = vpop.eup %6306  ;;  %6326 = vrcp.f32 %v3489_v35  ;;  %v3494_v58 = vadd.f32 1.0, %v6305_v54 }
 0x5e7   : > { %v6309_v51 = vpop.eup %6308  ;;  %6328 = vrcp.f32 %v3492_v1  ;;  %v3493_v40 = vadd.f32 1.0, %v6307_v24 }
 0x5e8   : > { %v6311_v3 = vpop.eup %6310  ;;  %6330 = vrcp.f32 %v3494_v58  ;;  %v3865_v45 = vmul.f32 %v6309_v51, %v7969_v27 }
 0x5e9   : > { %v6313_v5 = vpop.eup %6312  ;;  %6332 = vrcp.f32 %v3493_v40 }
 0x5ea   : > { %v6315_v47 = vpop.eup %6314  ;;  %v3868_v19 = vmul.f32 %v6313_v5, %v7974_v17  ;;  %6334 = vpow2.f32 %v5012_v50  ;;  %v3867_v17 = vmul.f32 %v6311_v3, %v7972_v2 }
 0x5eb   : > { %v6317_v42 = vpop.eup %6316  ;;  %v3870_v11 = vmul.f32 %v6315_v47, %v7977_v14  ;;  %6336 = vpow2.f32 %v5013_v7  ;;  %v5020_v14 = vmul.f32 -1.442695, %v8045_v10 }
 0x5ec   : > { %v6319_v18 = vpop.eup %6318  ;;  %v3980_v34 = vpack.c.bf16 %v3868_v19, %v3864_v57  ;;  %v3869_v20 = vmul.f32 %v6317_v42, %v7979_v31  ;;  %6338 = vpow2.f32 %v5015_v62 }
 0x5ed   : > { %v6321_v22 = vpop.eup %6320  ;;  %v3982_v44 = vpack.c.bf16 %v3870_v11, %v3866_v38  ;;  %v3871_v49 = vmul.f32 %v6319_v18, %v7982_v15  ;;  %6340 = vpow2.f32 %v5014_v8 }
 0x5ee   : > { %v6323_v55 = vpop.eup %6322  ;;  %v3981_v56 = vpack.c.bf16 %v3869_v20, %v3865_v45  ;;  %6342 = vpow2.f32 %v5016_v39  ;;  %v3491_v30 = vadd.f32 1.0, %v6321_v22 }
 0x5ef   : > { %v6325_v16 = vpop.eup %6324  ;;  %v3983_v52 = vpack.c.bf16 %v3871_v49, %v3867_v17  ;;  %6344 = vpow2.f32 %v5017_v33  ;;  %v3872_v15 = vmul.f32 %v6323_v55, %v7994_v12 }
 0x5f0   : > { %v6327_v27 = vpop.eup %6326  ;;  %6346 = vpow2.f32 %v5019_v28  ;;  %4344 = vmatprep.mubr.bf16.mxu0 %v3981_v56  ;;  %v8100_v29 = vmul.f32 %v6325_v16, %v7996_v36 }
 0x5f1   : > { %v6329_v31 = vpop.eup %6328  ;;  %6348 = vpow2.f32 %v5018_v41  ;;  %4505 = vmatprep.mubr.bf16.mxu1 %v3983_v52  ;;  %4345 = vmatmul.mubr.bf16.gmra.mrb[204].mxu0 %v3980_v34  ;;  %v3873_v54 = vmul.f32 %v6327_v27, %v8000_v9 }
 0x5f2   : > { %v6331_v2 = vpop.eup %6330  ;;  %v3876_v0 = vmul.f32 %v6329_v31, %v8006_v37  ;;  %6350 = vpow2.f32 %v5020_v14  ;;  %4506 = vmatmul.mubr.bf16.gmra.mrb[204].mxu1 %v3982_v44 }
 0x5f3   : > { %v6333_v61 = vpop.eup %6332  ;;  %v8103_v35 = vmul.f32 %v6331_v2, %v8008_v43  ;;  %6352 = vrcp.f32 %v3491_v30 }
 0x5f4   : > { %v6335_v6 = vpop.eup %6334  ;;  %v3984_v1 = vpack.c.bf16 %v3876_v0, %v3872_v15  ;;  %v3877_v24 = vmul.f32 %v6333_v61, %v8013_v59  ;;  %v8109_v36 = vpop.f32.mrb[152].mxu0 }
 0x5f5   : > { %v6337_v58 = vpop.eup %6336  ;;  %v3986_v12 = vpack.c.bf16 %v8103_v35, %v8100_v29  ;;  %v3495_v37 = vadd.f32 1.0, %v6335_v6  ;;  %v8111_v7 = vpop.f32.mrb[152].mxu1  ;;  %v5021_v45 = vmul.f32 -1.442695, %v8109_v36 }
 0x5f6   : > { %v6339_v50 = vpop.eup %6338  ;;  %v3985_v51 = vpack.c.bf16 %v3877_v24, %v3873_v54  ;;  %v3496_v40 = vadd.f32 1.0, %v6337_v58  ;;  %v8113_v9 = vpop.f32.mrb[153].mxu0  ;;  %v5023_v20 = vmul.f32 -1.442695, %v8111_v7 }
 0x5f7   : > { %v6341_v43 = vpop.eup %6340  ;;  %6354 = vrcp.f32 %v3495_v37  ;;  %v3498_v3 = vadd.f32 1.0, %v6339_v50  ;;  %v8115_v5 = vpop.f32.mrb[153].mxu1  ;;  %v5022_v22 = vmul.f32 -1.442695, %v8113_v9 }
 0x5f8   : > { %v6343_v62 = vpop.eup %6342  ;;  %6356 = vrcp.f32 %v3496_v40  ;;  %v3497_v59 = vadd.f32 1.0, %v6341_v43  ;;  %4352 = vmatprep.mubr.bf16.mxu0 %v3985_v51  ;;  %v8117_v8 = vpop.f32.mrb[154].mxu0  ;;  %v5024_v55 = vmul.f32 -1.442695, %v8115_v5 }
 0x5f9   : > { %v6345_v39 = vpop.eup %6344  ;;  %6358 = vrcp.f32 %v3498_v3  ;;  %v3499_v33 = vadd.f32 1.0, %v6343_v62  ;;  %4353 = vmatmul.mubr.bf16.gmra.mrb[208].mxu0 %v3984_v1  ;;  %v8119_v47 = vpop.f32.mrb[154].mxu1  ;;  %v5025_v16 = vmul.f32 -1.442695, %v8117_v8 }
 0x5fa   : > { %v6347_v57 = vpop.eup %6346  ;;  %6360 = vrcp.f32 %v3497_v59  ;;  %v3500_v19 = vadd.f32 1.0, %v6345_v39  ;;  %v8121_v28 = vpop.f32.mrb[155].mxu0  ;;  %v5027_v30 = vmul.f32 -1.442695, %v8119_v47 }
 0x5fb   : > { %v8123_v42 = vpop.f32.mrb[155].mxu1  ;;  %v6349_v38 = vpop.eup %6348  ;;  %6362 = vrcp.f32 %v3499_v33  ;;  %v3502_v11 = vadd.f32 1.0, %v6347_v57  ;;  %v5026_v54 = vmul.f32 -1.442695, %v8121_v28 }
 0x5fc   : > { %v6351_v41 = vpop.eup %6350  ;;  %6364 = vrcp.f32 %v3500_v19  ;;  %v3501_v18 = vadd.f32 1.0, %v6349_v38  ;;  %v8128_v17 = vpop.f32.mrb[156].mxu0  ;;  %v5028_v24 = vmul.f32 -1.442695, %v8123_v42 }
 0x5fd   : > { %6366 = vrcp.f32 %v3502_v11  ;;  %v3503_v34 = vadd.f32 1.0, %v6351_v41  ;;  %v8130_v44 = vpop.f32.mrb[156].mxu1  ;;  %v6353_v49 = vpop.eup %6352  ;;  %v5029_v50 = vmul.f32 -1.442695, %v8128_v17 }
 0x5fe   : > { %6368 = vrcp.f32 %v3501_v18  ;;  %v8133_v56 = vpop.f32.mrb[157].mxu0  ;;  %v8135_v14 = vpop.f32.mrb[157].mxu1  ;;  %v3875_v61 = vmul.f32 %v6353_v49, %v8002_v46  ;;  %v5031_v40 = vmul.f32 -1.442695, %v8130_v44 }
 0x5ff   : > { %6370 = vrcp.f32 %v3503_v34  ;;  %v8138_v52 = vpop.f32.mrb[158].mxu0  ;;  %v8140_v27 = vpop.f32.mrb[158].mxu1  ;;  %v5030_v46 = vmul.f32 -1.442695, %v8133_v56  ;;  %v5032_v33 = vmul.f32 -1.442695, %v8135_v14 }
 0x600   : > { %6372 = vpow2.f32 %v5021_v45  ;;  %v8143_v2 = vpop.f32.mrb[159].mxu0  ;;  %v8145_v15 = vpop.f32.mrb[159].mxu1 }
 0x601   : > { %v6355_v31 = vpop.eup %6354  ;;  %6374 = vpow2.f32 %v5023_v20 }
 0x602   : > { %v6357_v0 = vpop.eup %6356  ;;  %v3879_v6 = vmul.f32 %v6355_v31, %v8015_v21  ;;  %6376 = vpow2.f32 %v5022_v22 }
 0x603   : > { %v6359_v1 = vpop.eup %6358  ;;  %6378 = vpow2.f32 %v5024_v55  ;;  %v3880_v59 = vmul.f32 %v6357_v0, %v8029_v53  ;;  %v5033_v53 = vmul.f32 -1.442695, %v8138_v52 }
 0x604   : > { %v6361_v58 = vpop.eup %6360  ;;  %v3987_v37 = vpack.c.bf16 %v3879_v6, %v3875_v61  ;;  %6380 = vpow2.f32 %v5025_v16  ;;  %v8154_v21 = vpop.f32.mrb[160].mxu0  ;;  %v3882_v11 = vmul.f32 %v6359_v1, %v8031_v25 }
 0x605   : > { %v6363_v51 = vpop.eup %6362  ;;  %6382 = vpow2.f32 %v5027_v30  ;;  %v8156_v3 = vpop.f32.mrb[160].mxu1  ;;  %v3881_v35 = vmul.f32 %v6361_v58, %v8035_v13 }
 0x606   : > { %v6365_v43 = vpop.eup %6364  ;;  %4513 = vmatprep.mubr.bf16.mxu1 %v3987_v37  ;;  %6384 = vpow2.f32 %v5026_v54  ;;  %v8164_v57 = vpop.f32.mrb[161].mxu0 }
 0x607   : > { %v6367_v62 = vpop.eup %6366  ;;  %v3884_v39 = vmul.f32 %v6365_v43, %v8039_v23  ;;  %4514 = vmatmul.mubr.bf16.gmra.mrb[208].mxu1 %v3986_v12  ;;  %6386 = vpow2.f32 %v5028_v24  ;;  %v8166_v19 = vpop.f32.mrb[161].mxu1 }
 0x608   : > { %v6369_v38 = vpop.eup %6368  ;;  %v3886_v41 = vmul.f32 %v6367_v62, %v8041_v26  ;;  %6388 = vpow2.f32 %v5029_v50  ;;  %v8171_v23 = vpop.f32.mrb[162].mxu0  ;;  %v3883_v26 = vmul.f32 %v6363_v51, %v8037_v48 }
 0x609   : > { %v8173_v18 = vpop.f32.mrb[162].mxu1  ;;  %v6371_v29 = vpop.eup %6370  ;;  %v3988_v12 = vpack.c.bf16 %v3884_v39, %v3880_v59  ;;  %v3885_v45 = vmul.f32 %v6369_v38, %v8043_v32  ;;  %6390 = vpow2.f32 %v5031_v40 }
 0x60a   : > { %v8177_v34 = vpop.f32.mrb[163].mxu0  ;;  %v8179_v20 = vpop.f32.mrb[163].mxu1  ;;  %v3990_v22 = vpack.c.bf16 %v3886_v41, %v3882_v11  ;;  %v3887_v49 = vmul.f32 %v6371_v29, %v8045_v10  ;;  %6392 = vpow2.f32 %v5030_v46 }
 0x60b   : > { %v6373_v25 = vpop.eup %6372  ;;  %v3989_v16 = vpack.c.bf16 %v3885_v45, %v3881_v35  ;;  %6394 = vpow2.f32 %v5032_v33 }
 0x60c   : > { %v6375_v55 = vpop.eup %6374  ;;  %v3504_v31 = vadd.f32 1.0, %v6373_v25  ;;  %v3991_v30 = vpack.c.bf16 %v3887_v49, %v3883_v26  ;;  %6396 = vpow2.f32 %v5033_v53  ;;  %v8183_v54 = vpop.f32.mrb[164].mxu0  ;;  %v5035_v26 = vmul.f32 -1.442695, %v8140_v27 }
 0x60d   : > { %v6377_v13 = vpop.eup %6376  ;;  %v3506_v0 = vadd.f32 1.0, %v6375_v55  ;;  %4360 = vmatprep.mubr.bf16.mxu0 %v3989_v16  ;;  %v8185_v10 = vpop.f32.mrb[164].mxu1 }
 0x60e   : > { %v6379_v32 = vpop.eup %6378  ;;  %6398 = vrcp.f32 %v3504_v31  ;;  %v3505_v61 = vadd.f32 1.0, %v6377_v13  ;;  %4521 = vmatprep.mubr.bf16.mxu1 %v3991_v30  ;;  %4361 = vmatmul.mubr.bf16.gmra.mrb[212].mxu0 %v3988_v12  ;;  %v8187_v58 = vpop.f32.mrb[165].mxu0  ;;  %v5034_v31 = vmul.f32 -1.442695, %v8143_v2 }
 0x60f   : > { %v6381_v6 = vpop.eup %6380  ;;  %6400 = vrcp.f32 %v3506_v0  ;;  %v3507_v48 = vadd.f32 1.0, %v6379_v32  ;;  %4522 = vmatmul.mubr.bf16.gmra.mrb[212].mxu1 %v3990_v22  ;;  %v8189_v51 = vpop.f32.mrb[165].mxu1  ;;  %v5036_v0 = vmul.f32 -1.442695, %v8145_v15 }
 0x610   : > { %v6383_v1 = vpop.eup %6382  ;;  %6402 = vrcp.f32 %v3505_v61  ;;  %v3508_v24 = vadd.f32 1.0, %v6381_v6  ;;  %v8191_v40 = vpop.f32.mrb[166].mxu0 }
 0x611   : > { %v6385_v37 = vpop.eup %6384  ;;  %6404 = vrcp.f32 %v3507_v48  ;;  %v3510_v50 = vadd.f32 1.0, %v6383_v1  ;;  %v8193_v62 = vpop.f32.mrb[166].mxu1  ;;  %v5037_v48 = vmul.f32 -1.442695, %v8154_v21 }
 0x612   : > { %v6387_v43 = vpop.eup %6386  ;;  %6406 = vrcp.f32 %v3508_v24  ;;  %v3509_v46 = vadd.f32 1.0, %v6385_v37  ;;  %v8195_v33 = vpop.f32.mrb[167].mxu0 }
 0x613   : > { %v6389_v59 = vpop.eup %6388  ;;  %6408 = vrcp.f32 %v3510_v50  ;;  %v3511_v39 = vadd.f32 1.0, %v6387_v43  ;;  %v8197_v38 = vpop.f32.mrb[167].mxu1  ;;  %v5039_v50 = vmul.f32 -1.442695, %v8156_v3 }
 0x614   : > { %v6391_v11 = vpop.eup %6390  ;;  %6410 = vrcp.f32 %v3509_v46  ;;  %v3512_v41 = vadd.f32 1.0, %v6389_v59  ;;  %v8200_v22 = vpop.f32.mrb[168].mxu0  ;;  %v5038_v59 = vmul.f32 -1.442695, %v8164_v57 }
 0x615   : > { %v6393_v53 = vpop.eup %6392  ;;  %6412 = vrcp.f32 %v3511_v39  ;;  %v3514_v29 = vadd.f32 1.0, %v6391_v11  ;;  %v8202_v49 = vpop.f32.mrb[168].mxu1  ;;  %v5040_v39 = vmul.f32 -1.442695, %v8166_v19  ;;  %v5041_v11 = vmul.f32 -1.442695, %v8171_v23 }
 0x616   : > { %v6395_v35 = vpop.eup %6394  ;;  %6414 = vrcp.f32 %v3512_v41  ;;  %v3513_v12 = vadd.f32 1.0, %v6393_v53  ;;  %v8205_v13 = vpop.f32.mrb[169].mxu0 }
 0x617   : > { %v6397_v45 = vpop.eup %6396  ;;  %6416 = vrcp.f32 %v3514_v29  ;;  %v3515_v25 = vadd.f32 1.0, %v6395_v35  ;;  %v8208_v32 = vpop.f32.mrb[169].mxu1  ;;  %v5043_v35 = vmul.f32 -1.442695, %v8173_v18 }
 0x618   : > { %v6399_v55 = vpop.eup %6398  ;;  %6418 = vrcp.f32 %v3513_v12  ;;  %v3516_v16 = vadd.f32 1.0, %v6397_v45  ;;  %v8210_v61 = vpop.f32.mrb[170].mxu0 }
 0x619   : > { %v6401_v30 = vpop.eup %6400  ;;  %6420 = vrcp.f32 %v3515_v25  ;;  %v8213_v1 = vpop.f32.mrb[170].mxu1  ;;  %v3888_v53 = vmul.f32 %v6399_v55, %v8109_v36 }
 0x61a   : > { %v6403_v6 = vpop.eup %6402  ;;  %6422 = vrcp.f32 %v3516_v16  ;;  %v8215_v24 = vpop.f32.mrb[171].mxu0  ;;  %v3890_v45 = vmul.f32 %v6401_v30, %v8111_v7 }
 0x61b   : > { %v6405_v37 = vpop.eup %6404  ;;  %6424 = vpow2.f32 %v5035_v26  ;;  %v8218_v43 = vpop.f32.mrb[171].mxu1  ;;  %v5042_v26 = vmul.f32 -1.442695, %v8177_v34 }
 0x61c   : > { %v6407_v46 = vpop.eup %6406  ;;  %6426 = vpow2.f32 %v5034_v31  ;;  %v3889_v31 = vmul.f32 %v6403_v6, %v8113_v9  ;;  %v8231_v36 = vpop.f32.mrb[172].mxu0 }
 0x61d   : > { %v6409_v41 = vpop.eup %6408  ;;  %v3892_v29 = vmul.f32 %v6407_v46, %v8117_v8  ;;  %6428 = vpow2.f32 %v5036_v0  ;;  %v8233_v8 = vpop.f32.mrb[172].mxu1  ;;  %v3891_v0 = vmul.f32 %v6405_v37, %v8115_v5 }
 0x61e   : > { %v6411_v12 = vpop.eup %6410  ;;  %v3894_v25 = vmul.f32 %v6409_v41, %v8119_v47  ;;  %6430 = vpow2.f32 %v5037_v48  ;;  %v8237_v30 = vpop.f32.mrb[173].mxu0 }
 0x61f   : > { %v6413_v16 = vpop.eup %6412  ;;  %v3992_v60 = vpack.c.bf16 %v3892_v29, %v3888_v53  ;;  %v3893_v63 = vmul.f32 %v6411_v12, %v8121_v28  ;;  %6432 = vpow2.f32 %v5039_v50  ;;  %v8239_v48 = vpop.f32.mrb[173].mxu1  ;;  %v5044_v28 = vmul.f32 -1.442695, %v8179_v20 }
 0x620   : > { %v6415_v55 = vpop.eup %6414  ;;  %v3994_v7 = vpack.c.bf16 %v3894_v25, %v3890_v45  ;;  %v3895_v47 = vmul.f32 %v6413_v16, %v8123_v42  ;;  %6434 = vpow2.f32 %v5038_v59  ;;  %v8244_v50 = vpop.f32.mrb[174].mxu0  ;;  %v5045_v42 = vmul.f32 -1.442695, %v8183_v54 }
 0x621   : > { %v8241_v9 = vpop.eup %6416  ;;  %v3993_v6 = vpack.c.bf16 %v3893_v63, %v3889_v31  ;;  %6436 = vpow2.f32 %v5040_v39  ;;  %v8246_v46 = vpop.f32.mrb[174].mxu1  ;;  %v5047_v63 = vmul.f32 -1.442695, %v8185_v10  ;;  %v8259_v12 = vmul.f32 %v6415_v55, %v8128_v17 }
 0x622   : > { %v8248_v41 = vpop.eup %6418  ;;  %v3995_v5 = vpack.c.bf16 %v3895_v47, %v3891_v0  ;;  %6438 = vpow2.f32 %v5041_v11  ;;  %v8251_v37 = vpop.f32.mrb[175].mxu0 }
 0x623   : > { %v8253_v59 = vpop.f32.mrb[175].mxu1  ;;  %v8255_v53 = vpop.eup %6420  ;;  %6440 = vpow2.f32 %v5043_v35  ;;  %4368 = vmatprep.mubr.bf16.mxu0 %v3993_v6 }
 0x624   : > { %v6423_v39 = vpop.eup %6422  ;;  %6442 = vpow2.f32 %v5042_v26  ;;  %4529 = vmatprep.mubr.bf16.mxu1 %v3995_v5  ;;  %4369 = vmatmul.mubr.bf16.gmra.mrb[216].mxu0 %v3992_v60  ;;  %v8266_v26 = vpop.f32.mrb[176].mxu0 }
 0x625   : > { %v6425_v29 = vpop.eup %6424  ;;  %v8262_v11 = vmul.f32 %v6423_v39, %v8138_v52  ;;  %6444 = vpow2.f32 %v5044_v28  ;;  %4530 = vmatmul.mubr.bf16.gmra.mrb[216].mxu1 %v3994_v7  ;;  %v8268_v60 = vpop.f32.mrb[176].mxu1 }
 0x626   : > { %v6427_v45 = vpop.eup %6426  ;;  %v3518_v25 = vadd.f32 1.0, %v6425_v29  ;;  %6446 = vpow2.f32 %v5045_v42  ;;  %v8270_v52 = vpop.f32.mrb[177].mxu0 }
 0x627   : > { %v6429_v35 = vpop.eup %6428  ;;  %v3517_v31 = vadd.f32 1.0, %v6427_v45  ;;  %6448 = vpow2.f32 %v5047_v63  ;;  %v8272_v47 = vpop.f32.mrb[177].mxu1 }
 0x628   : > { %v6431_v17 = vpop.eup %6430  ;;  %6450 = vrcp.f32 %v3518_v25  ;;  %v3519_v55 = vadd.f32 1.0, %v6429_v35  ;;  %v8274_v6 = vpop.f32.mrb[178].mxu0 }
 0x629   : > { %v6433_v0 = vpop.eup %6432  ;;  %6452 = vrcp.f32 %v3517_v31  ;;  %v3520_v7 = vadd.f32 1.0, %v6431_v17  ;;  %8681 = vst [vmem:[#allocation34_spill] sm:$0xff] %v8274_v6  ;;  %v8276_v42 = vpop.f32.mrb[178].mxu1 }
 0x62a   : > { %v6435_v28 = vpop.eup %6434  ;;  %6454 = vrcp.f32 %v3519_v55  ;;  %v3522_v5 = vadd.f32 1.0, %v6433_v0  ;;  %8682 = vst [vmem:[#allocation35_spill] sm:$0xff] %v8276_v42  ;;  %v8278_v29 = vpop.f32.mrb[179].mxu0 }
 0x62b   : > { %v6437_v63 = vpop.eup %6436  ;;  %6456 = vrcp.f32 %v3520_v7  ;;  %v3521_v39 = vadd.f32 1.0, %v6435_v28  ;;  %8683 = vst [vmem:[#allocation36_spill] sm:$0xff] %v8278_v29  ;;  %v8280_v45 = vpop.f32.mrb[179].mxu1 }
 0x62c   : > { %8684 = vst [vmem:[#allocation37_spill] sm:$0xff] %v8280_v45  ;;  %v6439_v25 = vpop.eup %6438  ;;  %6458 = vrcp.f32 %v3522_v5  ;;  %v3523_v35 = vadd.f32 1.0, %v6437_v63  ;;  %v8282_v42 = vpop.f32.mrb[180].mxu0 }
 0x62d   : > { %v6441_v31 = vpop.eup %6440  ;;  %6460 = vrcp.f32 %v3521_v39  ;;  %v3524_v17 = vadd.f32 1.0, %v6439_v25  ;;  %8685 = vst [vmem:[#allocation38_spill] sm:$0xff] %v8282_v42  ;;  %v8284_v7 = vpop.f32.mrb[180].mxu1  ;;  %v5046_v39 = vmul.f32 -1.442695, %v8187_v58 }
 0x62e   : > { %v6443_v16 = vpop.eup %6442  ;;  %6462 = vrcp.f32 %v3523_v35  ;;  %v3526_v4 = vadd.f32 1.0, %v6441_v31  ;;  %8686 = vst [vmem:[#allocation39_spill] sm:$0xff] %v8284_v7  ;;  %v8286_v45 = vpop.f32.mrb[181].mxu0  ;;  %v5049_v7 = vmul.f32 -1.442695, %v8191_v40 }
 0x62f   : > { %v6445_v55 = vpop.eup %6444  ;;  %6464 = vrcp.f32 %v3524_v17  ;;  %v3525_v0 = vadd.f32 1.0, %v6443_v16  ;;  %8687 = vst [vmem:[#allocation40_spill] sm:$0xff] %v8286_v45  ;;  %v8289_v25 = vpop.f32.mrb[181].mxu1  ;;  %v5048_v17 = vmul.f32 -1.442695, %v8189_v51 }
 0x630   : > { %v6447_v28 = vpop.eup %6446  ;;  %6466 = vrcp.f32 %v3526_v4  ;;  %v3527_v29 = vadd.f32 1.0, %v6445_v55  ;;  %8688 = vst [vmem:[#allocation41_spill] sm:$0xff] %v8289_v25  ;;  %v8291_v35 = vpop.f32.mrb[182].mxu0  ;;  %v5051_v25 = vmul.f32 -1.442695, %v8193_v62 }
 0x631   : > { %v6449_v5 = vpop.eup %6448  ;;  %6468 = vrcp.f32 %v3525_v0  ;;  %v3528_v63 = vadd.f32 1.0, %v6447_v28  ;;  %8689 = vst [vmem:[#allocation42_spill] sm:$0xff] %v8291_v35  ;;  %v8295_v4 = vpop.f32.mrb[182].mxu1  ;;  %v3898_v0 = vmul.f32 %v8241_v9, %v8130_v44  ;;  %v3899_v44 = vmul.f32 %v8255_v53, %v8135_v14 }
 0x632   : > { %v6451_v31 = vpop.eup %6450  ;;  %6470 = vrcp.f32 %v3527_v29  ;;  %v3530_v16 = vadd.f32 1.0, %v6449_v5  ;;  %8690 = vst [vmem:[#allocation43_spill] sm:$0xff] %v8295_v4  ;;  %v8301_v45 = vpop.f32.mrb[183].mxu0  ;;  %v3897_v5 = vmul.f32 %v8248_v41, %v8133_v56  ;;  %v5050_v4 = vmul.f32 -1.442695, %v8195_v33 }
 0x633   : > { %v6453_v55 = vpop.eup %6452  ;;  %v3902_v28 = vmul.f32 %v6451_v31, %v8140_v27  ;;  %6472 = vrcp.f32 %v3528_v63  ;;  %8691 = vst [vmem:[#allocation44_spill] sm:$0xff] %v8301_v45  ;;  %v8303_v35 = vpop.f32.mrb[183].mxu1  ;;  %v5056_v53 = vmul.f32 -1.442695, %v8208_v32 }
 0x634   : > { %8692 = vst [vmem:[#allocation45_spill] sm:$0xff] %v8303_v35  ;;  %v6455_v29 = vpop.eup %6454  ;;  %v3901_v42 = vmul.f32 %v6453_v55, %v8143_v2  ;;  %6474 = vrcp.f32 %v3530_v16  ;;  %v5052_v35 = vmul.f32 -1.442695, %v8197_v38  ;;  %v5053_v2 = vmul.f32 -1.442695, %v8200_v22 }
 0x635   : > { %v6457_v6 = vpop.eup %6456  ;;  %v3998_v27 = vpack.c.bf16 %v3902_v28, %v3898_v0  ;;  %v3903_v9 = vmul.f32 %v6455_v29, %v8145_v15  ;;  %6476 = vpow2.f32 %v5046_v39  ;;  %v5055_v16 = vmul.f32 -1.442695, %v8202_v49 }
 0x636   : > { %v6459_v63 = vpop.eup %6458  ;;  %v3997_v31 = vpack.c.bf16 %v3901_v42, %v3897_v5  ;;  %6478 = vpow2.f32 %v5048_v17  ;;  %v5054_v15 = vmul.f32 -1.442695, %v8205_v13  ;;  %v5057_v42 = vmul.f32 -1.442695, %v8210_v61 }
 0x637   : > { %v6461_v45 = vpop.eup %6460  ;;  %v3999_v56 = vpack.c.bf16 %v3903_v9, %v3899_v44  ;;  %6480 = vpow2.f32 %v5049_v7  ;;  %v8693_v39 = vpack.c.bf16 %v8262_v11, %v8259_v12  ;;  %v3904_v17 = vmul.f32 %v6457_v6, %v8154_v21 }
 0x638   : > { %v6463_v41 = vpop.eup %6462  ;;  %6482 = vpow2.f32 %v5051_v25  ;;  %4376 = vmatprep.mubr.bf16.mxu0 %v3997_v31  ;;  %v5059_v55 = vmul.f32 -1.442695, %v8213_v1  ;;  %v3906_v0 = vmul.f32 %v6459_v63, %v8156_v3  ;;  %v5058_v29 = vmul.f32 -1.442695, %v8215_v24 }
 0x639   : > { %v6465_v14 = vpop.eup %6464  ;;  %6484 = vpow2.f32 %v5050_v4  ;;  %4537 = vmatprep.mubr.bf16.mxu1 %v3999_v56  ;;  %4377 = vmatmul.mubr.bf16.gmra.mrb[220].mxu0 %v8693_v39  ;;  %v3905_v12 = vmul.f32 %v6461_v45, %v8164_v57  ;;  %v3907_v6 = vmul.f32 %v6463_v41, %v8166_v19 }
 0x63a   : > { %v6467_v7 = vpop.eup %6466  ;;  %v3908_v25 = vmul.f32 %v6465_v14, %v8171_v23  ;;  %6486 = vpow2.f32 %v5052_v35  ;;  %4538 = vmatmul.mubr.bf16.gmra.mrb[220].mxu1 %v3998_v27 }
 0x63b   : > { %v6469_v4 = vpop.eup %6468  ;;  %v3910_v28 = vmul.f32 %v6467_v7, %v8173_v18  ;;  %6488 = vpow2.f32 %v5053_v2 }
 0x63c   : > { %v6471_v5 = vpop.eup %6470  ;;  %v4000_v11 = vpack.c.bf16 %v3908_v25, %v3904_v17  ;;  %v3909_v21 = vmul.f32 %v6469_v4, %v8177_v34  ;;  %6490 = vpow2.f32 %v5055_v16 }
 0x63d   : > { %v8329_v23 = vpop.eup %6472  ;;  %v4002_v35 = vpack.c.bf16 %v3910_v28, %v3906_v0  ;;  %v3911_v44 = vmul.f32 %v6471_v5, %v8179_v20  ;;  %6492 = vpow2.f32 %v5054_v15  ;;  %v5060_v5 = vmul.f32 -1.442695, %v8218_v43 }
 0x63e   : > { %v8333_v3 = vpop.eup %6474  ;;  %v4001_v18 = vpack.c.bf16 %v3909_v21, %v3905_v12  ;;  %6494 = vpow2.f32 %v5056_v53  ;;  %v5061_v21 = vmul.f32 -1.442695, %v8231_v36 }
 0x63f   : > { %v6477_v27 = vpop.eup %6476  ;;  %v4003_v9 = vpack.c.bf16 %v3911_v44, %v3907_v6  ;;  %6496 = vpow2.f32 %v5057_v42 }
 0x640   : > { %v6479_v57 = vpop.eup %6478  ;;  %v3529_v45 = vadd.f32 1.0, %v6477_v27  ;;  %6498 = vpow2.f32 %v5059_v55  ;;  %4384 = vmatprep.mubr.bf16.mxu0 %v4001_v18  ;;  %v5062_v18 = vmul.f32 -1.442695, %v8237_v30  ;;  %v5064_v27 = vmul.f32 -1.442695, %v8239_v48 }
 0x641   : > { %v6481_v34 = vpop.eup %6480  ;;  %v3531_v63 = vadd.f32 1.0, %v6479_v57  ;;  %6500 = vpow2.f32 %v5058_v29  ;;  %4545 = vmatprep.mubr.bf16.mxu1 %v4003_v9  ;;  %4385 = vmatmul.mubr.bf16.gmra.mrb[224].mxu0 %v4000_v11  ;;  %v5065_v9 = vmul.f32 -1.442695, %v8244_v50 }
 0x642   : > { %v6483_v19 = vpop.eup %6482  ;;  %6502 = vrcp.f32 %v3529_v45  ;;  %v3532_v20 = vadd.f32 1.0, %v6481_v34  ;;  %4546 = vmatmul.mubr.bf16.gmra.mrb[224].mxu1 %v4002_v35  ;;  %v5063_v35 = vmul.f32 -1.442695, %v8233_v8  ;;  %v3912_v45 = vmul.f32 %v8329_v23, %v8183_v54 }
 0x643   : > { %v6485_v31 = vpop.eup %6484  ;;  %6504 = vrcp.f32 %v3531_v63  ;;  %v3534_v56 = vadd.f32 1.0, %v6483_v19  ;;  %v5067_v63 = vmul.f32 -1.442695, %v8246_v46 }
 0x644   : > { %v6487_v2 = vpop.eup %6486  ;;  %6506 = vrcp.f32 %v3532_v20  ;;  %v3533_v41 = vadd.f32 1.0, %v6485_v31  ;;  %v3914_v20 = vmul.f32 %v8333_v3, %v8185_v10 }
 0x645   : > { %v6489_v16 = vpop.eup %6488  ;;  %6508 = vrcp.f32 %v3534_v56  ;;  %v3535_v14 = vadd.f32 1.0, %v6487_v2  ;;  %v5066_v56 = vmul.f32 -1.442695, %v8251_v37 }
 0x646   : > { %v6491_v15 = vpop.eup %6490  ;;  %6510 = vrcp.f32 %v3533_v41  ;;  %v3536_v53 = vadd.f32 1.0, %v6489_v16 }
 0x647   : > { %v6493_v42 = vpop.eup %6492  ;;  %6512 = vrcp.f32 %v3535_v14  ;;  %v3538_v39 = vadd.f32 1.0, %v6491_v15 }
 0x648   : > { %v6495_v7 = vpop.eup %6494  ;;  %6514 = vrcp.f32 %v3536_v53  ;;  %v3537_v17 = vadd.f32 1.0, %v6493_v42 }
 0x649   : > { %v6497_v25 = vpop.eup %6496  ;;  %6516 = vrcp.f32 %v3538_v39  ;;  %v3539_v55 = vadd.f32 1.0, %v6495_v7 }
 0x64a   : > { %v6499_v4 = vpop.eup %6498  ;;  %6518 = vrcp.f32 %v3537_v17  ;;  %v3540_v0 = vadd.f32 1.0, %v6497_v25 }
 0x64b   : > { %v6501_v28 = vpop.eup %6500  ;;  %6520 = vrcp.f32 %v3539_v55  ;;  %v3542_v29 = vadd.f32 1.0, %v6499_v4  ;;  %v5072_v55 = vmul.f32 -1.442695, %v8272_v47 }
 0x64c   : > { %v6503_v12 = vpop.eup %6502  ;;  %6522 = vrcp.f32 %v3540_v0  ;;  %v3541_v11 = vadd.f32 1.0, %v6501_v28 }
 0x64d   : > { %v6505_v6 = vpop.eup %6504  ;;  %6524 = vrcp.f32 %v3542_v29  ;;  %v3913_v41 = vmul.f32 %v6503_v12, %v8187_v58  ;;  %v5069_v58 = vmul.f32 -1.442695, %v8266_v26 }
 0x64e   : > { %v6507_v44 = vpop.eup %6506  ;;  %6526 = vrcp.f32 %v3541_v11  ;;  %v3915_v23 = vmul.f32 %v6505_v6, %v8189_v51 }
 0x64f   : > { %v6509_v57 = vpop.eup %6508  ;;  %v3916_v34 = vmul.f32 %v6507_v44, %v8191_v40  ;;  %6528 = vpow2.f32 %v5060_v5 }
 0x650   : > { %v6511_v19 = vpop.eup %6510  ;;  %v3918_v31 = vmul.f32 %v6509_v57, %v8193_v62  ;;  %6530 = vpow2.f32 %v5061_v21  ;;  %v5068_v62 = vmul.f32 -1.442695, %v8253_v59 }
 0x651   : > { %v6513_v2 = vpop.eup %6512  ;;  %v4004_v16 = vpack.c.bf16 %v3916_v34, %v3912_v45  ;;  %v3917_v54 = vmul.f32 %v6511_v19, %v8195_v33  ;;  %6532 = vpow2.f32 %v5063_v35  ;;  %v5071_v33 = vmul.f32 -1.442695, %v8268_v60 }
 0x652   : > { %v6515_v40 = vpop.eup %6514  ;;  %v4006_v14 = vpack.c.bf16 %v3918_v31, %v3914_v20  ;;  %v3919_v15 = vmul.f32 %v6513_v2, %v8197_v38  ;;  %6534 = vpow2.f32 %v5062_v18  ;;  %v5070_v38 = vmul.f32 -1.442695, %v8270_v52 }
 0x653   : > { %v6517_v10 = vpop.eup %6516  ;;  %v4005_v3 = vpack.c.bf16 %v3917_v54, %v3913_v41  ;;  %6536 = vpow2.f32 %v5064_v27  ;;  %v3920_v17 = vmul.f32 %v6515_v40, %v8200_v22 }
 0x654   : > { %v6519_v53 = vpop.eup %6518  ;;  %v4007_v42 = vpack.c.bf16 %v3919_v15, %v3915_v23  ;;  %6538 = vpow2.f32 %v5065_v9  ;;  %v8363_v0 = vmul.f32 %v6517_v10, %v8202_v49 }
 0x655   : > { %v8355_v39 = vpop.eup %6520  ;;  %6540 = vpow2.f32 %v5067_v63  ;;  %4392 = vmatprep.mubr.bf16.mxu0 %v4005_v3  ;;  %v3921_v5 = vmul.f32 %v6519_v53, %v8205_v13 }
 0x656   : > { %v6523_v51 = vpop.eup %6522  ;;  %6542 = vpow2.f32 %v5066_v56  ;;  %4553 = vmatprep.mubr.bf16.mxu1 %v4007_v42  ;;  %4393 = vmatmul.mubr.bf16.gmra.mrb[228].mxu0 %v4004_v16  ;;  %v8372_v11 = vpop.f32.mrb[184].mxu1 }
 0x657   : > { %v6525_v7 = vpop.eup %6524  ;;  %v3924_v25 = vmul.f32 %v6523_v51, %v8210_v61  ;;  %6544 = vpow2.f32 %v5068_v62  ;;  %4554 = vmatmul.mubr.bf16.gmra.mrb[228].mxu1 %v4006_v14  ;;  %v8370_v61 = vpop.f32.mrb[184].mxu0 }
 0x658   : > { %v6527_v4 = vpop.eup %6526  ;;  %v8366_v28 = vmul.f32 %v6525_v7, %v8213_v1  ;;  %6546 = vpow2.f32 %v5069_v58  ;;  %v8376_v1 = vpop.f32.mrb[185].mxu0 }
 0x659   : > { %v6529_v29 = vpop.eup %6528  ;;  %v4008_v12 = vpack.c.bf16 %v3924_v25, %v3920_v17  ;;  %v3925_v22 = vmul.f32 %v6527_v4, %v8215_v24  ;;  %6548 = vpow2.f32 %v5071_v33  ;;  %v8378_v35 = vpop.f32.mrb[185].mxu1  ;;  %v8694_v25 = vld [vmem:[#allocation34_spill] sm:$0xff] }
 0x65a   : > { %v6531_v21 = vpop.eup %6530  ;;  %v4010_v49 = vpack.c.bf16 %v8366_v28, %v8363_v0  ;;  %v3543_v6 = vadd.f32 1.0, %v6529_v29  ;;  %6550 = vpow2.f32 %v5070_v38  ;;  %v8380_v24 = vpop.f32.mrb[186].mxu0 }
 0x65b   : > { %v6533_v44 = vpop.eup %6532  ;;  %v4009_v13 = vpack.c.bf16 %v3925_v22, %v3921_v5  ;;  %v3544_v18 = vadd.f32 1.0, %v6531_v21  ;;  %6552 = vpow2.f32 %v5072_v55  ;;  %v8382_v27 = vpop.f32.mrb[186].mxu1  ;;  %v5073_v55 = vmul.f32 -1.442695, %v8694_v25  ;;  %v8695_v22 = vld [vmem:[#allocation35_spill] sm:$0xff] }
 0x65c   : > { %v6535_v9 = vpop.eup %6534  ;;  %6554 = vrcp.f32 %v3543_v6  ;;  %v3546_v57 = vadd.f32 1.0, %v6533_v44  ;;  %v8384_v45 = vpop.f32.mrb[187].mxu0  ;;  %v5075_v21 = vmul.f32 -1.442695, %v8695_v22  ;;  %v3923_v44 = vmul.f32 %v8355_v39, %v8208_v32  ;;  %v8700_v32 = vld [vmem:[#allocation40_spill] sm:$0xff]  ;;  %v8701_v39 = vld [vmem:[#allocation41_spill] sm:$0xff] }
 0x65d   : > { %v6537_v34 = vpop.eup %6536  ;;  %6556 = vrcp.f32 %v3544_v18  ;;  %v3545_v63 = vadd.f32 1.0, %v6535_v9  ;;  %4400 = vmatprep.mubr.bf16.mxu0 %v4009_v13  ;;  %v8386_v19 = vpop.f32.mrb[187].mxu1  ;;  %v8696_v18 = vld [vmem:[#allocation36_spill] sm:$0xff] }
 0x65e   : > { %v6539_v20 = vpop.eup %6538  ;;  %6558 = vrcp.f32 %v3546_v57  ;;  %v3547_v31 = vadd.f32 1.0, %v6537_v34  ;;  %4401 = vmatmul.mubr.bf16.gmra.mrb[232].mxu0 %v4008_v12  ;;  %v8388_v23 = vpop.f32.mrb[188].mxu0  ;;  %v5074_v9 = vmul.f32 -1.442695, %v8696_v18  ;;  %v8697_v34 = vld [vmem:[#allocation37_spill] sm:$0xff] }
 0x65f   : > { %v6541_v56 = vpop.eup %6540  ;;  %6560 = vrcp.f32 %v3545_v63  ;;  %v3548_v2 = vadd.f32 1.0, %v6539_v20  ;;  %v8390_v14 = vpop.f32.mrb[188].mxu1  ;;  %v5076_v63 = vmul.f32 -1.442695, %v8697_v34 }
 0x660   : > { %v6543_v41 = vpop.eup %6542  ;;  %6562 = vrcp.f32 %v3547_v31  ;;  %v3550_v16 = vadd.f32 1.0, %v6541_v56  ;;  %v8392_v3 = vpop.f32.mrb[189].mxu0  ;;  %v8698_v56 = vld [vmem:[#allocation38_spill] sm:$0xff] }
 0x661   : > { %v6545_v54 = vpop.eup %6544  ;;  %6564 = vrcp.f32 %v3548_v2  ;;  %v3549_v40 = vadd.f32 1.0, %v6543_v41  ;;  %v8394_v42 = vpop.f32.mrb[189].mxu1  ;;  %v5077_v2 = vmul.f32 -1.442695, %v8698_v56 }
 0x662   : > { %v6547_v15 = vpop.eup %6546  ;;  %6566 = vrcp.f32 %v3550_v16  ;;  %v3551_v10 = vadd.f32 1.0, %v6545_v54  ;;  %v8396_v58 = vpop.f32.mrb[190].mxu0  ;;  %v8699_v16 = vld [vmem:[#allocation39_spill] sm:$0xff] }
 0x663   : > { %v6549_v62 = vpop.eup %6548  ;;  %6568 = vrcp.f32 %v3549_v40  ;;  %v3552_v53 = vadd.f32 1.0, %v6547_v15  ;;  %v8398_v38 = vpop.f32.mrb[190].mxu1  ;;  %v5079_v54 = vmul.f32 -1.442695, %v8699_v16  ;;  %v5080_v15 = vmul.f32 -1.442695, %v8701_v39 }
 0x664   : > { %v6551_v33 = vpop.eup %6550  ;;  %6570 = vrcp.f32 %v3551_v10  ;;  %v3554_v51 = vadd.f32 1.0, %v6549_v62  ;;  %v8401_v4 = vpop.f32.mrb[191].mxu0  ;;  %v8702_v10 = vld [vmem:[#allocation42_spill] sm:$0xff] }
 0x665   : > { %v6553_v7 = vpop.eup %6552  ;;  %6572 = vrcp.f32 %v3552_v53  ;;  %v3553_v17 = vadd.f32 1.0, %v6551_v33  ;;  %v8403_v29 = vpop.f32.mrb[191].mxu1  ;;  %v5081_v62 = vmul.f32 -1.442695, %v8702_v10 }
 0x666   : > { %v6555_v5 = vpop.eup %6554  ;;  %6574 = vrcp.f32 %v3554_v51  ;;  %v3555_v12 = vadd.f32 1.0, %v6553_v7  ;;  %v8703_v7 = vld [vmem:[#allocation43_spill] sm:$0xff] }
 0x667   : > { %v6557_v6 = vpop.eup %6556  ;;  %v3927_v13 = vmul.f32 %v6555_v5, %v8218_v43  ;;  %6576 = vrcp.f32 %v3553_v17  ;;  %v5078_v43 = vmul.f32 -1.442695, %v8700_v32  ;;  %v5083_v17 = vmul.f32 -1.442695, %v8703_v7 }
 0x668   : > { %v6559_v57 = vpop.eup %6558  ;;  %6578 = vrcp.f32 %v3555_v12  ;;  %v3928_v33 = vmul.f32 %v6557_v6, %v8231_v36 }
 0x669   : > { %v6561_v20 = vpop.eup %6560  ;;  %v4011_v31 = vpack.c.bf16 %v3927_v13, %v3923_v44  ;;  %6580 = vpow2.f32 %v5073_v55  ;;  %v3930_v5 = vmul.f32 %v6559_v57, %v8233_v8  ;;  %v8705_v57 = vld [vmem:[#allocation45_spill] sm:$0xff] }
 0x66a   : > { %v6563_v41 = vpop.eup %6562  ;;  %6582 = vpow2.f32 %v5075_v21  ;;  %v8704_v21 = vld [vmem:[#allocation44_spill] sm:$0xff]  ;;  %v3929_v36 = vmul.f32 %v6561_v20, %v8237_v30 }
 0x66b   : > { %v6565_v40 = vpop.eup %6564  ;;  %6584 = vpow2.f32 %v5074_v9  ;;  %4561 = vmatprep.mubr.bf16.mxu1 %v4011_v31  ;;  %v5082_v44 = vmul.f32 -1.442695, %v8704_v21  ;;  %v3931_v0 = vmul.f32 %v6563_v41, %v8239_v48 }
 0x66c   : > { %v6567_v53 = vpop.eup %6566  ;;  %v3932_v51 = vmul.f32 %v6565_v40, %v8244_v50  ;;  %6586 = vpow2.f32 %v5076_v63  ;;  %4562 = vmatmul.mubr.bf16.gmra.mrb[232].mxu1 %v4010_v49  ;;  %v5084_v63 = vmul.f32 -1.442695, %v8705_v57 }
 0x66d   : > { %v6569_v55 = vpop.eup %6568  ;;  %v3934_v12 = vmul.f32 %v6567_v53, %v8246_v46  ;;  %6588 = vpow2.f32 %v5077_v2 }
 0x66e   : > { %v6571_v13 = vpop.eup %6570  ;;  %v4012_v6 = vpack.c.bf16 %v3932_v51, %v3928_v33  ;;  %v3933_v50 = vmul.f32 %v6569_v55, %v8251_v37  ;;  %6590 = vpow2.f32 %v5079_v54  ;;  %v5085_v37 = vmul.f32 -1.442695, %v8370_v61 }
 0x66f   : > { %v8427_v9 = vpop.eup %6572  ;;  %v4014_v28 = vpack.c.bf16 %v3934_v12, %v3930_v5  ;;  %v3935_v49 = vmul.f32 %v6571_v13, %v8253_v59  ;;  %6592 = vpow2.f32 %v5078_v43 }
 0x670   : > { %v8431_v8 = vpop.eup %6574  ;;  %v4013_v46 = vpack.c.bf16 %v3933_v50, %v3929_v36  ;;  %6594 = vpow2.f32 %v5080_v15 }
 0x671   : > { %v8434_v31 = vpop.eup %6576  ;;  %v4015_v30 = vpack.c.bf16 %v3935_v49, %v3931_v0  ;;  %6596 = vpow2.f32 %v5081_v62 }
 0x672   : > { %v8437_v20 = vpop.eup %6578  ;;  %6598 = vpow2.f32 %v5083_v17  ;;  %4408 = vmatprep.mubr.bf16.mxu0 %v4013_v46 }
 0x673   : > { %v6581_v48 = vpop.eup %6580  ;;  %6600 = vpow2.f32 %v5082_v44  ;;  %4569 = vmatprep.mubr.bf16.mxu1 %v4015_v30  ;;  %4409 = vmatmul.mubr.bf16.gmra.mrb[236].mxu0 %v4012_v6 }
 0x674   : > { %v6583_v59 = vpop.eup %6582  ;;  %v3556_v2 = vadd.f32 1.0, %v6581_v48  ;;  %6602 = vpow2.f32 %v5084_v63  ;;  %4570 = vmatmul.mubr.bf16.gmra.mrb[236].mxu1 %v4014_v28  ;;  %v5087_v63 = vmul.f32 -1.442695, %v8372_v11  ;;  %v5088_v48 = vmul.f32 -1.442695, %v8378_v35 }
 0x675   : > { %v6585_v41 = vpop.eup %6584  ;;  %v3558_v54 = vadd.f32 1.0, %v6583_v59  ;;  %6604 = vpow2.f32 %v5085_v37  ;;  %v5086_v37 = vmul.f32 -1.442695, %v8376_v1 }
 0x676   : > { %v6587_v40 = vpop.eup %6586  ;;  %6606 = vrcp.f32 %v3556_v2  ;;  %v3557_v43 = vadd.f32 1.0, %v6585_v41  ;;  %v3936_v2 = vmul.f32 %v8427_v9, %v8266_v26 }
 0x677   : > { %v6589_v15 = vpop.eup %6588  ;;  %6608 = vrcp.f32 %v3558_v54  ;;  %v3559_v62 = vadd.f32 1.0, %v6587_v40  ;;  %v5089_v54 = vmul.f32 -1.442695, %v8380_v24 }
 0x678   : > { %v6591_v53 = vpop.eup %6590  ;;  %6610 = vrcp.f32 %v3557_v43  ;;  %v3560_v33 = vadd.f32 1.0, %v6589_v15  ;;  %v3938_v43 = vmul.f32 %v8431_v8, %v8268_v60 }
 0x679   : > { %v6593_v51 = vpop.eup %6592  ;;  %6612 = vrcp.f32 %v3559_v62  ;;  %v3562_v17 = vadd.f32 1.0, %v6591_v53  ;;  %v5091_v62 = vmul.f32 -1.442695, %v8382_v27  ;;  %v5090_v53 = vmul.f32 -1.442695, %v8384_v45 }
 0x67a   : > { %v6595_v55 = vpop.eup %6594  ;;  %6614 = vrcp.f32 %v3560_v33  ;;  %v3561_v5 = vadd.f32 1.0, %v6593_v51  ;;  %v3937_v51 = vmul.f32 %v8434_v31, %v8270_v52  ;;  %v5093_v52 = vmul.f32 -1.442695, %v8388_v23 }
 0x67b   : > { %v6597_v12 = vpop.eup %6596  ;;  %6616 = vrcp.f32 %v3562_v17  ;;  %v3563_v44 = vadd.f32 1.0, %v6595_v55  ;;  %v3939_v17 = vmul.f32 %v8437_v20, %v8272_v47  ;;  %v5095_v31 = vmul.f32 -1.442695, %v8390_v14 }
 0x67c   : > { %v6599_v13 = vpop.eup %6598  ;;  %6618 = vrcp.f32 %v3561_v5  ;;  %v3564_v36 = vadd.f32 1.0, %v6597_v12  ;;  %v5092_v5 = vmul.f32 -1.442695, %v8386_v19 }
 0x67d   : > { %v6601_v6 = vpop.eup %6600  ;;  %6620 = vrcp.f32 %v3563_v44  ;;  %v3566_v50 = vadd.f32 1.0, %v6599_v13 }
 0x67e   : > { %v6603_v0 = vpop.eup %6602  ;;  %6622 = vrcp.f32 %v3564_v36  ;;  %v3565_v28 = vadd.f32 1.0, %v6601_v6 }
 0x67f   : > { %v6605_v49 = vpop.eup %6604  ;;  %6624 = vrcp.f32 %v3566_v50  ;;  %v3567_v46 = vadd.f32 1.0, %v6603_v0 }
 0x680   : > { %v6607_v30 = vpop.eup %6606  ;;  %6626 = vrcp.f32 %v3565_v28  ;;  %v3568_v6 = vadd.f32 1.0, %v6605_v49 }
 0x681   : > { %v6609_v59 = vpop.eup %6608  ;;  %v3940_v41 = vmul.f32 %v6607_v30, %v8694_v25  ;;  %6628 = vrcp.f32 %v3567_v46  ;;  %v5099_v46 = vmul.f32 -1.442695, %v8398_v38 }
 0x682   : > { %v6611_v40 = vpop.eup %6610  ;;  %v3942_v15 = vmul.f32 %v6609_v59, %v8695_v22  ;;  %6630 = vpow2.f32 %v5087_v63 }
 0x683   : > { %v6613_v33 = vpop.eup %6612  ;;  %v4016_v26 = vpack.c.bf16 %v3940_v41, %v3936_v2  ;;  %v3941_v25 = vmul.f32 %v6611_v40, %v8696_v18  ;;  %6632 = vpow2.f32 %v5086_v37 }
 0x684   : > { %v6615_v9 = vpop.eup %6614  ;;  %v4018_v55 = vpack.c.bf16 %v3942_v15, %v3938_v43  ;;  %v3943_v60 = vmul.f32 %v6613_v33, %v8697_v34  ;;  %6634 = vpow2.f32 %v5088_v48  ;;  %v5097_v34 = vmul.f32 -1.442695, %v8396_v58 }
 0x685   : > { %v6617_v22 = vpop.eup %6616  ;;  %v4017_v8 = vpack.c.bf16 %v3941_v25, %v3937_v51  ;;  %6636 = vpow2.f32 %v5089_v54  ;;  %v3944_v13 = vmul.f32 %v6615_v9, %v8698_v56  ;;  %v5094_v33 = vmul.f32 -1.442695, %v8392_v3 }
 0x686   : > { %v6619_v12 = vpop.eup %6618  ;;  %v4019_v44 = vpack.c.bf16 %v3943_v60, %v3939_v17  ;;  %6638 = vpow2.f32 %v5091_v62  ;;  %v3946_v0 = vmul.f32 %v6617_v22, %v8699_v16  ;;  %v5096_v9 = vmul.f32 -1.442695, %v8394_v42 }
 0x687   : > { %v6621_v18 = vpop.eup %6620  ;;  %4416 = vmatprep.mubr.bf16.mxu0 %v4017_v8  ;;  %6640 = vpow2.f32 %v5090_v53  ;;  %v3945_v30 = vmul.f32 %v6619_v12, %v8700_v32 }
 0x688   : > { %v6623_v47 = vpop.eup %6622  ;;  %4577 = vmatprep.mubr.bf16.mxu1 %v4019_v44  ;;  %4417 = vmatmul.mubr.bf16.gmra.mrb[240].mxu0 %v4016_v26  ;;  %6642 = vpow2.f32 %v5092_v5  ;;  %v3947_v56 = vmul.f32 %v6621_v18, %v8701_v39 }
 0x689   : > { %v6625_v20 = vpop.eup %6624  ;;  %v3948_v36 = vmul.f32 %v6623_v47, %v8702_v10  ;;  %4578 = vmatmul.mubr.bf16.gmra.mrb[240].mxu1 %v4018_v55  ;;  %6644 = vpow2.f32 %v5093_v52 }
 0x68a   : > { %v6627_v50 = vpop.eup %6626  ;;  %v3950_v28 = vmul.f32 %v6625_v20, %v8703_v7  ;;  %6646 = vpow2.f32 %v5095_v31 }
 0x68b   : > { %v6629_v63 = vpop.eup %6628  ;;  %v4020_v37 = vpack.c.bf16 %v3948_v36, %v3944_v13  ;;  %v3949_v48 = vmul.f32 %v6627_v50, %v8704_v21  ;;  %6648 = vrcp.f32 %v3568_v6 }
 0x68c   : > { %v4022_v10 = vpack.c.bf16 %v3950_v28, %v3946_v0  ;;  %v3951_v49 = vmul.f32 %v6629_v63, %v8705_v57  ;;  %v6631_v59 = vpop.eup %6630  ;;  %6650 = vpow2.f32 %v5097_v34  ;;  %v5098_v28 = vmul.f32 -1.442695, %v8401_v4 }
 0x68d   : > { %v4021_v2 = vpack.c.bf16 %v3949_v48, %v3945_v30  ;;  %v6633_v16 = vpop.eup %6632  ;;  %v3570_v41 = vadd.f32 1.0, %v6631_v59  ;;  %6652 = vpow2.f32 %v5099_v46  ;;  %v5100_v30 = vmul.f32 -1.442695, %v8403_v29  ;;  %v8707_v59 = vld [vmem:[#allocation3_spill] sm:$0xff] }
 0x68e   : > { %v4023_v7 = vpack.c.bf16 %v3951_v49, %v3947_v56  ;;  %v6635_v54 = vpop.eup %6634  ;;  %v3569_v40 = vadd.f32 1.0, %v6633_v16 }
 0x68f   : > { %4424 = vmatprep.mubr.bf16.mxu0 %v4021_v2  ;;  %v6637_v32 = vpop.eup %6636  ;;  %6654 = vrcp.f32 %v3570_v41  ;;  %v3571_v21 = vadd.f32 1.0, %v6635_v54 }
 0x690   : > { %4585 = vmatprep.mubr.bf16.mxu1 %v4023_v7  ;;  %4425 = vmatmul.mubr.bf16.gmra.mrb[244].mxu0 %v4020_v37  ;;  %v6639_v39 = vpop.eup %6638  ;;  %6656 = vrcp.f32 %v3569_v40  ;;  %v3572_v57 = vadd.f32 1.0, %v6637_v32 }
 0x691   : > { %4586 = vmatmul.mubr.bf16.gmra.mrb[244].mxu1 %v4022_v10  ;;  %v6641_v43 = vpop.eup %6640  ;;  %6658 = vrcp.f32 %v3571_v21  ;;  %v3574_v15 = vadd.f32 1.0, %v6639_v39  ;;  %v8706_v10 = vld [vmem:[#allocation2_spill] sm:$0xff] }
 0x692   : > { %v6643_v62 = vpop.eup %6642  ;;  %6660 = vrcp.f32 %v3572_v57  ;;  %v3573_v53 = vadd.f32 1.0, %v6641_v43  ;;  %v5521_v51 = vpop.f32.mrb[192].mxu0 }
 0x693   : > { %v6645_v26 = vpop.eup %6644  ;;  %6662 = vrcp.f32 %v3574_v15  ;;  %v3575_v25 = vadd.f32 1.0, %v6643_v62  ;;  %v5633_v17 = vpop.f32.mrb[192].mxu1 }
 0x694   : > { %v5522_v55 = vpop.f32.mrb[193].mxu0  ;;  %v6647_v60 = vpop.eup %6646  ;;  %6664 = vrcp.f32 %v3573_v53  ;;  %v3576_v22 = vadd.f32 1.0, %v6645_v26 }
 0x695   : > { %v5523_v8 = vadd.f32 %v5522_v55, %v5521_v51  ;;  %v5634_v5 = vpop.f32.mrb[193].mxu1  ;;  %v5524_v12 = vpop.f32.mrb[194].mxu0  ;;  %6666 = vrcp.f32 %v3575_v25  ;;  %v3578_v44 = vadd.f32 1.0, %v6647_v60 }
 0x696   : > { %v5635_v52 = vadd.f32 %v5634_v5, %v5633_v17  ;;  %v5636_v18 = vpop.f32.mrb[194].mxu1  ;;  %v5525_v31 = vpop.f32.mrb[195].mxu0  ;;  %6668 = vpow2.f32 %v5094_v33 }
 0x697   : > { %v6649_v47 = vpop.eup %6648  ;;  %v5526_v34 = vadd.f32 %v5525_v31, %v5524_v12  ;;  %v5637_v20 = vpop.f32.mrb[195].mxu1  ;;  %6670 = vpow2.f32 %v5096_v9 }
 0x698   : > { %v6651_v13 = vpop.eup %6650  ;;  %v4484_v36 = vadd.f32 %v5635_v52, %v5523_v8  ;;  %v5638_v6 = vadd.f32 %v5637_v20, %v5636_v18  ;;  %6672 = vrcp.f32 %v3576_v22  ;;  %v3952_v41 = vmul.f32 %v6649_v47, %v8370_v61 }
 0x699   : > { %v6653_v50 = vpop.eup %6652  ;;  %v3580_v0 = vadd.f32 1.0, %v6651_v13  ;;  %6674 = vrcp.f32 %v3578_v44 }
 0x69a   : > { %v6655_v46 = vpop.eup %6654  ;;  %v3582_v63 = vadd.f32 1.0, %v6653_v50  ;;  %v4487_v37 = vadd.f32 %v5638_v6, %v5526_v34  ;;  %v4610_v49 = vadd.f32 %v4484_v36, %v8706_v10 }
 0x69b   : > { %v6657_v48 = vpop.eup %6656  ;;  %6676 = vrcp.f32 %v3580_v0  ;;  %v3954_v21 = vmul.f32 %v6655_v46, %v8372_v11  ;;  %v8708_v46 = vld [vmem:[#allocation5_spill] sm:$0xff] }
 0x69c   : > { %v6659_v56 = vpop.eup %6658  ;;  %6678 = vrcp.f32 %v3582_v63  ;;  %v4611_v2 = vadd.f32 %v4487_v37, %v8707_v59  ;;  %v3953_v43 = vmul.f32 %v6657_v48, %v8376_v1 }
 0x69d   : > { %v6661_v16 = vpop.eup %6660  ;;  %6680 = vpow2.f32 %v5098_v28  ;;  %v3955_v33 = vmul.f32 %v6659_v56, %v8378_v35 }
 0x69e   : > { %v6663_v7 = vpop.eup %6662  ;;  %v3956_v54 = vmul.f32 %v6661_v16, %v8380_v24  ;;  %6682 = vpow2.f32 %v5100_v30  ;;  %v5205_v40 = vpack.c.bf16 %v4611_v2, %v4610_v49  ;;  %v8709_v30 = vld [vmem:[#allocation4_spill] sm:$0xff] }
 0x69f   : > { %v6665_v32 = vpop.eup %6664  ;;  %v3958_v39 = vmul.f32 %v6663_v7, %v8382_v27 }
 0x6a0   : > { %v6667_v57 = vpop.eup %6666  ;;  %v4024_v15 = vpack.c.bf16 %v3956_v54, %v3952_v41  ;;  %v3957_v62 = vmul.f32 %v6665_v32, %v8384_v45  ;;  %5206 = vst [vmem:[%s8481_s17] sm:$0xff] %v5205_v40  }
 0x6a1   : > { %v6669_v53 = vpop.eup %6668  ;;  %v4026_v61 = vpack.c.bf16 %v3958_v39, %v3954_v21  ;;  %v3959_v24 = vmul.f32 %v6667_v57, %v8386_v19 }
 0x6a2   : > { %v6671_v51 = vpop.eup %6670  ;;  %v4025_v26 = vpack.c.bf16 %v3957_v62, %v3953_v43  ;;  %v3577_v17 = vadd.f32 1.0, %v6669_v53 }
 0x6a3   : > { %v6673_v25 = vpop.eup %6672  ;;  %v4027_v9 = vpack.c.bf16 %v3959_v24, %v3955_v33  ;;  %v3579_v55 = vadd.f32 1.0, %v6671_v51 }
 0x6a4   : > { %v6675_v11 = vpop.eup %6674  ;;  %4432 = vmatprep.mubr.bf16.mxu0 %v4025_v26  ;;  %v3960_v45 = vmul.f32 %v6673_v25, %v8388_v23  ;;  %6684 = vrcp.f32 %v3577_v17  ;;  %v8710_v25 = vld [vmem:[#allocation6_spill] sm:$0xff] }
 0x6a5   : > { %v6677_v27 = vpop.eup %6676  ;;  %4593 = vmatprep.mubr.bf16.mxu1 %v4027_v9  ;;  %4433 = vmatmul.mubr.bf16.gmra.mrb[248].mxu0 %v4024_v15  ;;  %v3962_v19 = vmul.f32 %v6675_v11, %v8390_v14  ;;  %6686 = vrcp.f32 %v3579_v55  ;;  %v8711_v11 = vld [vmem:[#allocation7_spill] sm:$0xff] }
 0x6a6   : > { %v6679_v1 = vpop.eup %6678  ;;  %v3964_v60 = vmul.f32 %v6677_v27, %v8396_v58  ;;  %4594 = vmatmul.mubr.bf16.gmra.mrb[248].mxu1 %v4026_v61 }
 0x6a7   : > { %v6681_v35 = vpop.eup %6680  ;;  %v3966_v22 = vmul.f32 %v6679_v1, %v8398_v38 }
 0x6a8   : > { %v6683_v8 = vpop.eup %6682  ;;  %v4028_v5 = vpack.c.bf16 %v3964_v60, %v3960_v45  ;;  %v3581_v12 = vadd.f32 1.0, %v6681_v35  ;;  %v5527_v44 = vpop.f32.mrb[196].mxu0 }
 0x6a9   : > { %v4030_v52 = vpack.c.bf16 %v3966_v22, %v3962_v19  ;;  %v3583_v18 = vadd.f32 1.0, %v6683_v8  ;;  %v5639_v31 = vpop.f32.mrb[196].mxu1  ;;  %v5528_v47 = vpop.f32.mrb[197].mxu0 }
 0x6aa   : > { %6688 = vrcp.f32 %v3581_v12  ;;  %v5529_v23 = vadd.f32 %v5528_v47, %v5527_v44  ;;  %v5640_v34 = vpop.f32.mrb[197].mxu1  ;;  %v5530_v58 = vpop.f32.mrb[198].mxu0 }
 0x6ab   : > { %6690 = vrcp.f32 %v3583_v18  ;;  %v5641_v20 = vadd.f32 %v5640_v34, %v5639_v31  ;;  %v5642_v13 = vpop.f32.mrb[198].mxu1  ;;  %v5531_v14 = vpop.f32.mrb[199].mxu0  ;;  %v8713_v31 = vld [vmem:[#allocation8_spill] sm:$0xff] }
 0x6ac   : > { %v5532_v36 = vadd.f32 %v5531_v14, %v5530_v58  ;;  %v5643_v38 = vpop.f32.mrb[199].mxu1 }
 0x6ad   : > { %v4492_v6 = vadd.f32 %v5641_v20, %v5529_v23  ;;  %v5644_v50 = vadd.f32 %v5643_v38, %v5642_v13 }
 0x6ae   : > { %v6685_v10 = vpop.eup %6684 }
 0x6af   : > { %v4495_v0 = vadd.f32 %v5644_v50, %v5532_v36  ;;  %v4612_v63 = vadd.f32 %v4492_v6, %v8708_v46  ;;  %v6687_v16 = vpop.eup %6686  ;;  %v3961_v43 = vmul.f32 %v6685_v10, %v8392_v3 }
 0x6b0   : > { %v5533_v28 = vpop.f32.mrb[200].mxu0  ;;  %v3963_v33 = vmul.f32 %v6687_v16, %v8394_v42 }
 0x6b1   : > { %v4613_v37 = vadd.f32 %v4495_v0, %v8709_v30  ;;  %v5645_v48 = vpop.f32.mrb[200].mxu1  ;;  %v5534_v56 = vpop.f32.mrb[201].mxu0 }
 0x6b2   : > { %v5535_v49 = vadd.f32 %v5534_v56, %v5533_v28  ;;  %v5646_v59 = vpop.f32.mrb[201].mxu1  ;;  %v5536_v2 = vpop.f32.mrb[202].mxu0  ;;  %v8715_v56 = vld [vmem:[#allocation11_spill] sm:$0xff] }
 0x6b3   : > { %v5210_v7 = vpack.c.bf16 %v4613_v37, %v4612_v63  ;;  %v5647_v41 = vadd.f32 %v5646_v59, %v5645_v48  ;;  %v5648_v54 = vpop.f32.mrb[202].mxu1  ;;  %v5537_v40 = vpop.f32.mrb[203].mxu0  ;;  %v8714_v37 = vld [vmem:[#allocation10_spill] sm:$0xff] }
 0x6b4   : > { %v6689_v32 = vpop.eup %6688  ;;  %v5538_v21 = vadd.f32 %v5537_v40, %v5536_v2  ;;  %v5649_v39 = vpop.f32.mrb[203].mxu1 }
 0x6b5   : > { %v6691_v57 = vpop.eup %6690  ;;  %v3965_v15 = vmul.f32 %v6689_v32, %v8401_v4  ;;  %5282 = vst [vmem:[%s8481_s17 + $0x8] sm:$0xff] %v5210_v7   ;;  %v4500_v62 = vadd.f32 %v5647_v41, %v5535_v49  ;;  %v5650_v53 = vadd.f32 %v5649_v39, %v5648_v54 }
 0x6b6   : > { %v3967_v61 = vmul.f32 %v6691_v57, %v8403_v29 }
 0x6b7   : > { %v4029_v24 = vpack.c.bf16 %v3965_v15, %v3961_v43  ;;  %v4503_v51 = vadd.f32 %v5650_v53, %v5538_v21  ;;  %v4614_v9 = vadd.f32 %v4500_v62, %v8710_v25  ;;  %v8716_v62 = vld [vmem:[#allocation13_spill] sm:$0xff] }
 0x6b8   : > { %v4031_v26 = vpack.c.bf16 %v3967_v61, %v3963_v33  ;;  %v8717_v33 = vld [vmem:[#allocation12_spill] sm:$0xff] }
 0x6b9   : > { %4440 = vmatprep.mubr.bf16.mxu0 %v4029_v24  ;;  %v4615_v17 = vadd.f32 %v4503_v51, %v8711_v11 }
 0x6ba   : > { %4601 = vmatprep.mubr.bf16.mxu1 %v4031_v26  ;;  %4441 = vmatmul.mubr.bf16.gmra.mrb[252].mxu0 %v4028_v5  ;;  %v8712_v5 = vld [vmem:[#allocation9_spill] sm:$0xff] }
 0x6bb   : > { %4602 = vmatmul.mubr.bf16.gmra.mrb[252].mxu1 %v4030_v52  ;;  %v5215_v3 = vpack.c.bf16 %v4615_v17, %v4614_v9 }
 0x6bd   : > { %5283 = vst [vmem:[%s8481_s17 + $0x10] sm:$0xff] %v5215_v3  }
 0x6c4   : > { %v5539_v4 = vpop.f32.mrb[204].mxu0 }
 0x6c5   : > { %v5651_v27 = vpop.f32.mrb[204].mxu1  ;;  %v5540_v55 = vpop.f32.mrb[205].mxu0 }
 0x6c6   : > { %v5541_v1 = vadd.f32 %v5540_v55, %v5539_v4  ;;  %v5652_v42 = vpop.f32.mrb[205].mxu1  ;;  %v5542_v45 = vpop.f32.mrb[206].mxu0 }
 0x6c7   : > { %v5653_v29 = vadd.f32 %v5652_v42, %v5651_v27  ;;  %v5654_v60 = vpop.f32.mrb[206].mxu1  ;;  %v5543_v35 = vpop.f32.mrb[207].mxu0 }
 0x6c8   : > { %v5544_v19 = vadd.f32 %v5543_v35, %v5542_v45  ;;  %v5655_v22 = vpop.f32.mrb[207].mxu1 }
 0x6c9   : > { %v4508_v8 = vadd.f32 %v5653_v29, %v5541_v1  ;;  %v5656_v12 = vadd.f32 %v5655_v22, %v5654_v60  ;;  %v8718_v60 = vld [vmem:[#allocation14_spill] sm:$0xff] }
 0x6cb   : > { %v4511_v44 = vadd.f32 %v5656_v12, %v5544_v19  ;;  %v4616_v52 = vadd.f32 %v4508_v8, %v8712_v5  ;;  %v8719_v19 = vld [vmem:[#allocation15_spill] sm:$0xff] }
 0x6cc   : > { %v5545_v18 = vpop.f32.mrb[208].mxu0 }
 0x6cd   : > { %v4617_v47 = vadd.f32 %v4511_v44, %v8713_v31  ;;  %v5546_v23 = vpop.f32.mrb[209].mxu0 }
 0x6ce   : > { %v5547_v34 = vadd.f32 %v5546_v23, %v5545_v18  ;;  %v5548_v58 = vpop.f32.mrb[210].mxu0 }
 0x6cf   : > { %v5220_v20 = vpack.c.bf16 %v4617_v47, %v4616_v52  ;;  %v5549_v13 = vpop.f32.mrb[211].mxu0 }
 0x6d0   : > { %v5550_v14 = vadd.f32 %v5549_v13, %v5548_v58 }
 0x6d1   : > { %5284 = vst [vmem:[%s8481_s17 + $0x18] sm:$0xff] %v5220_v20  }
 0x6da   : > { %v5657_v36 = vpop.f32.mrb[208].mxu1 }
 0x6db   : > { %v5658_v38 = vpop.f32.mrb[209].mxu1 }
 0x6dc   : > { %v5659_v6 = vadd.f32 %v5658_v38, %v5657_v36  ;;  %v5660_v50 = vpop.f32.mrb[210].mxu1 }
 0x6dd   : > { %v5661_v0 = vpop.f32.mrb[211].mxu1 }
 0x6de   : > { %v4516_v28 = vadd.f32 %v5659_v6, %v5547_v34  ;;  %v5662_v46 = vadd.f32 %v5661_v0, %v5660_v50  ;;  %v8720_v6 = vld [vmem:[#allocation17_spill] sm:$0xff]  ;;  %v8721_v0 = vld [vmem:[#allocation16_spill] sm:$0xff] }
 0x6e0   : > { %v4519_v63 = vadd.f32 %v5662_v46, %v5550_v14  ;;  %v4618_v48 = vadd.f32 %v4516_v28, %v8714_v37 }
 0x6e1   : > { %v5551_v30 = vpop.f32.mrb[212].mxu0 }
 0x6e2   : > { %v4619_v10 = vadd.f32 %v4519_v63, %v8715_v56  ;;  %v5663_v49 = vpop.f32.mrb[212].mxu1  ;;  %v5552_v59 = vpop.f32.mrb[213].mxu0 }
 0x6e3   : > { %v5553_v2 = vadd.f32 %v5552_v59, %v5551_v30  ;;  %v5664_v16 = vpop.f32.mrb[213].mxu1  ;;  %v5554_v7 = vpop.f32.mrb[214].mxu0 }
 0x6e4   : > { %v5225_v41 = vpack.c.bf16 %v4619_v10, %v4618_v48  ;;  %v5665_v54 = vadd.f32 %v5664_v16, %v5663_v49  ;;  %v5666_v40 = vpop.f32.mrb[214].mxu1  ;;  %v5555_v32 = vpop.f32.mrb[215].mxu0 }
 0x6e5   : > { %v5556_v21 = vadd.f32 %v5555_v32, %v5554_v7  ;;  %v5667_v39 = vpop.f32.mrb[215].mxu1 }
 0x6e6   : > { %5285 = vst [vmem:[%s8481_s17 + $0x20] sm:$0xff] %v5225_v41   ;;  %v4524_v57 = vadd.f32 %v5665_v54, %v5553_v2  ;;  %v5668_v43 = vadd.f32 %v5667_v39, %v5666_v40  ;;  %v8722_v40 = vld [vmem:[#allocation18_spill] sm:$0xff] }
 0x6e8   : > { %v4527_v15 = vadd.f32 %v5668_v43, %v5556_v21  ;;  %v4620_v53 = vadd.f32 %v4524_v57, %v8716_v62  ;;  %v8723_v21 = vld [vmem:[#allocation19_spill] sm:$0xff] }
 0x6ea   : > { %v4621_v61 = vadd.f32 %v4527_v15, %v8717_v33 }
 0x6ec   : > { %v5230_v24 = vpack.c.bf16 %v4621_v61, %v4620_v53 }
 0x6ee   : > { %5286 = vst [vmem:[%s8481_s17 + $0x28] sm:$0xff] %v5230_v24  }
 0x6f7   : > { %v5557_v51 = vpop.f32.mrb[216].mxu0 }
 0x6f8   : > { %v5669_v26 = vpop.f32.mrb[216].mxu1  ;;  %v5558_v25 = vpop.f32.mrb[217].mxu0 }
 0x6f9   : > { %v5559_v9 = vadd.f32 %v5558_v25, %v5557_v51  ;;  %v5670_v11 = vpop.f32.mrb[217].mxu1  ;;  %v5560_v17 = vpop.f32.mrb[218].mxu0 }
 0x6fa   : > { %v5671_v3 = vadd.f32 %v5670_v11, %v5669_v26  ;;  %v5672_v4 = vpop.f32.mrb[218].mxu1  ;;  %v5561_v27 = vpop.f32.mrb[219].mxu0 }
 0x6fb   : > { %v5562_v55 = vadd.f32 %v5561_v27, %v5560_v17  ;;  %v5673_v1 = vpop.f32.mrb[219].mxu1  ;;  %v8724_v27 = vld [vmem:[#allocation21_spill] sm:$0xff] }
 0x6fc   : > { %v4532_v42 = vadd.f32 %v5671_v3, %v5559_v9  ;;  %v5674_v45 = vadd.f32 %v5673_v1, %v5672_v4  ;;  %v8725_v1 = vld [vmem:[#allocation20_spill] sm:$0xff] }
 0x6fe   : > { %v4535_v29 = vadd.f32 %v5674_v45, %v5562_v55  ;;  %v4622_v35 = vadd.f32 %v4532_v42, %v8718_v60 }
 0x700   : > { %v4623_v22 = vadd.f32 %v4535_v29, %v8719_v19 }
 0x702   : > { %v5235_v8 = vpack.c.bf16 %v4623_v22, %v4622_v35 }
 0x704   : > { %5287 = vst [vmem:[%s8481_s17 + $0x30] sm:$0xff] %v5235_v8  }
 0x70c   : > { %v5563_v12 = vpop.f32.mrb[220].mxu0 }
 0x70d   : > { %v5675_v44 = vpop.f32.mrb[220].mxu1  ;;  %v5564_v18 = vpop.f32.mrb[221].mxu0 }
 0x70e   : > { %v5565_v5 = vadd.f32 %v5564_v18, %v5563_v12  ;;  %v5676_v52 = vpop.f32.mrb[221].mxu1  ;;  %v5566_v31 = vpop.f32.mrb[222].mxu0 }
 0x70f   : > { %v5677_v47 = vadd.f32 %v5676_v52, %v5675_v44  ;;  %v5678_v23 = vpop.f32.mrb[222].mxu1  ;;  %v5567_v34 = vpop.f32.mrb[223].mxu0 }
 0x710   : > { %v5568_v58 = vadd.f32 %v5567_v34, %v5566_v31  ;;  %v5679_v20 = vpop.f32.mrb[223].mxu1  ;;  %v8726_v34 = vld [vmem:[#allocation22_spill] sm:$0xff] }
 0x711   : > { %v4540_v13 = vadd.f32 %v5677_v47, %v5565_v5  ;;  %v5680_v14 = vadd.f32 %v5679_v20, %v5678_v23  ;;  %v8727_v20 = vld [vmem:[#allocation23_spill] sm:$0xff] }
 0x713   : > { %v4543_v36 = vadd.f32 %v5680_v14, %v5568_v58  ;;  %v4624_v50 = vadd.f32 %v4540_v13, %v8720_v6 }
 0x714   : > { %v5569_v38 = vpop.f32.mrb[224].mxu0 }
 0x715   : > { %v4625_v28 = vadd.f32 %v4543_v36, %v8721_v0  ;;  %v5681_v46 = vpop.f32.mrb[224].mxu1  ;;  %v5570_v63 = vpop.f32.mrb[225].mxu0 }
 0x716   : > { %v5571_v30 = vadd.f32 %v5570_v63, %v5569_v38  ;;  %v5682_v37 = vpop.f32.mrb[225].mxu1  ;;  %v5572_v48 = vpop.f32.mrb[226].mxu0 }
 0x717   : > { %v5240_v56 = vpack.c.bf16 %v4625_v28, %v4624_v50  ;;  %v5683_v10 = vadd.f32 %v5682_v37, %v5681_v46  ;;  %v5684_v49 = vpop.f32.mrb[226].mxu1  ;;  %v5573_v59 = vpop.f32.mrb[227].mxu0 }
 0x718   : > { %v5574_v2 = vadd.f32 %v5573_v59, %v5572_v48  ;;  %v5685_v16 = vpop.f32.mrb[227].mxu1 }
 0x719   : > { %5288 = vst [vmem:[%s8481_s17 + $0x38] sm:$0xff] %v5240_v56   ;;  %v4548_v7 = vadd.f32 %v5683_v10, %v5571_v30  ;;  %v5686_v41 = vadd.f32 %v5685_v16, %v5684_v49  ;;  %v8728_v49 = vld [vmem:[#allocation25_spill] sm:$0xff] }
 0x71b   : > { %v4551_v54 = vadd.f32 %v5686_v41, %v5574_v2  ;;  %v4626_v32 = vadd.f32 %v4548_v7, %v8722_v40  ;;  %v8729_v2 = vld [vmem:[#allocation24_spill] sm:$0xff] }
 0x71d   : > { %v4627_v39 = vadd.f32 %v4551_v54, %v8723_v21 }
 0x71f   : > { %v5245_v57 = vpack.c.bf16 %v4627_v39, %v4626_v32 }
 0x721   : > { %5289 = vst [vmem:[%s8481_s17 + $0x40] sm:$0xff] %v5245_v57  }
 0x729   : > { %v5575_v43 = vpop.f32.mrb[228].mxu0 }
 0x72a   : > { %v5687_v15 = vpop.f32.mrb[228].mxu1  ;;  %v5576_v62 = vpop.f32.mrb[229].mxu0 }
 0x72b   : > { %v5577_v53 = vadd.f32 %v5576_v62, %v5575_v43  ;;  %v5688_v33 = vpop.f32.mrb[229].mxu1  ;;  %v5578_v61 = vpop.f32.mrb[230].mxu0 }
 0x72c   : > { %v5689_v24 = vadd.f32 %v5688_v33, %v5687_v15  ;;  %v5690_v51 = vpop.f32.mrb[230].mxu1  ;;  %v5579_v26 = vpop.f32.mrb[231].mxu0 }
 0x72d   : > { %v5580_v25 = vadd.f32 %v5579_v26, %v5578_v61  ;;  %v5691_v9 = vpop.f32.mrb[231].mxu1  ;;  %v8730_v26 = vld [vmem:[#allocation26_spill] sm:$0xff] }
 0x72e   : > { %v4556_v11 = vadd.f32 %v5689_v24, %v5577_v53  ;;  %v5692_v17 = vadd.f32 %v5691_v9, %v5690_v51  ;;  %v8731_v9 = vld [vmem:[#allocation27_spill] sm:$0xff] }
 0x730   : > { %v4559_v3 = vadd.f32 %v5692_v17, %v5580_v25  ;;  %v4628_v55 = vadd.f32 %v4556_v11, %v8724_v27 }
 0x731   : > { %v5581_v4 = vpop.f32.mrb[232].mxu0 }
 0x732   : > { %v4629_v42 = vadd.f32 %v4559_v3, %v8725_v1  ;;  %v5582_v45 = vpop.f32.mrb[233].mxu0 }
 0x733   : > { %v5583_v29 = vadd.f32 %v5582_v45, %v5581_v4  ;;  %v5584_v60 = vpop.f32.mrb[234].mxu0 }
 0x734   : > { %v5250_v35 = vpack.c.bf16 %v4629_v42, %v4628_v55  ;;  %v5585_v19 = vpop.f32.mrb[235].mxu0 }
 0x735   : > { %v5586_v22 = vadd.f32 %v5585_v19, %v5584_v60 }
 0x736   : > { %5290 = vst [vmem:[%s8481_s17 + $0x48] sm:$0xff] %v5250_v35  }
 0x73f   : > { %v5693_v8 = vpop.f32.mrb[232].mxu1 }
 0x740   : > { %v5694_v12 = vpop.f32.mrb[233].mxu1 }
 0x741   : > { %v5695_v44 = vadd.f32 %v5694_v12, %v5693_v8  ;;  %v5696_v18 = vpop.f32.mrb[234].mxu1  ;;  %v8732_v12 = vld [vmem:[#allocation29_spill] sm:$0xff] }
 0x742   : > { %v5697_v5 = vpop.f32.mrb[235].mxu1 }
 0x743   : > { %v4564_v52 = vadd.f32 %v5695_v44, %v5583_v29  ;;  %v5698_v31 = vadd.f32 %v5697_v5, %v5696_v18  ;;  %v8733_v18 = vld [vmem:[#allocation28_spill] sm:$0xff] }
 0x745   : > { %v4567_v47 = vadd.f32 %v5698_v31, %v5586_v22  ;;  %v4630_v58 = vadd.f32 %v4564_v52, %v8726_v34 }
 0x746   : > { %v5587_v23 = vpop.f32.mrb[236].mxu0 }
 0x747   : > { %v4631_v13 = vadd.f32 %v4567_v47, %v8727_v20  ;;  %v5699_v14 = vpop.f32.mrb[236].mxu1  ;;  %v5588_v36 = vpop.f32.mrb[237].mxu0 }
 0x748   : > { %v5589_v38 = vadd.f32 %v5588_v36, %v5587_v23  ;;  %v5700_v6 = vpop.f32.mrb[237].mxu1  ;;  %v5590_v50 = vpop.f32.mrb[238].mxu0 }
 0x749   : > { %v5255_v0 = vpack.c.bf16 %v4631_v13, %v4630_v58  ;;  %v5701_v28 = vadd.f32 %v5700_v6, %v5699_v14  ;;  %v5702_v46 = vpop.f32.mrb[238].mxu1  ;;  %v5591_v63 = vpop.f32.mrb[239].mxu0 }
 0x74a   : > { %v5592_v30 = vadd.f32 %v5591_v63, %v5590_v50  ;;  %v5703_v37 = vpop.f32.mrb[239].mxu1 }
 0x74b   : > { %5291 = vst [vmem:[%s8481_s17 + $0x50] sm:$0xff] %v5255_v0   ;;  %v4572_v48 = vadd.f32 %v5701_v28, %v5589_v38  ;;  %v5704_v56 = vadd.f32 %v5703_v37, %v5702_v46  ;;  %v8734_v46 = vld [vmem:[#allocation30_spill] sm:$0xff] }
 0x74d   : > { %v4575_v10 = vadd.f32 %v5704_v56, %v5592_v30  ;;  %v4632_v59 = vadd.f32 %v4572_v48, %v8728_v49  ;;  %v8735_v30 = vld [vmem:[#allocation31_spill] sm:$0xff] }
 0x74f   : > { %v4633_v16 = vadd.f32 %v4575_v10, %v8729_v2 }
 0x751   : > { %v5260_v7 = vpack.c.bf16 %v4633_v16, %v4632_v59 }
 0x753   : > { %5292 = vst [vmem:[%s8481_s17 + $0x58] sm:$0xff] %v5260_v7  }
 0x75b   : > { %v5593_v41 = vpop.f32.mrb[240].mxu0 }
 0x75c   : > { %v5705_v54 = vpop.f32.mrb[240].mxu1  ;;  %v5594_v40 = vpop.f32.mrb[241].mxu0 }
 0x75d   : > { %v5595_v32 = vadd.f32 %v5594_v40, %v5593_v41  ;;  %v5706_v21 = vpop.f32.mrb[241].mxu1  ;;  %v5596_v39 = vpop.f32.mrb[242].mxu0 }
 0x75e   : > { %v5707_v57 = vadd.f32 %v5706_v21, %v5705_v54  ;;  %v5708_v43 = vpop.f32.mrb[242].mxu1  ;;  %v5597_v15 = vpop.f32.mrb[243].mxu0 }
 0x75f   : > { %v5598_v62 = vadd.f32 %v5597_v15, %v5596_v39  ;;  %v5709_v53 = vpop.f32.mrb[243].mxu1 }
 0x760   : > { %v4580_v33 = vadd.f32 %v5707_v57, %v5595_v32  ;;  %v5710_v61 = vadd.f32 %v5709_v53, %v5708_v43  ;;  %v8736_v43 = vld [vmem:[#allocation33_spill] sm:$0xff] }
 0x762   : > { %v4583_v24 = vadd.f32 %v5710_v61, %v5598_v62  ;;  %v4634_v25 = vadd.f32 %v4580_v33, %v8730_v26  ;;  %v8737_v62 = vld [vmem:[#allocation32_spill] sm:$0xff] }
 0x763   : > { %v5599_v51 = vpop.f32.mrb[244].mxu0 }
 0x764   : > { %v4635_v11 = vadd.f32 %v4583_v24, %v8731_v9  ;;  %v5711_v17 = vpop.f32.mrb[244].mxu1  ;;  %v5600_v3 = vpop.f32.mrb[245].mxu0 }
 0x765   : > { %v5601_v4 = vadd.f32 %v5600_v3, %v5599_v51  ;;  %v5712_v27 = vpop.f32.mrb[245].mxu1  ;;  %v5602_v55 = vpop.f32.mrb[246].mxu0 }
 0x766   : > { %v5265_v1 = vpack.c.bf16 %v4635_v11, %v4634_v25  ;;  %v5713_v42 = vadd.f32 %v5712_v27, %v5711_v17  ;;  %v5714_v45 = vpop.f32.mrb[246].mxu1  ;;  %v5603_v29 = vpop.f32.mrb[247].mxu0 }
 0x767   : > { %v5604_v60 = vadd.f32 %v5603_v29, %v5602_v55  ;;  %v5715_v35 = vpop.f32.mrb[247].mxu1 }
 0x768   : > { %5293 = vst [vmem:[%s8481_s17 + $0x60] sm:$0xff] %v5265_v1   ;;  %v4588_v19 = vadd.f32 %v5713_v42, %v5601_v4  ;;  %v5716_v22 = vadd.f32 %v5715_v35, %v5714_v45 }
 0x76a   : > { %v4591_v8 = vadd.f32 %v5716_v22, %v5604_v60  ;;  %v4636_v44 = vadd.f32 %v4588_v19, %v8732_v12 }
 0x76c   : > { %v4637_v5 = vadd.f32 %v4591_v8, %v8733_v18 }
 0x76e   : > { %v5270_v52 = vpack.c.bf16 %v4637_v5, %v4636_v44 }
 0x770   : > { %5294 = vst [vmem:[%s8481_s17 + $0x68] sm:$0xff] %v5270_v52  }
 0x778   : > { %v5605_v31 = vpop.f32.mrb[248].mxu0 }
 0x779   : > { %v5717_v47 = vpop.f32.mrb[248].mxu1  ;;  %v5606_v23 = vpop.f32.mrb[249].mxu0 }
 0x77a   : > { %v5607_v34 = vadd.f32 %v5606_v23, %v5605_v31  ;;  %v5718_v58 = vpop.f32.mrb[249].mxu1  ;;  %v5608_v20 = vpop.f32.mrb[250].mxu0 }
 0x77b   : > { %v5719_v13 = vadd.f32 %v5718_v58, %v5717_v47  ;;  %v5720_v14 = vpop.f32.mrb[250].mxu1  ;;  %v5609_v36 = vpop.f32.mrb[251].mxu0 }
 0x77c   : > { %v5610_v38 = vadd.f32 %v5609_v36, %v5608_v20  ;;  %v5721_v6 = vpop.f32.mrb[251].mxu1 }
 0x77d   : > { %v4596_v50 = vadd.f32 %v5719_v13, %v5607_v34  ;;  %v5722_v0 = vadd.f32 %v5721_v6, %v5720_v14 }
 0x77f   : > { %v4599_v28 = vadd.f32 %v5722_v0, %v5610_v38  ;;  %v4638_v63 = vadd.f32 %v4596_v50, %v8734_v46 }
 0x781   : > { %v4639_v37 = vadd.f32 %v4599_v28, %v8735_v30 }
 0x783   : > { %v5275_v48 = vpack.c.bf16 %v4639_v37, %v4638_v63 }
 0x785   : > { %5295 = vst [vmem:[%s8481_s17 + $0x70] sm:$0xff] %v5275_v48  }
 0x78d   : > { %v5611_v56 = vpop.f32.mrb[252].mxu0 }
 0x78e   : > { %v5723_v10 = vpop.f32.mrb[252].mxu1  ;;  %v5612_v49 = vpop.f32.mrb[253].mxu0 }
 0x78f   : > { %v5613_v59 = vadd.f32 %v5612_v49, %v5611_v56  ;;  %v5724_v2 = vpop.f32.mrb[253].mxu1  ;;  %v5614_v16 = vpop.f32.mrb[254].mxu0 }
 0x790   : > { %v5725_v7 = vadd.f32 %v5724_v2, %v5723_v10  ;;  %v5726_v41 = vpop.f32.mrb[254].mxu1  ;;  %v5615_v54 = vpop.f32.mrb[255].mxu0 }
 0x791   : > { %v5616_v40 = vadd.f32 %v5615_v54, %v5614_v16  ;;  %v5727_v32 = vpop.f32.mrb[255].mxu1 }
 0x792   : > { %v4604_v21 = vadd.f32 %v5725_v7, %v5613_v59  ;;  %v5728_v39 = vadd.f32 %v5727_v32, %v5726_v41 }
 0x794   : > { %v4607_v57 = vadd.f32 %v5728_v39, %v5616_v40  ;;  %v4640_v15 = vadd.f32 %v4604_v21, %v8736_v43 }
 0x796   : > { %v4641_v53 = vadd.f32 %v4607_v57, %v8737_v62 }
 0x798   : > { %v5280_v33 = vpack.c.bf16 %v4641_v53, %v4640_v15 }
 0x79a   : > { %5296 = vst [vmem:[%s8481_s17 + $0x78] sm:$0xff] %v5280_v33  }
 0x79b PF: > { %s17_s24 = sadd.s32 1, %s6714_s24  }
 0x79c   : > { %p14_p4 = scmp.ge.s32.totalorder %s17_s24, 4  }
 0x79e   :  { %16 = sbr.rel (!%p14_p4) target bundleno = 1 (0x1), region = 84 }

// kernel: pi0_forward.7
= control target key start
LH: loop header
LB: loop body
LE: loop exit
PB: predicated region body
PF: predicated region fallthrough
CT: control target
= control target key end

     0   :  { %v240_v1 = vmov 0.0   ;;  %vm241_vm0 = vmmov 0   ;;  %s318_s0 = inlined_call_operand.vmem [shape: bf16[16,128], index: 0, kind: input, shape index: {}]   ;;  %s319_s1 = inlined_call_operand.vmem [shape: bf16[128,128], index: 1, kind: input, shape index: {}]   ;;  %s320_s2 = inlined_call_operand.vmem [shape: f32[1,128], index: 2, kind: input, shape index: {}]   ;;  %s321_s3 = inlined_call_operand.vmem [shape: f32[16,128], index: 3, kind: input, shape index: {}]   ;;  %s322_s4 = inlined_call_operand.hbm [shape: f32[16,128], index: 4, kind: output, shape index: {}]  }
   0x1   :  { %v207_v0 = vld [vmem:[%s319_s1] sm:$0xff]   ;;  %182 = vmatprep.subr.bf16.mxu0 %v240_v1  ;;  %v208_v2 = vld [vmem:[%s319_s1 + $0x8] sm:$0xff]   ;;  %198 = vmatprep.mubr.msk.bf16.mxu0 %vm241_vm0, %v240_v1  ;;  %v209_v3 = vld [vmem:[%s319_s1 + $0x10] sm:$0xff]  }
   0x2   :  { %183 = vmatpush3.bf16.msra.mxu0 %v207_v0 }
   0x3   :  { %184 = vmatprep.subr.bf16.mxu0 %v240_v1 }
   0x6   :  { %185 = vmatpush3.bf16.msra.mxu0 %v208_v2 }
   0x7   :  { %186 = vmatprep.subr.bf16.mxu0 %v240_v1 }
   0x8   :  { %9 = vsyncpa [#allocation3], 0  ;;  %v210_v4 = vld [vmem:[%s319_s1 + $0x18] sm:$0xff]   ;;  %v211_v5 = vld [vmem:[%s319_s1 + $0x20] sm:$0xff]  }
   0x9   :  { %v212_v6 = vld [vmem:[%s319_s1 + $0x28] sm:$0xff]   ;;  %v213_v7 = vld [vmem:[%s319_s1 + $0x30] sm:$0xff]   ;;  %v214_v8 = vld [vmem:[%s319_s1 + $0x38] sm:$0xff]  }
   0xa   :  { %187 = vmatpush3.bf16.msra.mxu0 %v209_v3  ;;  %v215_v9 = vld [vmem:[%s318_s0] sm:$0xff]   ;;  %v140_v16 = vld [vmem:[%s321_s3 + $0x8] sm:$0xff]  ;;  %s242_s0 = smov [#allocation2]  }
   0xb   :  { %188 = vmatprep.subr.bf16.mxu0 %v240_v1  ;;  %v163_v10 = vld [vmem:[%s320_s2] ss:$0 sm:$0xff]  ;;  %s152_s12 = sshll.u32 %s242_s0, 4  ;;  %s153_s12 = int_to_ptr.vmem [resolvable:$true] %s152_s12 }
   0xc   :  { %v139_v12 = vld [vmem:[%s321_s3] sm:$0xff]  ;;  %s216_s2 = scalar_lea.vmem %s153_s12, 256  ;;  %p221_p1 = scmp.lt.s32.totalorder %s153_s12, %s153_s12 }
   0xd   :  { %p217_p0 = scmp.ne.s32.totalorder %s153_s12, %s216_s2  ;;  %p222_p2 = scmp.lt.s32.totalorder %s216_s2, %s216_s2 }
   0xe   :  { %189 = vmatpush3.bf16.msra.mxu0 %v210_v4 }
   0xf   :  { %190 = vmatprep.subr.bf16.mxu0 %v240_v1  ;;  %p223_p3 = por %p222_p2, %p221_p1 }
  0x11   :  { %p224_p4 = pnand %p223_p3, %p217_p0 }
  0x12   :  { %191 = vmatpush3.bf16.msra.mxu0 %v211_v5 }
  0x13   :  { %192 = vmatprep.subr.bf16.mxu0 %v240_v1 }
  0x16   :  { %193 = vmatpush3.bf16.msra.mxu0 %v212_v6 }
  0x17   :  { %194 = vmatprep.subr.bf16.mxu0 %v240_v1 }
  0x1a   :  { %195 = vmatpush3.bf16.msra.mxu0 %v213_v7 }
  0x1b   :  { %196 = vmatprep.subr.bf16.mxu0 %v240_v1 }
  0x1e   :  { %197 = vmatpush3.bf16.msra.mxu0 %v214_v8 }
  0x21   :  { %199 = vmatmul.mubr.bf16.vlgmr.msra.gmra.mrb[0].mxu0 %v215_v9 }
  0xf4   :  { %v132_v11 = vpop.f32.mrb[0].mxu0 }
  0xf5   :  { %v133_v13 = vadd.f32 %v163_v10, %v132_v11  ;;  %v200_v14 = vpop.f32.mrb[1].mxu0 }
  0xf6   :  { %v135_v15 = vpop.f32.mrb[2].mxu0 }
  0xf7   :  { %v141_v17 = vsub.f32 %v139_v12, %v133_v13  ;;  %v136_v18 = vadd.f32 %v163_v10, %v135_v15  ;;  %v201_v19 = vpop.f32.mrb[3].mxu0 }
  0xf9   :  { %v143_v20 = vmul.f32 %v141_v17, %v141_v17  ;;  %v142_v21 = vsub.f32 %v140_v16, %v136_v18 }
  0xfb   :  { %145 = vst [vmem:[#allocation2] sm:$0xff] %v143_v20  ;;  %v144_v22 = vmul.f32 %v142_v21, %v142_v21 }
  0xfd   :  { %146 = vst [vmem:[#allocation2 + $0x8] sm:$0xff] %v144_v22 }
  0xfe   :  { %227 = shalt.err (!%p224_p4)
}
  0xff   :  { %s228_s14 = scalar_lea.hbm %s322_s4, 256 }
 0x100   :  { %p229_p5 = scmp.ne.s32.totalorder %s322_s4, %s228_s14  ;;  %p232_p6 = scmp.lt.u32.totalorder %s228_s14, %s322_s4 }
 0x102   :  { %p234_p7 = pnand %p232_p6, %p229_p5 }
 0x104   :  { %237 = shalt.err (!%p234_p7)
}
 0x105   :  { %s243_s19 = smov 128   ;;  %s244_s20 = smov 8  }
 0x106   :  { %158 = dma.vmem_to_hbm [thread:$0]  %s153_s12, 256, %s322_s4, [#allocation3], %s243_s19, %s243_s19, %s244_s20  }
 0x107   :  { %238 = dma.done.wait [#allocation3], 256  }
 0x108   :  { %239 = vsyncadd [#allocation3], 4294967040 }
 0x109   :  { %162 = vsyncpa [#allocation3], 1 }

</bundles_post_ra>
